<compile_context>
chip_gen: v7x
topology: tpu7x:2x2x1
jax: 0.10.0
libtpu: 0.0.40
codegen_flags: <defaults>
</compile_context>

<pallas_src>
import functools

import jax
import jax.numpy as jnp
from jax.experimental import pallas as pl
from jax.experimental.pallas import tpu as pltpu

NEG_SLOPE = 0.01   # torch.nn.functional.leaky_relu default negative_slope
LANE = 128
SUB = 8


def _leaky(x):
    return jnp.where(x > 0, x, NEG_SLOPE * x)


# ------------------------------ fused Pallas kernel ------------------------------

def _dqn_kernel(x_ref, w1_ref, b1_ref, w2_ref, b2_ref, w3_ref, b3_ref,
                w4_ref, b4_ref, w5_ref, b5_ref, o_ref):
    # layer1: Conv2d(C, 32, k=1) folded into a row-permuted block-diagonal matmul
    # (rows ordered c*HW+p to match the free NCHW reshape), f32 in / f32 acc.
    h = _leaky(jnp.dot(x_ref[...], w1_ref[...],
                       preferred_element_type=jnp.float32) + b1_ref[...])

    # layer2: Conv2d(32, 64, k=1) as a block-diagonal (288 x 576) matmul.
    # TODO(synk): dropout2d(p=0.05) is the identity at inference; not emulated.
    h = _leaky(jnp.dot(h.astype(jnp.bfloat16), w2_ref[...],
                       preferred_element_type=jnp.float32) + b2_ref[...])

    # layer3: Linear(64*HW, 1024) as ONE K=576 matmul (PyTorch's channel-major
    # flatten absorbed by permuting w3's rows at init).
    h = _leaky(jnp.dot(h.astype(jnp.bfloat16), w3_ref[...],
                       preferred_element_type=jnp.float32) + b3_ref[...])

    # layer4: Linear(1024, 512), bf16 in / f32 acc.
    h = _leaky(jnp.dot(h.astype(jnp.bfloat16), w4_ref[...],
                       preferred_element_type=jnp.float32) + b4_ref[...])

    # fc5: Linear(512, n_actions) zero-padded to 128 lanes -> unmasked final store.
    o_ref[...] = jnp.dot(h.astype(jnp.bfloat16), w5_ref[...],
                         preferred_element_type=jnp.float32) + b5_ref[...]


def _resident(shape):
    """Weight BlockSpec: full array, constant block index -> VMEM-resident across grid."""
    return pl.BlockSpec(shape, lambda i: (0, 0))


# --------------------------------- wrapper (glue) --------------------------------

def dqn_forward(x_nchw, params, *, n_actions, batch_tile=256):
    B, C, H, W = x_nchw.shape
    HW = H * W
    Cx = C * HW

    # Round batch up to the sublane multiple, then to a multiple of the batch tile.
    bp8 = ((B + SUB - 1) // SUB) * SUB
    tb = min(batch_tile, bp8)
    bpad = ((bp8 + tb - 1) // tb) * tb
    grid = (bpad // tb,)

    # NCHW -> (B, C*HW) is a FREE reshape (channel-major flatten); layer1's weight
    # rows were permuted at init to match, so no wrapper transpose is needed.
    x_rows = x_nchw.reshape(B, Cx)
    if bpad != B:
        x_rows = jnp.pad(x_rows, ((0, bpad - B), (0, 0)))

    n1, n2 = HW * 32, HW * 64
    flops = 2 * bpad * (Cx * n1 + n1 * n2 + n2 * 1024 + 1024 * 512 + 512 * LANE)
    w_bytes = (params["w1"].size * 4 + params["w2"].size * 2 + params["w3"].size * 2
               + params["w4"].size * 2 + params["w5"].size * 2)
    b_bytes = 4 * (n1 + n2 + 1024 + 512 + LANE)
    bytes_accessed = int(w_bytes + b_bytes + bpad * Cx * 4 + bpad * LANE * 4)

    out = pl.pallas_call(
        _dqn_kernel,
        out_shape=jax.ShapeDtypeStruct((bpad, LANE), jnp.float32),
        grid=grid,
        in_specs=[
            pl.BlockSpec((tb, Cx), lambda i: (i, 0)),        # streamed per grid step
            _resident(params["w1"].shape), _resident(params["b1"].shape),
            _resident(params["w2"].shape), _resident(params["b2"].shape),
            _resident(params["w3"].shape), _resident(params["b3"].shape),
            _resident(params["w4"].shape), _resident(params["b4"].shape),
            _resident(params["w5"].shape), _resident(params["b5"].shape),
        ],
        out_specs=pl.BlockSpec((tb, LANE), lambda i: (i, 0)),
        compiler_params=pltpu.CompilerParams(
            dimension_semantics=("parallel",)),              # v7x megacore; no-op on v5e/v6e
        cost_estimate=pl.CostEstimate(flops=flops, transcendentals=0,
                                      bytes_accessed=bytes_accessed),
    )(x_rows, params["w1"], params["b1"], params["w2"], params["b2"],
      params["w3"], params["b3"], params["w4"], params["b4"],
      params["w5"], params["b5"])

    return out[:B, :n_actions]


# ---------------------------- deterministic parameters ---------------------------

def init_params(key, channels=2, insize=3, n_actions=6):
    H = W = insize
    HW = H * W
    flat = 64 * HW  # conv_out(conv_out(insize, ks=1), ks=1) == insize -> 64 * insize**2
    ks = jax.random.split(key, 5)

    def kaiming_uniform(k, fan_in, shape):
        bound = (6.0 / fan_in) ** 0.5
        return jax.random.uniform(k, shape, jnp.float32, -bound, bound)

    w1 = kaiming_uniform(ks[0], channels, (channels, 32))   # Conv2d(2, 32, k=1) as (Cin, Cout)
    w2 = kaiming_uniform(ks[1], 32, (32, 64))               # Conv2d(32, 64, k=1)
    w3 = kaiming_uniform(ks[2], flat, (flat, 1024))         # Linear(576, 1024), rows = c*HW + p
    w4 = kaiming_uniform(ks[3], 1024, (1024, 512))          # Linear(1024, 512)
    w5 = kaiming_uniform(ks[4], 512, (512, n_actions))      # Linear(512, n_actions)
    raw = dict(w1=w1, w2=w2, w3=w3, w4=w4, w5=w5)

    # --- all padding / permutation / block-diag packing done ONCE here ---
    eye = jnp.eye(HW, dtype=jnp.float32)
    # layer1: block-diag over pixels with ROWS permuted to channel-major input order:
    #   w1_bd[c*HW + p, p*32 + j] = w1[c, j]
    w1_bd = jnp.einsum('pq,cj->cpqj', eye, w1).reshape(channels * HW, HW * 32)
    # layer2: plain block-diag over pixels:
    #   w2_bd[p*32 + i, p*64 + j] = w2[i, j]
    w2_bd = jnp.einsum('pq,ij->piqj', eye, w2).reshape(HW * 32, HW * 64).astype(jnp.bfloat16)
    # layer3: reorder rows so kernel column order p*64+c matches PyTorch flatten c*HW+p.
    perm = (jnp.arange(HW)[:, None] + jnp.arange(64)[None, :] * HW).reshape(-1)
    w3k = w3[perm, :].astype(jnp.bfloat16)
    w4b = w4.astype(jnp.bfloat16)
    # fc5 padded to 128 output lanes (zero columns) for an unmasked final store.
    w5_p = jnp.zeros((512, LANE), jnp.float32).at[:, :n_actions].set(w5).astype(jnp.bfloat16)
    b5_p = jnp.zeros((1, LANE), jnp.float32).at[:, :n_actions].set(0.01)

    bias = lambda n: jnp.full((1, n), 0.01, jnp.float32)    # model.bias.data.fill_(0.01)
    packed = dict(w1=w1_bd, b1=bias(HW * 32),
                  w2=w2_bd, b2=bias(HW * 64),
                  w3=w3k, b3=bias(1024),
                  w4=w4b, b4=bias(512),
                  w5=w5_p, b5=b5_p)
    return packed, raw


# -------------------------------- pure-JAX reference ------------------------------

def ref_forward(x_nchw, raw, n_actions):
    """Intended DQN semantics from the RAW (unpacked) weights, with matching bf16 casts."""
    B, C, H, W = x_nchw.shape
    HW = H * W
    bf = lambda a: a.astype(jnp.bfloat16)
    xp = jnp.transpose(x_nchw, (0, 2, 3, 1)).reshape(B * HW, C)          # per-pixel rows
    h = _leaky(jnp.dot(xp, raw["w1"], preferred_element_type=jnp.float32) + 0.01)
    h = _leaky(jnp.dot(bf(h), bf(raw["w2"]), preferred_element_type=jnp.float32) + 0.01)
    h = h.reshape(B, HW, 64).transpose(0, 2, 1).reshape(B, 64 * HW)      # channel-major flatten
    h = _leaky(jnp.dot(bf(h), bf(raw["w3"]), preferred_element_type=jnp.float32) + 0.01)
    h = _leaky(jnp.dot(bf(h), bf(raw["w4"]), preferred_element_type=jnp.float32) + 0.01)
    return jnp.dot(bf(h), bf(raw["w5"]), preferred_element_type=jnp.float32) + 0.01


if __name__ == "__main__":
    key = jax.random.PRNGKey(0)
    kx, kp, kx2 = jax.random.split(key, 3)

    # network_setup defaults: insize=3, channels=2; fc5 -> 6 actions (bomberman action set).
    C, H, W = 2, 3, 3
    N_ACTIONS = 6
    params, raw = init_params(kp, channels=C, insize=H, n_actions=N_ACTIONS)

    fwd = jax.jit(functools.partial(dqn_forward, n_actions=N_ACTIONS))

    # Small batch (single-state policy evaluation path).
    x_small = jax.random.normal(kx, (2, C, H, W), dtype=jnp.float32)
    out_small = jax.block_until_ready(fwd(x_small, params))
    assert out_small.shape == (2, N_ACTIONS), out_small.shape
    ref_small = ref_forward(x_small, raw, N_ACTIONS)
    if not jnp.allclose(out_small, ref_small, rtol=2e-3, atol=2e-3):
        raise AssertionError("Pallas output (small batch) does not match JAX reference")

    # Larger batch (replay-buffer scoring): exercises the weight-resident grid
    # (2 tiles of 256 rows, padded rows sliced off).
    x_big = jax.random.normal(kx2, (500, C, H, W), dtype=jnp.float32)
    out_big = jax.block_until_ready(fwd(x_big, params))
    assert out_big.shape == (500, N_ACTIONS), out_big.shape
    ref_big = ref_forward(x_big, raw, N_ACTIONS)
    if not jnp.allclose(out_big, ref_big, rtol=2e-3, atol=2e-3):
        raise AssertionError("Pallas output (large batch) does not match JAX reference")

    print("KERNEL_OK")
</pallas_src>

<mosaic_0001>
module attributes {stable_mosaic.version = 11 : i64} {
  func.func @_dqn_kernel(%arg0: i32, %arg1: memref<8x18xf32, #tpu.memory_space<vmem>>, %arg2: memref<18x288xf32, #tpu.memory_space<vmem>>, %arg3: memref<1x288xf32, #tpu.memory_space<vmem>>, %arg4: memref<288x576xbf16, #tpu.memory_space<vmem>>, %arg5: memref<1x576xf32, #tpu.memory_space<vmem>>, %arg6: memref<576x1024xbf16, #tpu.memory_space<vmem>>, %arg7: memref<1x1024xf32, #tpu.memory_space<vmem>>, %arg8: memref<1024x512xbf16, #tpu.memory_space<vmem>>, %arg9: memref<1x512xf32, #tpu.memory_space<vmem>>, %arg10: memref<512x128xbf16, #tpu.memory_space<vmem>>, %arg11: memref<1x128xf32, #tpu.memory_space<vmem>>, %arg12: memref<8x128xf32, #tpu.memory_space<vmem>>) attributes {dimension_semantics = [#tpu.dimension_semantics<parallel>], iteration_bounds = array<i64: 1>, scalar_prefetch = 0 : i64, scratch_operands = 0 : i64, tpu.core_type = #tpu.core_type<tc>, window_params = [{transform_indices = @transform_0, window_bounds = array<i64: 8, 18>}, {pipeline_mode = #tpu.pipeline_mode<synchronous>, transform_indices = @transform_1, window_bounds = array<i64: 18, 288>}, {pipeline_mode = #tpu.pipeline_mode<synchronous>, transform_indices = @transform_2, window_bounds = array<i64: 1, 288>}, {pipeline_mode = #tpu.pipeline_mode<synchronous>, transform_indices = @transform_3, window_bounds = array<i64: 288, 576>}, {pipeline_mode = #tpu.pipeline_mode<synchronous>, transform_indices = @transform_4, window_bounds = array<i64: 1, 576>}, {pipeline_mode = #tpu.pipeline_mode<synchronous>, transform_indices = @transform_5, window_bounds = array<i64: 576, 1024>}, {pipeline_mode = #tpu.pipeline_mode<synchronous>, transform_indices = @transform_6, window_bounds = array<i64: 1, 1024>}, {pipeline_mode = #tpu.pipeline_mode<synchronous>, transform_indices = @transform_7, window_bounds = array<i64: 1024, 512>}, {pipeline_mode = #tpu.pipeline_mode<synchronous>, transform_indices = @transform_8, window_bounds = array<i64: 1, 512>}, {pipeline_mode = #tpu.pipeline_mode<synchronous>, transform_indices = @transform_9, window_bounds = array<i64: 512, 128>}, {pipeline_mode = #tpu.pipeline_mode<synchronous>, transform_indices = @transform_10, window_bounds = array<i64: 1, 128>}, {transform_indices = @transform_11, window_bounds = array<i64: 8, 128>}]} {
    %c0 = arith.constant 0 : index
    %c0_0 = arith.constant 0 : index
    %0 = vector.load %arg1[%c0, %c0_0] : memref<8x18xf32, #tpu.memory_space<vmem>>, vector<8x18xf32>
    %c0_1 = arith.constant 0 : index
    %c0_2 = arith.constant 0 : index
    %1 = vector.load %arg2[%c0_1, %c0_2] : memref<18x288xf32, #tpu.memory_space<vmem>>, vector<18x288xf32>
    %cst = arith.constant dense<0.000000e+00> : vector<8x288xf32>
    %2 = tpu.matmul %0, %1, %cst {dimension_numbers = #tpu.dot_dimension_numbers<[1], [0], [0], [1], [0, 0, 1, 1], [], []>} : vector<8x18xf32>, vector<18x288xf32>, vector<8x288xf32> -> vector<8x288xf32>
    %c0_3 = arith.constant 0 : index
    %c0_4 = arith.constant 0 : index
    %3 = vector.load %arg3[%c0_3, %c0_4] : memref<1x288xf32, #tpu.memory_space<vmem>>, vector<1x288xf32>
    %4 = vector.broadcast %3 : vector<1x288xf32> to vector<8x288xf32>
    %5 = arith.addf %2, %4 : vector<8x288xf32>
    %cst_5 = arith.constant 0.000000e+00 : f32
    %6 = vector.broadcast %cst_5 : f32 to vector<8x288xf32>
    %7 = arith.cmpf ogt, %5, %6 : vector<8x288xf32>
    %cst_6 = arith.constant 0.00999999977 : f32
    %8 = vector.broadcast %cst_6 : f32 to vector<8x288xf32>
    %9 = arith.mulf %8, %5 : vector<8x288xf32>
    %10 = arith.select %7, %5, %9 : vector<8x288xi1>, vector<8x288xf32>
    %11 = arith.truncf %10 : vector<8x288xf32> to vector<8x288xbf16>
    %c0_7 = arith.constant 0 : index
    %c0_8 = arith.constant 0 : index
    %12 = vector.load %arg4[%c0_7, %c0_8] : memref<288x576xbf16, #tpu.memory_space<vmem>>, vector<288x576xbf16>
    %cst_9 = arith.constant dense<0.000000e+00> : vector<8x576xf32>
    %13 = tpu.matmul %11, %12, %cst_9 {dimension_numbers = #tpu.dot_dimension_numbers<[1], [0], [0], [1], [0, 0, 1, 1], [], []>} : vector<8x288xbf16>, vector<288x576xbf16>, vector<8x576xf32> -> vector<8x576xf32>
    %c0_10 = arith.constant 0 : index
    %c0_11 = arith.constant 0 : index
    %14 = vector.load %arg5[%c0_10, %c0_11] : memref<1x576xf32, #tpu.memory_space<vmem>>, vector<1x576xf32>
    %15 = vector.broadcast %14 : vector<1x576xf32> to vector<8x576xf32>
    %16 = arith.addf %13, %15 : vector<8x576xf32>
    %cst_12 = arith.constant 0.000000e+00 : f32
    %17 = vector.broadcast %cst_12 : f32 to vector<8x576xf32>
    %18 = arith.cmpf ogt, %16, %17 : vector<8x576xf32>
    %cst_13 = arith.constant 0.00999999977 : f32
    %19 = vector.broadcast %cst_13 : f32 to vector<8x576xf32>
    %20 = arith.mulf %19, %16 : vector<8x576xf32>
    %21 = arith.select %18, %16, %20 : vector<8x576xi1>, vector<8x576xf32>
    %22 = arith.truncf %21 : vector<8x576xf32> to vector<8x576xbf16>
    %c0_14 = arith.constant 0 : index
    %c0_15 = arith.constant 0 : index
    %23 = vector.load %arg6[%c0_14, %c0_15] : memref<576x1024xbf16, #tpu.memory_space<vmem>>, vector<576x1024xbf16>
    %cst_16 = arith.constant dense<0.000000e+00> : vector<8x1024xf32>
    %24 = tpu.matmul %22, %23, %cst_16 {dimension_numbers = #tpu.dot_dimension_numbers<[1], [0], [0], [1], [0, 0, 1, 1], [], []>} : vector<8x576xbf16>, vector<576x1024xbf16>, vector<8x1024xf32> -> vector<8x1024xf32>
    %c0_17 = arith.constant 0 : index
    %c0_18 = arith.constant 0 : index
    %25 = vector.load %arg7[%c0_17, %c0_18] : memref<1x1024xf32, #tpu.memory_space<vmem>>, vector<1x1024xf32>
    %26 = vector.broadcast %25 : vector<1x1024xf32> to vector<8x1024xf32>
    %27 = arith.addf %24, %26 : vector<8x1024xf32>
    %cst_19 = arith.constant 0.000000e+00 : f32
    %28 = vector.broadcast %cst_19 : f32 to vector<8x1024xf32>
    %29 = arith.cmpf ogt, %27, %28 : vector<8x1024xf32>
    %cst_20 = arith.constant 0.00999999977 : f32
    %30 = vector.broadcast %cst_20 : f32 to vector<8x1024xf32>
    %31 = arith.mulf %30, %27 : vector<8x1024xf32>
    %32 = arith.select %29, %27, %31 : vector<8x1024xi1>, vector<8x1024xf32>
    %33 = arith.truncf %32 : vector<8x1024xf32> to vector<8x1024xbf16>
    %c0_21 = arith.constant 0 : index
    %c0_22 = arith.constant 0 : index
    %34 = vector.load %arg8[%c0_21, %c0_22] : memref<1024x512xbf16, #tpu.memory_space<vmem>>, vector<1024x512xbf16>
    %cst_23 = arith.constant dense<0.000000e+00> : vector<8x512xf32>
    %35 = tpu.matmul %33, %34, %cst_23 {dimension_numbers = #tpu.dot_dimension_numbers<[1], [0], [0], [1], [0, 0, 1, 1], [], []>} : vector<8x1024xbf16>, vector<1024x512xbf16>, vector<8x512xf32> -> vector<8x512xf32>
    %c0_24 = arith.constant 0 : index
    %c0_25 = arith.constant 0 : index
    %36 = vector.load %arg9[%c0_24, %c0_25] : memref<1x512xf32, #tpu.memory_space<vmem>>, vector<1x512xf32>
    %37 = vector.broadcast %36 : vector<1x512xf32> to vector<8x512xf32>
    %38 = arith.addf %35, %37 : vector<8x512xf32>
    %cst_26 = arith.constant 0.000000e+00 : f32
    %39 = vector.broadcast %cst_26 : f32 to vector<8x512xf32>
    %40 = arith.cmpf ogt, %38, %39 : vector<8x512xf32>
    %cst_27 = arith.constant 0.00999999977 : f32
    %41 = vector.broadcast %cst_27 : f32 to vector<8x512xf32>
    %42 = arith.mulf %41, %38 : vector<8x512xf32>
    %43 = arith.select %40, %38, %42 : vector<8x512xi1>, vector<8x512xf32>
    %44 = arith.truncf %43 : vector<8x512xf32> to vector<8x512xbf16>
    %c0_28 = arith.constant 0 : index
    %c0_29 = arith.constant 0 : index
    %45 = vector.load %arg10[%c0_28, %c0_29] : memref<512x128xbf16, #tpu.memory_space<vmem>>, vector<512x128xbf16>
    %cst_30 = arith.constant dense<0.000000e+00> : vector<8x128xf32>
    %46 = tpu.matmul %44, %45, %cst_30 {dimension_numbers = #tpu.dot_dimension_numbers<[1], [0], [0], [1], [0, 0, 1, 1], [], []>} : vector<8x512xbf16>, vector<512x128xbf16>, vector<8x128xf32> -> vector<8x128xf32>
    %c0_31 = arith.constant 0 : index
    %c0_32 = arith.constant 0 : index
    %47 = vector.load %arg11[%c0_31, %c0_32] : memref<1x128xf32, #tpu.memory_space<vmem>>, vector<1x128xf32>
    %48 = vector.broadcast %47 : vector<1x128xf32> to vector<8x128xf32>
    %49 = arith.addf %46, %48 : vector<8x128xf32>
    %c0_33 = arith.constant 0 : index
    %c0_34 = arith.constant 0 : index
    %50 = vector.load %arg12[%c0_33, %c0_34] : memref<8x128xf32, #tpu.memory_space<vmem>>, vector<8x128xf32>
    tpu.vector_store %arg12[%c0_33, %c0_34], %49 {strides = array<i32>} : memref<8x128xf32, #tpu.memory_space<vmem>>, vector<8x128xf32>,
    return
  }
  func.func @transform_0(%arg0: i32) -> (i32, i32) {
    %c0_i32 = arith.constant 0 : i32
    %c0_i32_0 = arith.constant 0 : i32
    return %arg0, %c0_i32 : i32, i32
  }
  func.func @transform_1(%arg0: i32) -> (i32, i32) {
    %c0_i32 = arith.constant 0 : i32
    %c0_i32_0 = arith.constant 0 : i32
    %c0_i32_1 = arith.constant 0 : i32
    return %c0_i32, %c0_i32_0 : i32, i32
  }
  func.func @transform_2(%arg0: i32) -> (i32, i32) {
    %c0_i32 = arith.constant 0 : i32
    %c0_i32_0 = arith.constant 0 : i32
    %c0_i32_1 = arith.constant 0 : i32
    return %c0_i32, %c0_i32_0 : i32, i32
  }
  func.func @transform_3(%arg0: i32) -> (i32, i32) {
    %c0_i32 = arith.constant 0 : i32
    %c0_i32_0 = arith.constant 0 : i32
    %c0_i32_1 = arith.constant 0 : i32
    return %c0_i32, %c0_i32_0 : i32, i32
  }
  func.func @transform_4(%arg0: i32) -> (i32, i32) {
    %c0_i32 = arith.constant 0 : i32
    %c0_i32_0 = arith.constant 0 : i32
    %c0_i32_1 = arith.constant 0 : i32
    return %c0_i32, %c0_i32_0 : i32, i32
  }
  func.func @transform_5(%arg0: i32) -> (i32, i32) {
    %c0_i32 = arith.constant 0 : i32
    %c0_i32_0 = arith.constant 0 : i32
    %c0_i32_1 = arith.constant 0 : i32
    return %c0_i32, %c0_i32_0 : i32, i32
  }
  func.func @transform_6(%arg0: i32) -> (i32, i32) {
    %c0_i32 = arith.constant 0 : i32
    %c0_i32_0 = arith.constant 0 : i32
    %c0_i32_1 = arith.constant 0 : i32
    return %c0_i32, %c0_i32_0 : i32, i32
  }
  func.func @transform_7(%arg0: i32) -> (i32, i32) {
    %c0_i32 = arith.constant 0 : i32
    %c0_i32_0 = arith.constant 0 : i32
    %c0_i32_1 = arith.constant 0 : i32
    return %c0_i32, %c0_i32_0 : i32, i32
  }
  func.func @transform_8(%arg0: i32) -> (i32, i32) {
    %c0_i32 = arith.constant 0 : i32
    %c0_i32_0 = arith.constant 0 : i32
    %c0_i32_1 = arith.constant 0 : i32
    return %c0_i32, %c0_i32_0 : i32, i32
  }
  func.func @transform_9(%arg0: i32) -> (i32, i32) {
    %c0_i32 = arith.constant 0 : i32
    %c0_i32_0 = arith.constant 0 : i32
    %c0_i32_1 = arith.constant 0 : i32
    return %c0_i32, %c0_i32_0 : i32, i32
  }
  func.func @transform_10(%arg0: i32) -> (i32, i32) {
    %c0_i32 = arith.constant 0 : i32
    %c0_i32_0 = arith.constant 0 : i32
    %c0_i32_1 = arith.constant 0 : i32
    return %c0_i32, %c0_i32_0 : i32, i32
  }
  func.func @transform_11(%arg0: i32) -> (i32, i32) {
    %c0_i32 = arith.constant 0 : i32
    %c0_i32_0 = arith.constant 0 : i32
    return %arg0, %c0_i32 : i32, i32
  }
}

</mosaic_0001>

<bundles_post_ra>
// kernel: dqn_forward.1
= control target key start
LH: loop header
LB: loop body
LE: loop exit
PB: predicated region body
PF: predicated region fallthrough
CT: control target
= control target key end

     0   :  { %16 = vsyncpa [#allocation3], 0  ;;  %s7797_s0 = inlined_call_operand.vmem [shape: f32[8,18], index: 0, kind: input, shape index: {}]   ;;  %s7798_s1 = inlined_call_operand.hbm [shape: f32[18,288], index: 1, kind: input, shape index: {}]   ;;  %s7799_s2 = inlined_call_operand.hbm [shape: f32[1,288], index: 2, kind: input, shape index: {}]   ;;  %s7800_s3 = inlined_call_operand.hbm [shape: bf16[288,576], index: 3, kind: input, shape index: {}]   ;;  %s7801_s4 = inlined_call_operand.hbm [shape: f32[1,576], index: 4, kind: input, shape index: {}]   ;;  %s7802_s5 = inlined_call_operand.hbm [shape: bf16[576,1024], index: 5, kind: input, shape index: {}]   ;;  %s7803_s6 = inlined_call_operand.hbm [shape: f32[1,1024], index: 6, kind: input, shape index: {}]   ;;  %s7804_s7 = inlined_call_operand.hbm [shape: bf16[1024,512], index: 7, kind: input, shape index: {}]   ;;  %s7805_s8 = inlined_call_operand.hbm [shape: f32[1,512], index: 8, kind: input, shape index: {}]   ;;  %s7806_s9 = inlined_call_operand.hbm [shape: bf16[512,128], index: 9, kind: input, shape index: {}]   ;;  %s7807_s10 = inlined_call_operand.hbm [shape: f32[1,128], index: 10, kind: input, shape index: {}]   ;;  %s7808_s11 = inlined_call_operand.vmem [shape: f32[8,128], index: 11, kind: output, shape index: {}]  }
   0x1   :  { %17 = vsyncpa [#allocation5], 0 }
   0x2   :  { %18 = vsyncpa [#allocation8], 0 }
   0x3   :  { %19 = vsyncpa [#allocation11], 0 }
   0x4   :  { %20 = vsyncpa [#allocation14], 0 }
   0x5   :  { %21 = vsyncpa [#allocation17], 0  ;;  %s7436_s17 = smov [#allocation4]   ;;  %s7437_s19 = smov [#allocation7]  }
   0x6   :  { %s42_s18 = sshll.u32 %s7436_s17, 4  ;;  %s64_s20 = sshll.u32 %s7437_s19, 4  ;;  %s43_s18 = int_to_ptr.vmem [resolvable:$true] %s42_s18  ;;  %s65_s20 = int_to_ptr.vmem [resolvable:$true] %s64_s20 }
   0x7   :  { %s7204_s23 = scalar_lea.hbm %s7799_s2, 48 }
   0x8   :  { %p7205_p0 = scmp.ne.s32.totalorder %s7799_s2, %s7204_s23  ;;  %p7208_p1 = scmp.lt.u32.totalorder %s7204_s23, %s7799_s2 }
   0xa   :  { %p7210_p2 = pnand %p7208_p1, %p7205_p0 }
   0xc   :  { %7213 = shalt.err (!%p7210_p2)
}
   0xd   :  { %s7214_s28 = scalar_lea.vmem %s43_s18, 48  ;;  %s7218_s29 = scalar_lea.vmem %s43_s18, 64 }
   0xe   :  { %p7215_p3 = scmp.ne.s32.totalorder %s43_s18, %s7214_s28  ;;  %p7219_p4 = scmp.lt.s32.totalorder %s43_s18, %s43_s18 }
   0xf   :  { %p7220_p5 = scmp.lt.s32.totalorder %s7218_s29, %s7214_s28 }
  0x11   :  { %p7221_p6 = por %p7220_p5, %p7219_p4 }
  0x13   :  { %p7222_p7 = pnand %p7221_p6, %p7215_p3 }
  0x15   :  { %7225 = shalt.err (!%p7222_p7)
}
  0x16   :  { %45 = dma.hbm_to_vmem [thread:$0]  %s7799_s2, 48, %s43_s18, [#allocation5]  }
  0x17   :  { %s7226_s15 = scalar_lea.hbm %s7801_s4, 80 }
  0x18   :  { %p7227_p8 = scmp.ne.s32.totalorder %s7801_s4, %s7226_s15  ;;  %p7230_p9 = scmp.lt.u32.totalorder %s7226_s15, %s7801_s4 }
  0x1a   :  { %p7232_p10 = pnand %p7230_p9, %p7227_p8 }
  0x1c   :  { %7235 = shalt.err (!%p7232_p10)
}
  0x1d   :  { %s7236_s22 = scalar_lea.vmem %s65_s20, 80  ;;  %s7240_s23 = scalar_lea.vmem %s65_s20, 96 }
  0x1e   :  { %p7237_p11 = scmp.ne.s32.totalorder %s65_s20, %s7236_s22  ;;  %p7241_p12 = scmp.lt.s32.totalorder %s65_s20, %s65_s20 }
  0x1f   :  { %p7242_p13 = scmp.lt.s32.totalorder %s7240_s23, %s7236_s22 }
  0x21   :  { %p7243_p0 = por %p7242_p13, %p7241_p12 }
  0x23   :  { %p7244_p1 = pnand %p7243_p0, %p7237_p11 }
  0x25   :  { %7247 = shalt.err (!%p7244_p1)
}
  0x26   :  { %67 = dma.hbm_to_vmem [thread:$0]  %s7801_s4, 80, %s65_s20, [#allocation8]  }
  0x27   :  { %s7438_s24 = smov [#allocation10]   ;;  %s7439_s26 = smov [#allocation13]  }
  0x28   :  { %s86_s25 = sshll.u32 %s7438_s24, 4  ;;  %s108_s27 = sshll.u32 %s7439_s26, 4  ;;  %s87_s25 = int_to_ptr.vmem [resolvable:$true] %s86_s25  ;;  %s109_s27 = int_to_ptr.vmem [resolvable:$true] %s108_s27 }
  0x29   :  { %s7248_s30 = scalar_lea.hbm %s7803_s6, 128 }
  0x2a   :  { %p7249_p2 = scmp.ne.s32.totalorder %s7803_s6, %s7248_s30  ;;  %p7252_p3 = scmp.lt.u32.totalorder %s7248_s30, %s7803_s6 }
  0x2c   :  { %p7254_p4 = pnand %p7252_p3, %p7249_p2 }
  0x2e   :  { %7257 = shalt.err (!%p7254_p4)
}
  0x2f   :  { %s7258_s4 = scalar_lea.vmem %s87_s25, 128  ;;  %p7263_p6 = scmp.lt.s32.totalorder %s87_s25, %s87_s25 }
  0x30   :  { %p7259_p5 = scmp.ne.s32.totalorder %s87_s25, %s7258_s4  ;;  %p7264_p7 = scmp.lt.s32.totalorder %s7258_s4, %s7258_s4 }
  0x32   :  { %p7265_p8 = por %p7264_p7, %p7263_p6 }
  0x34   :  { %p7266_p9 = pnand %p7265_p8, %p7259_p5 }
  0x36   :  { %7269 = shalt.err (!%p7266_p9)
}
  0x37   :  { %89 = dma.hbm_to_vmem [thread:$0]  %s7803_s6, 128, %s87_s25, [#allocation11]  }
  0x38   :  { %s7270_s21 = scalar_lea.hbm %s7805_s8, 64 }
  0x39   :  { %p7271_p10 = scmp.ne.s32.totalorder %s7805_s8, %s7270_s21  ;;  %p7274_p11 = scmp.lt.u32.totalorder %s7270_s21, %s7805_s8 }
  0x3b   :  { %p7276_p12 = pnand %p7274_p11, %p7271_p10 }
  0x3d   :  { %7279 = shalt.err (!%p7276_p12)
}
  0x3e   :  { %s7280_s24 = scalar_lea.vmem %s109_s27, 64  ;;  %p7285_p0 = scmp.lt.s32.totalorder %s109_s27, %s109_s27 }
  0x3f   :  { %p7281_p13 = scmp.ne.s32.totalorder %s109_s27, %s7280_s24  ;;  %p7286_p1 = scmp.lt.s32.totalorder %s7280_s24, %s7280_s24 }
  0x41   :  { %p7287_p2 = por %p7286_p1, %p7285_p0 }
  0x43   :  { %p7288_p3 = pnand %p7287_p2, %p7281_p13 }
  0x45   :  { %7291 = shalt.err (!%p7288_p3)
}
  0x46   :  { %111 = dma.hbm_to_vmem [thread:$0]  %s7805_s8, 64, %s109_s27, [#allocation14]  }
  0x47   :  { %s7440_s26 = smov [#allocation2]   ;;  %s7292_s12 = scalar_lea.hbm %s7798_s1, 1152 }
  0x48   :  { %s29_s28 = sshll.u32 %s7440_s26, 4  ;;  %p7293_p4 = scmp.ne.s32.totalorder %s7798_s1, %s7292_s12  ;;  %s30_s28 = int_to_ptr.vmem [resolvable:$true] %s29_s28 }
  0x49   :  { %p7296_p5 = scmp.lt.u32.totalorder %s7292_s12, %s7798_s1 }
  0x4b   :  { %p7298_p6 = pnand %p7296_p5, %p7293_p4 }
  0x4d   :  { %7301 = shalt.err (!%p7298_p6)
}
  0x4e   :  { %s7302_s20 = scalar_lea.vmem %s30_s28, 1152  ;;  %p7307_p8 = scmp.lt.s32.totalorder %s30_s28, %s30_s28 }
  0x4f   :  { %p7303_p7 = scmp.ne.s32.totalorder %s30_s28, %s7302_s20  ;;  %p7308_p9 = scmp.lt.s32.totalorder %s7302_s20, %s7302_s20 }
  0x51   :  { %p7309_p10 = por %p7308_p9, %p7307_p8 }
  0x53   :  { %p7310_p11 = pnand %p7309_p10, %p7303_p7 }
  0x55   :  { %7313 = shalt.err (!%p7310_p11)
}
  0x56   :  { %s7441_s8 = smov 384   ;;  %s7442_s27 = smov 24  }
  0x57   :  { %35 = dma.hbm_to_vmem [thread:$0]  %s7798_s1, 1152, %s30_s28, [#allocation3], %s7441_s8, %s7441_s8, %s7442_s27  }
  0x58   :  { %s7443_s19 = smov [#allocation6]   ;;  %s7314_s2 = scalar_lea.hbm %s7800_s3, 11520 }
  0x59   :  { %s51_s21 = sshll.u32 %s7443_s19, 4  ;;  %p7315_p12 = scmp.ne.s32.totalorder %s7800_s3, %s7314_s2  ;;  %s52_s21 = int_to_ptr.vmem [resolvable:$true] %s51_s21 }
  0x5a   :  { %p7318_p13 = scmp.lt.u32.totalorder %s7314_s2, %s7800_s3 }
  0x5c   :  { %p7320_p0 = pnand %p7318_p13, %p7315_p12 }
  0x5e   :  { %7323 = shalt.err (!%p7320_p0)
}
  0x5f   :  { %s7324_s26 = scalar_lea.vmem %s52_s21, 11520  ;;  %p7329_p2 = scmp.lt.s32.totalorder %s52_s21, %s52_s21 }
  0x60   :  { %p7325_p1 = scmp.ne.s32.totalorder %s52_s21, %s7324_s26  ;;  %p7330_p3 = scmp.lt.s32.totalorder %s7324_s26, %s7324_s26 }
  0x62   :  { %p7331_p4 = por %p7330_p3, %p7329_p2 }
  0x64   :  { %p7332_p5 = pnand %p7331_p4, %p7325_p1 }
  0x66   :  { %7335 = shalt.err (!%p7332_p5)
}
  0x67   :  { %s7444_s1 = smov 320   ;;  %s7445_s28 = smov 20  }
  0x68   :  { %57 = dma.hbm_to_vmem [thread:$0]  %s7800_s3, 11520, %s52_s21, [#allocation5], %s7444_s1, %s7444_s1, %s7445_s28  }
  0x69   :  { %s7446_s12 = smov [#allocation9]   ;;  %s7336_s4 = scalar_lea.hbm %s7802_s5, 36864 }
  0x6a   :  { %s73_s13 = sshll.u32 %s7446_s12, 4  ;;  %p7337_p6 = scmp.ne.s32.totalorder %s7802_s5, %s7336_s4  ;;  %s74_s13 = int_to_ptr.vmem [resolvable:$true] %s73_s13 }
  0x6b   :  { %p7340_p7 = scmp.lt.u32.totalorder %s7336_s4, %s7802_s5 }
  0x6d   :  { %p7342_p8 = pnand %p7340_p7, %p7337_p6 }
  0x6f   :  { %7345 = shalt.err (!%p7342_p8)
}
  0x70   :  { %s7346_s17 = scalar_lea.vmem %s74_s13, 36864  ;;  %p7351_p10 = scmp.lt.s32.totalorder %s74_s13, %s74_s13 }
  0x71   :  { %p7347_p9 = scmp.ne.s32.totalorder %s74_s13, %s7346_s17  ;;  %p7352_p11 = scmp.lt.s32.totalorder %s7346_s17, %s7346_s17 }
  0x73   :  { %p7353_p12 = por %p7352_p11, %p7351_p10 }
  0x75   :  { %p7354_p13 = pnand %p7353_p12, %p7347_p9 }
  0x77   :  { %7357 = shalt.err (!%p7354_p13)
}
  0x78   :  { %s7447_s3 = smov 512   ;;  %s7448_s19 = smov 32  }
  0x79   :  { %79 = dma.hbm_to_vmem [thread:$0]  %s7802_s5, 36864, %s74_s13, [#allocation8], %s7447_s3, %s7447_s3, %s7448_s19  }
  0x7a   :  { %s7449_s23 = smov [#allocation12]   ;;  %s7358_s6 = scalar_lea.hbm %s7804_s7, 32768 }
  0x7b   :  { %s95_s2 = sshll.u32 %s7449_s23, 4  ;;  %p7359_p0 = scmp.ne.s32.totalorder %s7804_s7, %s7358_s6  ;;  %s96_s2 = int_to_ptr.vmem [resolvable:$true] %s95_s2 }
  0x7c   :  { %p7362_p1 = scmp.lt.u32.totalorder %s7358_s6, %s7804_s7 }
  0x7e   :  { %p7364_p2 = pnand %p7362_p1, %p7359_p0 }
  0x80   :  { %7367 = shalt.err (!%p7364_p2)
}
  0x81   :  { %s7368_s29 = scalar_lea.vmem %s96_s2, 32768  ;;  %p7373_p4 = scmp.lt.s32.totalorder %s96_s2, %s96_s2 }
  0x82   :  { %p7369_p3 = scmp.ne.s32.totalorder %s96_s2, %s7368_s29  ;;  %p7374_p5 = scmp.lt.s32.totalorder %s7368_s29, %s7368_s29 }
  0x84   :  { %p7375_p6 = por %p7374_p5, %p7373_p4 }
  0x86   :  { %p7376_p7 = pnand %p7375_p6, %p7369_p3 }
  0x88   :  { %7379 = shalt.err (!%p7376_p7)
}
  0x89   :  { %s7450_s5 = smov 256   ;;  %s7451_s30 = smov 16  }
  0x8a   :  { %101 = dma.hbm_to_vmem [thread:$0]  %s7804_s7, 32768, %s96_s2, [#allocation11], %s7450_s5, %s7450_s5, %s7451_s30  }
  0x8b   :  { %s7452_s14 = smov [#allocation15]   ;;  %s7380_s8 = scalar_lea.hbm %s7806_s9, 4096 }
  0x8c   :  { %s117_s15 = sshll.u32 %s7452_s14, 4  ;;  %p7381_p8 = scmp.ne.s32.totalorder %s7806_s9, %s7380_s8  ;;  %s118_s15 = int_to_ptr.vmem [resolvable:$true] %s117_s15 }
  0x8d   :  { %p7384_p9 = scmp.lt.u32.totalorder %s7380_s8, %s7806_s9 }
  0x8f   :  { %p7386_p10 = pnand %p7384_p9, %p7381_p8 }
  0x91   :  { %7389 = shalt.err (!%p7386_p10)
}
  0x92   :  { %s7390_s19 = scalar_lea.vmem %s118_s15, 4096  ;;  %p7395_p12 = scmp.lt.s32.totalorder %s118_s15, %s118_s15 }
  0x93   :  { %p7391_p11 = scmp.ne.s32.totalorder %s118_s15, %s7390_s19  ;;  %p7396_p13 = scmp.lt.s32.totalorder %s7390_s19, %s7390_s19 }
  0x95   :  { %p7397_p0 = por %p7396_p13, %p7395_p12 }
  0x97   :  { %p7398_p1 = pnand %p7397_p0, %p7391_p11 }
  0x99   :  { %7401 = shalt.err (!%p7398_p1)
}
  0x9a   :  { %s7453_s7 = smov 64   ;;  %s7454_s21 = smov 4  }
  0x9b   :  { %123 = dma.hbm_to_vmem [thread:$0]  %s7806_s9, 4096, %s118_s15, [#allocation14], %s7453_s7, %s7453_s7, %s7454_s21  }
  0x9c   :  { %s7455_s2 = smov [#allocation16]   ;;  %s7402_s25 = scalar_lea.hbm %s7807_s10, 16 }
  0x9d   :  { %s130_s18 = sshll.u32 %s7455_s2, 4  ;;  %p7403_p2 = scmp.ne.s32.totalorder %s7807_s10, %s7402_s25  ;;  %s131_s18 = int_to_ptr.vmem [resolvable:$true] %s130_s18 }
  0x9e   :  { %p7406_p3 = scmp.lt.u32.totalorder %s7402_s25, %s7807_s10 }
  0xa0   :  { %p7408_p4 = pnand %p7406_p3, %p7403_p2 }
  0xa2   :  { %7411 = shalt.err (!%p7408_p4)
}
  0xa3   :  { %s7412_s5 = scalar_lea.vmem %s131_s18, 16  ;;  %s7416_s9 = scalar_lea.vmem %s131_s18, 32 }
  0xa4   :  { %p7413_p5 = scmp.ne.s32.totalorder %s131_s18, %s7412_s5  ;;  %p7417_p6 = scmp.lt.s32.totalorder %s131_s18, %s131_s18 }
  0xa5   :  { %p7418_p7 = scmp.lt.s32.totalorder %s7416_s9, %s7412_s5 }
  0xa7   :  { %p7419_p8 = por %p7418_p7, %p7417_p6 }
  0xa9   :  { %p7420_p9 = pnand %p7419_p8, %p7413_p5 }
  0xab   :  { %7423 = shalt.err (!%p7420_p9)
}
  0xac   :  { %133 = dma.hbm_to_vmem [thread:$0]  %s7807_s10, 16, %s131_s18, [#allocation17]  }
  0xad   :  { %7424 = dma.done.wait [#allocation3], 1152  }
  0xae   :  { %7425 = vsyncadd [#allocation3], 4294966144 }
  0xaf   :  { %7426 = dma.done.wait [#allocation5], 11568  }
  0xb0   :  { %7427 = vsyncadd [#allocation5], 4294955728 }
  0xb1   :  { %7428 = dma.done.wait [#allocation8], 36944  }
  0xb2   :  { %7429 = vsyncadd [#allocation8], 4294930352 }
  0xb3   :  { %7430 = dma.done.wait [#allocation11], 32896  }
  0xb4   :  { %7431 = vsyncadd [#allocation11], 4294934400 }
  0xb5   :  { %7432 = dma.done.wait [#allocation14], 4160  }
  0xb6   :  { %7433 = vsyncadd [#allocation14], 4294963136 }
  0xb7   :  { %7434 = dma.done.wait [#allocation17], 16  }
  0xb8   :  { %7435 = vsyncadd [#allocation17], 4294967280  ;;  %v7456_v0 = vmov 0.0   ;;  %v167_v1 = vld [vmem:[#allocation2 + $0x8] sm:$0xff]  ;;  %v170_v2 = vld [vmem:[#allocation2 + $0x20] sm:$0xff]  ;;  %vm196_vm0 = vcmask 1041408   ;;  %v177_v54 = vlaneseq }
  0xb9   :  { %270 = vmatprep.mubr.f32.mxu1 %v7456_v0  ;;  %v166_v3 = vld [vmem:[#allocation2] sm:$0xff]  ;;  %v6553_v4 = vpack.c.bf16 %v170_v2, %v167_v1  ;;  %v169_v5 = vld [vmem:[#allocation2 + $0x18] sm:$0xff]  ;;  %v168_v8 = vld [vmem:[#allocation2 + $0x10] sm:$0xff]  ;;  %vm192_vm1 = vcmask 146432   ;;  %v7457_v18 = vmov 0.0|0.0   ;;  %vm7458_vm2 = vmmov 0  }
  0xba   :  { %v6555_v6 = vpack.c.bf16 %v169_v5, %v166_v3  ;;  %v173_v7 = vld [vmem:[#allocation2 + $0x38] sm:$0x3]  ;;  %v171_v9 = vld [vmem:[#allocation2 + $0x28] sm:$0xff]  ;;  %v6662_v10 = vld [vmem:[#allocation6 + $0x4] ss:$20 sps:$4 sm:$0xff]   ;;  %v7459_v53 = vmov 0  }
  0xbb   :  { %6554 = vmatprep.subr.bf16.mxu1 %v6553_v4  ;;  %v6664_v11 = vld [vmem:[#allocation6] ss:$20 sps:$4 sm:$0xff]   ;;  %v172_v12 = vld [vmem:[#allocation2 + $0x30] sm:$0x3]  ;;  %v6558_v15 = vpack.c.bf16 %v171_v9, %v168_v8  ;;  %966 = vmatprep.subr.bf16.mxu0 %v6662_v10  ;;  %v6667_v16 = vld [vmem:[#allocation6 + $0x28] ss:$20 sps:$4 sm:$0xff]  }
  0xbc   :  { %6556 = vmatpush1.bf16.msra.mxu1 %v6555_v6  ;;  %v6665_v13 = vld [vmem:[#allocation6 + $0x2c] ss:$20 sps:$4 sm:$0xff]   ;;  %v165_v14 = vld [vmem:[%s7797_s0] sm:$0xff]  ;;  %967 = vmatpush1.bf16.msra.mxu0 %v6664_v11  ;;  %v6670_v20 = vld [vmem:[#allocation6 + $0x50] ss:$20 sps:$4 sm:$0xff]   ;;  %v7653_v55 = vshrl.u32 %v177_v54, 7 }
  0xbd   :  { %5784 = vmatprep.subr.msk.mxu1 %vm196_vm0, %v173_v7  ;;  %968 = vmatprep.subr.bf16.mxu0 %v6665_v13  ;;  %v6668_v17 = vld [vmem:[#allocation6 + $0x54] ss:$20 sps:$4 sm:$0xff]   ;;  %v6671_v21 = vld [vmem:[#allocation6 + $0x7c] ss:$20 sps:$4 sm:$0xff]   ;;  %v6673_v22 = vld [vmem:[#allocation6 + $0x78] ss:$20 sps:$4 sm:$0xff]  }
  0xbe   :  { %v174_v19 = vld [vmem:[#allocation2 + $0x40] sm:$0x3]  ;;  %v6674_v23 = vld [vmem:[#allocation6 + $0xa4] ss:$20 sps:$4 sm:$0xff]   ;;  %v6677_v25 = vld [vmem:[#allocation6 + $0xcc] ss:$20 sps:$4 sm:$0xff]  }
  0xbf   :  { %v6676_v24 = vld [vmem:[#allocation6 + $0xa0] ss:$20 sps:$4 sm:$0xff]   ;;  %v6679_v26 = vld [vmem:[#allocation6 + $0xc8] ss:$20 sps:$4 sm:$0xff]   ;;  %v6682_v28 = vld [vmem:[#allocation6 + $0xf0] ss:$20 sps:$4 sm:$0xff]  }
  0xc0   :  { %5785 = vmatpush1.msk.msra.mxu1 %vm196_vm0, %v172_v12  ;;  %969 = vmatpush1.bf16.msra.mxu0 %v6667_v16  ;;  %v6680_v27 = vld [vmem:[#allocation6 + $0xf4] ss:$20 sps:$4 sm:$0xff]   ;;  %v6683_v29 = vld [vmem:[#allocation6 + $0x11c] ss:$20 sps:$4 sm:$0xff]   ;;  %v6685_v30 = vld [vmem:[#allocation6 + $0x118] ss:$20 sps:$4 sm:$0xff]  }
  0xc1   :  { %5786 = vmatmul.mubr.msk.f32.vlgmr.msra.gmra.mrb[0].mxu1 %vm192_vm1, %v165_v14  ;;  %6557 = vmatprep.subr.bf16.mxu1 %v7457_v18  ;;  %v6686_v31 = vld [vmem:[#allocation6 + $0x144] ss:$20 sps:$4 sm:$0xff]   ;;  %v6688_v32 = vld [vmem:[#allocation6 + $0x140] ss:$20 sps:$4 sm:$0xff]   ;;  %v6691_v34 = vld [vmem:[#allocation6 + $0x168] ss:$20 sps:$4 sm:$0xff]  }
  0xc2   :  { %6559 = vmatpush3.bf16.msra.mxu1 %v6558_v15  ;;  %6542 = vmatprep.mubr.msk.f32.mxu1 %vm7458_vm2, %v7456_v0  ;;  %v6689_v33 = vld [vmem:[#allocation6 + $0x16c] ss:$20 sps:$4 sm:$0xff]   ;;  %v6692_v35 = vld [vmem:[#allocation6 + $0x194] ss:$20 sps:$4 sm:$0xff]   ;;  %v6694_v36 = vld [vmem:[#allocation6 + $0x190] ss:$20 sps:$4 sm:$0xff]  }
  0xc3   :  { %6540 = vmatprep.subr.mxu1 %v7456_v0  ;;  %970 = vmatprep.subr.bf16.mxu0 %v6668_v17  ;;  %v6695_v37 = vld [vmem:[#allocation6 + $0x1bc] ss:$20 sps:$4 sm:$0xff]   ;;  %v6697_v38 = vld [vmem:[#allocation6 + $0x1b8] ss:$20 sps:$4 sm:$0xff]   ;;  %v6700_v40 = vld [vmem:[#allocation6 + $0x1e0] ss:$20 sps:$4 sm:$0xff]  }
  0xc4   :  { %971 = vmatpush1.bf16.msra.mxu0 %v6670_v20  ;;  %v6698_v39 = vld [vmem:[#allocation6 + $0x1e4] ss:$20 sps:$4 sm:$0xff]   ;;  %v6701_v41 = vld [vmem:[#allocation6 + $0x20c] ss:$20 sps:$4 sm:$0xff]   ;;  %v6703_v42 = vld [vmem:[#allocation6 + $0x208] ss:$20 sps:$4 sm:$0xff]  }
  0xc5   :  { %972 = vmatprep.subr.bf16.mxu0 %v6671_v21  ;;  %v6704_v43 = vld [vmem:[#allocation6 + $0x234] ss:$20 sps:$4 sm:$0xff]   ;;  %v6706_v44 = vld [vmem:[#allocation6 + $0x230] ss:$20 sps:$4 sm:$0xff]   ;;  %v6712_v48 = vld [vmem:[#allocation6 + $0x258] ss:$20 sps:$4 sm:$0xff]  }
  0xc6   :  { %6541 = vmatpush3.msk.msra.mxu1 %vm196_vm0, %v174_v19  ;;  %v6707_v45 = vld [vmem:[#allocation6 + $0x25c] ss:$20 sps:$4 sm:$0xff]   ;;  %v6711_v46 = vld [vmem:[#allocation6 + $0x284] ss:$20 sps:$4 sm:$0xff]   ;;  %v6709_v47 = vld [vmem:[#allocation6 + $0x280] ss:$20 sps:$4 sm:$0xff]  }
  0xc7   :  { %6543 = vmatmul.mubr.msk.f32.vlgmr.msra.gmra.mrb[2].mxu1 %vm192_vm1, %v165_v14  ;;  %1007 = vmatprep.subr.bf16.mxu1 %v6711_v46  ;;  %v6715_v49 = vld [vmem:[#allocation6 + $0x2ac] ss:$20 sps:$4 sm:$0xff]   ;;  %v6716_v50 = vld [vmem:[#allocation6 + $0x150] ss:$20 sps:$4 sm:$0xff]   ;;  %v6713_v51 = vld [vmem:[#allocation6 + $0x2a8] ss:$20 sps:$4 sm:$0xff]  }
  0xc8   :  { %973 = vmatpush1.bf16.msra.mxu0 %v6673_v22  ;;  %1008 = vmatpush1.bf16.msra.mxu1 %v6709_v47  ;;  %v6720_v52 = vld [vmem:[#allocation6 + $0xc] ss:$20 sps:$4 sm:$0xff]   ;;  %v7656_v56 = vsub.s32 0, %v7653_v55  ;;  %v175_v57 = vld [vmem:[#allocation4] sm:$0x7]  ;;  %v7659_v58 = vsub.s32 1, %v7653_v55 }
  0xc9   :  { %974 = vmatprep.subr.bf16.mxu0 %v6674_v23  ;;  %1009 = vmatprep.subr.bf16.mxu1 %v6715_v49  ;;  %v7664_v61 = vsub.s32 2, %v7653_v55  ;;  %v6717_v12 = vld [vmem:[#allocation6 + $0x10] ss:$20 sps:$4 sm:$0xff]   ;;  %v6721_v14 = vld [vmem:[#allocation6 + $0x178] ss:$20 sps:$4 sm:$0xff]   ;;  %vm962_vm6 = vcmask 261120  }
  0xca   :  { %1039 = vmatprep.mubr.bf16.mxu1 %v7459_v53  ;;  %v180_v59 = vrot.slane %v175_v57, %v7656_v56  ;;  %v184_v60 = vrot.slane %v175_v57, %v7659_v58  ;;  %v6718_v17 = vld [vmem:[#allocation6 + $0x8] ss:$20 sps:$4 sm:$0xff]   ;;  %v6722_v18 = vld [vmem:[#allocation6 + $0x38] ss:$20 sps:$4 sm:$0xff]   ;;  %v6726_v21 = vld [vmem:[#allocation6 + $0x1a0] ss:$20 sps:$4 sm:$0xff]  }
  0xcb   :  { %v188_v4 = vrot.slane %v175_v57, %v7664_v61  ;;  %v6725_v20 = vld [vmem:[#allocation6 + $0x34] ss:$20 sps:$4 sm:$0xff]   ;;  %v6723_v22 = vld [vmem:[#allocation6 + $0x30] ss:$20 sps:$4 sm:$0xff]   ;;  %vm3000_vm12 = vcmask 523264  }
  0xcc   :  { %975 = vmatpush1.bf16.msra.mxu0 %v6676_v24  ;;  %1010 = vmatpush1.bf16.msra.mxu1 %v6713_v51  ;;  %v6727_v23 = vld [vmem:[#allocation6 + $0x60] ss:$20 sps:$4 sm:$0xff]   ;;  %v6730_v24 = vld [vmem:[#allocation6 + $0x5c] ss:$20 sps:$4 sm:$0xff]   ;;  %v6755_v46 = vld [vmem:[#allocation6 + $0x124] ss:$20 sps:$4 sm:$0xff]  }
  0xcd   :  { %976 = vmatprep.subr.bf16.mxu0 %v6677_v25  ;;  %1048 = vmatprep.subr.bf16.mxu1 %v6720_v52  ;;  %v6731_v25 = vld [vmem:[#allocation6 + $0x1c8] ss:$20 sps:$4 sm:$0xff]   ;;  %v6758_v52 = vld [vmem:[#allocation6 + $0x14c] ss:$20 sps:$4 sm:$0xff]  }
  0xce   :  { %v1243_v49 = vld [vmem:[#allocation9 + $0x68] sm:$0xff] }
  0xcf   :  { %v1247_v57 = vld [vmem:[#allocation9 + $0x88] sm:$0xff] }
  0xd0   :  { %977 = vmatpush1.bf16.msra.mxu0 %v6679_v26  ;;  %v6728_v26 = vld [vmem:[#allocation6 + $0x58] ss:$20 sps:$4 sm:$0xff]  }
  0xd1   :  { %978 = vmatprep.subr.bf16.mxu0 %v6680_v27  ;;  %v6732_v27 = vld [vmem:[#allocation6 + $0x88] ss:$20 sps:$4 sm:$0xff]  }
  0xd4   :  { %979 = vmatpush1.bf16.msra.mxu0 %v6682_v28  ;;  %v6735_v28 = vld [vmem:[#allocation6 + $0x84] ss:$20 sps:$4 sm:$0xff]  }
  0xd5   :  { %980 = vmatprep.subr.bf16.mxu0 %v6683_v29  ;;  %v6736_v29 = vld [vmem:[#allocation6 + $0x1f0] ss:$20 sps:$4 sm:$0xff]  }
  0xd8   :  { %981 = vmatpush1.bf16.msra.mxu0 %v6685_v30  ;;  %v6733_v30 = vld [vmem:[#allocation6 + $0x80] ss:$20 sps:$4 sm:$0xff]  }
  0xd9   :  { %982 = vmatprep.subr.bf16.mxu0 %v6686_v31  ;;  %v6737_v31 = vld [vmem:[#allocation6 + $0xb0] ss:$20 sps:$4 sm:$0xff]  }
  0xdc   :  { %983 = vmatpush1.bf16.msra.mxu0 %v6688_v32  ;;  %v6740_v32 = vld [vmem:[#allocation6 + $0xac] ss:$20 sps:$4 sm:$0xff]  }
  0xdd   :  { %984 = vmatprep.subr.bf16.mxu0 %v6689_v33  ;;  %v6741_v33 = vld [vmem:[#allocation6 + $0x218] ss:$20 sps:$4 sm:$0xff]  }
  0xe0   :  { %985 = vmatpush1.bf16.msra.mxu0 %v6691_v34  ;;  %v6738_v34 = vld [vmem:[#allocation6 + $0xa8] ss:$20 sps:$4 sm:$0xff]  }
  0xe1   :  { %986 = vmatprep.subr.bf16.mxu0 %v6692_v35  ;;  %v6742_v35 = vld [vmem:[#allocation6 + $0xd8] ss:$20 sps:$4 sm:$0xff]  }
  0xe4   :  { %987 = vmatpush1.bf16.msra.mxu0 %v6694_v36  ;;  %v6745_v36 = vld [vmem:[#allocation6 + $0xd4] ss:$20 sps:$4 sm:$0xff]  }
  0xe5   :  { %988 = vmatprep.subr.bf16.mxu0 %v6695_v37  ;;  %v6746_v37 = vld [vmem:[#allocation6 + $0x240] ss:$20 sps:$4 sm:$0xff]  }
  0xe8   :  { %989 = vmatpush1.bf16.msra.mxu0 %v6697_v38  ;;  %v6743_v38 = vld [vmem:[#allocation6 + $0xd0] ss:$20 sps:$4 sm:$0xff]  }
  0xe9   :  { %990 = vmatprep.subr.bf16.mxu0 %v6698_v39  ;;  %v6747_v39 = vld [vmem:[#allocation6 + $0x100] ss:$20 sps:$4 sm:$0xff]  }
  0xec   :  { %991 = vmatpush1.bf16.msra.mxu0 %v6700_v40  ;;  %v6750_v40 = vld [vmem:[#allocation6 + $0xfc] ss:$20 sps:$4 sm:$0xff]  }
  0xed   :  { %992 = vmatprep.subr.bf16.mxu0 %v6701_v41  ;;  %v6751_v41 = vld [vmem:[#allocation6 + $0x268] ss:$20 sps:$4 sm:$0xff]  }
  0xf0   :  { %993 = vmatpush1.bf16.msra.mxu0 %v6703_v42  ;;  %v1231_v42 = vld [vmem:[#allocation9 + $0x8] sm:$0xff] }
  0xf1   :  { %994 = vmatprep.subr.bf16.mxu0 %v6704_v43  ;;  %v1235_v43 = vld [vmem:[#allocation9 + $0x28] sm:$0xff] }
  0xf2   :  { %v5885_v47 = vcombine.high %v1231_v42, %v1235_v43  ;;  %v5884_v51 = vcombine.low %v1231_v42, %v1235_v43  ;;  %v6777_v42 = vld [vmem:[#allocation6 + $0x260] ss:$20 sps:$4 sm:$0xff]  }
  0xf4   :  { %995 = vmatpush1.bf16.msra.mxu0 %v6706_v44  ;;  %v6748_v44 = vld [vmem:[#allocation6 + $0xf8] ss:$20 sps:$4 sm:$0xff]  }
  0xf5   :  { %996 = vmatprep.subr.bf16.mxu0 %v6707_v45  ;;  %v6752_v45 = vld [vmem:[#allocation6 + $0x128] ss:$20 sps:$4 sm:$0xff]  }
  0xf8   :  { %997 = vmatpush1.bf16.msra.mxu0 %v6712_v48  ;;  %v1239_v48 = vld [vmem:[#allocation9 + $0x48] sm:$0xff] }
  0xf9   :  { %6467 = vmatprep.subr.bf16.mxu0 %v6716_v50  ;;  %v6753_v50 = vld [vmem:[#allocation6 + $0x120] ss:$20 sps:$4 sm:$0xff]   ;;  %v5893_v54 = vcombine.high %v1239_v48, %v1243_v49 }
 0x194   :  { %v272_v62 = vpop.f32.mrb[0].mxu1 }
 0x195   :  { %v273_v63 = vadd.f32 %v272_v62, %v180_v59  ;;  %v274_v1 = vpop.f32.mrb[1].mxu1  ;;  %v1251_v59 = vld [vmem:[#allocation9 + $0xa8] sm:$0xff]  ;;  %v5892_v62 = vcombine.low %v1239_v48, %v1243_v49  ;;  %v6785_v49 = vld [vmem:[#allocation6 + $0x2b4] ss:$20 sps:$4 sm:$0xff]  }
 0x196   :  { %v275_v2 = vadd.f32 %v274_v1, %v184_v60  ;;  %v6756_v60 = vld [vmem:[#allocation6 + $0x148] ss:$20 sps:$4 sm:$0xff]   ;;  %v5901_v1 = vcombine.high %v1247_v57, %v1251_v59 }
 0x197   :  { %vm347_vm3 = vcmp.gt.f32.partialorder %v273_v63, 0.0  ;;  %v350_v3 = vmul.f32 0.01, %v273_v63  ;;  %v6780_v48 = vld [vmem:[#allocation6 + $0x288] ss:$20 sps:$4 sm:$0xff]  }
 0x198   :  { %vm348_vm4 = vcmp.gt.f32.partialorder %v275_v2, 0.0  ;;  %v351_v5 = vmul.f32 0.01, %v275_v2 }
 0x199   :  { %v353_v6 = vsel %vm347_vm3, %v273_v63, %v350_v3  ;;  %v6761_v63 = vld [vmem:[#allocation6 + $0x174] ss:$20 sps:$4 sm:$0xff]   ;;  %v1259_v3 = vld [vmem:[#allocation9 + $0xe8] sm:$0xff] }
 0x19a   :  { %v343_v7 = vpop.f32.mrb[2].mxu1  ;;  %v354_v8 = vsel %vm348_vm4, %v275_v2, %v351_v5  ;;  %v7667_v13 = vpack.c.bf16 %v353_v6, %v353_v6  ;;  %v1255_v2 = vld [vmem:[#allocation9 + $0xc8] sm:$0xff]  ;;  %v5900_v5 = vcombine.low %v1247_v57, %v1251_v59 }
 0x19b   :  { %v344_v9 = vadd.f32 %v343_v7, %v188_v4  ;;  %v6544_v10 = vpop.f32.mrb[3].mxu1  ;;  %v357_v11 = vpack.c.bf16 %v354_v8, %v354_v8  ;;  %v6759_v4 = vld [vmem:[#allocation6 + $0x170] ss:$20 sps:$4 sm:$0xff]   ;;  %v5909_v7 = vcombine.high %v1255_v2, %v1259_v3 }
 0x19c   :  { %v6764_v6 = vld [vmem:[#allocation6 + $0x19c] ss:$20 sps:$4 sm:$0xff]   ;;  %v6762_v10 = vld [vmem:[#allocation6 + $0x198] ss:$20 sps:$4 sm:$0xff]  }
 0x19d   :  { %vm349_vm5 = vcmp.gt.f32.partialorder %v344_v9, 0.0  ;;  %v352_v15 = vmul.f32 0.01, %v344_v9  ;;  %998 = vmatprep.mubr.bf16.mxu0 %v357_v11  ;;  %v1263_v8 = vld [vmem:[#allocation9 + $0x108] sm:$0xff] }
 0x19e   :  { %999 = vmatmul.mubr.bf16.vlgmr.msra.gmra.mrb[0].mxu0 %v7667_v13  ;;  %v6783_v57 = vld [vmem:[#allocation6 + $0x2b0] ss:$20 sps:$4 sm:$0xff]  }
 0x19f   :  { %v355_v16 = vsel %vm349_vm5, %v344_v9, %v352_v15  ;;  %6468 = vmatpush3.bf16.msra.mxu0 %v6717_v12  ;;  %1162 = vmatprep.mubr.bf16.mxu0 %v357_v11  ;;  %v1267_v9 = vld [vmem:[#allocation9 + $0x128] sm:$0xff] }
 0x1a0   :  { %v7670_v19 = vpack.c.bf16 %v355_v16, %v355_v16  ;;  %6469 = vmatprep.subr.bf16.mxu0 %v6721_v14  ;;  %v6767_v12 = vld [vmem:[#allocation6 + $0x1c4] ss:$20 sps:$4 sm:$0xff]   ;;  %v5917_v14 = vcombine.high %v1263_v8, %v1267_v9 }
 0x1a1   :  { %v1271_v15 = vld [vmem:[#allocation9 + $0x148] sm:$0xff] }
 0x1a2   :  { %5879 = vmatmul.mubr.msk.bf16.vlgmr.msra.gmra.mrb[4].mxu1 %vm962_vm6, %v7670_v19  ;;  %v1275_v16 = vld [vmem:[#allocation9 + $0x168] sm:$0xff] }
 0x1a3   :  { %1049 = vmatpush1.bf16.msra.mxu1 %v6718_v17  ;;  %6470 = vmatpush3.bf16.msra.mxu0 %v6722_v18  ;;  %v6765_v17 = vld [vmem:[#allocation6 + $0x1c0] ss:$20 sps:$4 sm:$0xff]   ;;  %v5916_v18 = vcombine.low %v1263_v8, %v1267_v9 }
 0x1a4   :  { %1080 = vmatprep.mubr.bf16.mxu1 %v357_v11  ;;  %1050 = vmatprep.subr.bf16.mxu1 %v6725_v20  ;;  %v5908_v11 = vcombine.low %v1255_v2, %v1259_v3  ;;  %v6770_v20 = vld [vmem:[#allocation6 + $0x1ec] ss:$20 sps:$4 sm:$0xff]   ;;  %v6786_v2 = vld [vmem:[#allocation6 + $0x290] ss:$20 sps:$4 sm:$0xff]   ;;  %v1238_v8 = vld [vmem:[#allocation9 + $0x40] sm:$0xff] }
 0x1a5   :  { %6471 = vmatprep.subr.bf16.mxu0 %v6726_v21  ;;  %v5925_v21 = vcombine.high %v1271_v15, %v1275_v16  ;;  %v1242_v9 = vld [vmem:[#allocation9 + $0x60] sm:$0xff] }
 0x1a7   :  { %1051 = vmatpush1.bf16.msra.mxu1 %v6723_v22  ;;  %6472 = vmatpush3.bf16.msra.mxu0 %v6727_v23  ;;  %v1279_v22 = vld [vmem:[#allocation9 + $0x188] sm:$0xff] }
 0x1a8   :  { %1052 = vmatprep.subr.bf16.mxu1 %v6730_v24  ;;  %6473 = vmatprep.subr.bf16.mxu0 %v6731_v25  ;;  %v1283_v23 = vld [vmem:[#allocation9 + $0x1a8] sm:$0xff]  ;;  %v5924_v25 = vcombine.low %v1271_v15, %v1275_v16  ;;  %v5891_v16 = vcombine.high %v1238_v8, %v1242_v9 }
 0x1a9   :  { %v6768_v24 = vld [vmem:[#allocation6 + $0x1e8] ss:$20 sps:$4 sm:$0xff]  }
 0x1ab   :  { %1053 = vmatpush1.bf16.msra.mxu1 %v6728_v26  ;;  %6474 = vmatpush3.bf16.msra.mxu0 %v6732_v27  ;;  %v6773_v26 = vld [vmem:[#allocation6 + $0x214] ss:$20 sps:$4 sm:$0xff]   ;;  %v5933_v27 = vcombine.high %v1279_v22, %v1283_v23 }
 0x1ac   :  { %1054 = vmatprep.subr.bf16.mxu1 %v6735_v28  ;;  %6475 = vmatprep.subr.bf16.mxu0 %v6736_v29  ;;  %v1287_v28 = vld [vmem:[#allocation9 + $0x1c8] sm:$0xff] }
 0x1ad   :  { %v1291_v29 = vld [vmem:[#allocation9 + $0x1e8] sm:$0xff] }
 0x1af   :  { %1055 = vmatpush1.bf16.msra.mxu1 %v6733_v30  ;;  %6476 = vmatpush3.bf16.msra.mxu0 %v6737_v31  ;;  %v6771_v30 = vld [vmem:[#allocation6 + $0x210] ss:$20 sps:$4 sm:$0xff]   ;;  %v5932_v31 = vcombine.low %v1279_v22, %v1283_v23 }
 0x1b0   :  { %1056 = vmatprep.subr.bf16.mxu1 %v6740_v32  ;;  %6477 = vmatprep.subr.bf16.mxu0 %v6741_v33  ;;  %v6776_v32 = vld [vmem:[#allocation6 + $0x23c] ss:$20 sps:$4 sm:$0xff]   ;;  %v5941_v33 = vcombine.high %v1287_v28, %v1291_v29 }
 0x1b3   :  { %1057 = vmatpush1.bf16.msra.mxu1 %v6738_v34  ;;  %6478 = vmatpush3.bf16.msra.mxu0 %v6742_v35  ;;  %v1295_v34 = vld [vmem:[#allocation9 + $0x208] sm:$0xff] }
 0x1b4   :  { %1058 = vmatprep.subr.bf16.mxu1 %v6745_v36  ;;  %6479 = vmatprep.subr.bf16.mxu0 %v6746_v37  ;;  %v1299_v35 = vld [vmem:[#allocation9 + $0x228] sm:$0xff]  ;;  %v6774_v36 = vld [vmem:[#allocation6 + $0x238] ss:$20 sps:$4 sm:$0xff]   ;;  %v5940_v37 = vcombine.low %v1287_v28, %v1291_v29 }
 0x1b5   :  { %v5948_v43 = vcombine.low %v1295_v34, %v1299_v35  ;;  %v1355_v28 = vld [vmem:[#allocation9 + $0x3e8] sm:$0xff] }
 0x1b7   :  { %1059 = vmatpush1.bf16.msra.mxu1 %v6743_v38  ;;  %6480 = vmatpush3.bf16.msra.mxu0 %v6747_v39  ;;  %v6779_v38 = vld [vmem:[#allocation6 + $0x264] ss:$20 sps:$4 sm:$0xff]   ;;  %v5949_v39 = vcombine.high %v1295_v34, %v1299_v35 }
 0x1b8   :  { %1060 = vmatprep.subr.bf16.mxu1 %v6750_v40  ;;  %6481 = vmatprep.subr.bf16.mxu0 %v6751_v41  ;;  %v1303_v40 = vld [vmem:[#allocation9 + $0x248] sm:$0xff]  ;;  %v7685_v35 = vld [vmem:[#allocation9 + $0x400] sm:$0xff] }
 0x1b9   :  { %v1307_v41 = vld [vmem:[#allocation9 + $0x268] sm:$0xff] }
 0x1bb   :  { %1061 = vmatpush1.bf16.msra.mxu1 %v6748_v44  ;;  %6482 = vmatpush3.bf16.msra.mxu0 %v6752_v45  ;;  %v6782_v44 = vld [vmem:[#allocation6 + $0x28c] ss:$20 sps:$4 sm:$0xff]   ;;  %v5957_v45 = vcombine.high %v1303_v40, %v1307_v41 }
 0x1bc   :  { %1062 = vmatprep.subr.bf16.mxu1 %v6755_v46  ;;  %3127 = vmatprep.subr.bf16.mxu0 %v5885_v47  ;;  %v1311_v46 = vld [vmem:[#allocation9 + $0x288] sm:$0xff] }
 0x1bd   :  { %v1315_v47 = vld [vmem:[#allocation9 + $0x2a8] sm:$0xff] }
 0x1be   :  { %1163 = vmatmul.mubr.bf16.vlgmr.msra.gmra.mrb[4].mxu0 %v7667_v13  ;;  %v5964_v59 = vcombine.low %v1311_v46, %v1315_v47 }
 0x1bf   :  { %1063 = vmatpush1.bf16.msra.mxu1 %v6753_v50  ;;  %3128 = vmatpush1.bf16.msra.mxu0 %v5884_v51  ;;  %v5956_v50 = vcombine.low %v1303_v40, %v1307_v41  ;;  %v5965_v51 = vcombine.high %v1311_v46, %v1315_v47  ;;  %v7693_v40 = vld [vmem:[#allocation9 + $0x428] sm:$0xff]  ;;  %v1270_v41 = vld [vmem:[#allocation9 + $0x140] sm:$0xff] }
 0x1c0   :  { %1064 = vmatprep.subr.bf16.mxu1 %v6758_v52  ;;  %3129 = vmatprep.subr.bf16.mxu0 %v5893_v54  ;;  %v1319_v52 = vld [vmem:[#allocation9 + $0x2c8] sm:$0xff]  ;;  %v1278_v47 = vld [vmem:[#allocation9 + $0x180] sm:$0xff] }
 0x1c1   :  { %v1323_v54 = vld [vmem:[#allocation9 + $0x2e8] sm:$0xff] }
 0x1c3   :  { %1065 = vmatpush1.bf16.msra.mxu1 %v6756_v60  ;;  %3130 = vmatpush1.bf16.msra.mxu0 %v5892_v62  ;;  %v5973_v60 = vcombine.high %v1319_v52, %v1323_v54  ;;  %v1327_v62 = vld [vmem:[#allocation9 + $0x308] sm:$0xff] }
 0x1c4   :  { %1066 = vmatprep.subr.bf16.mxu1 %v6761_v63  ;;  %3131 = vmatprep.subr.bf16.mxu0 %v5901_v1  ;;  %v1331_v63 = vld [vmem:[#allocation9 + $0x328] sm:$0xff]  ;;  %v5972_v1 = vcombine.low %v1319_v52, %v1323_v54  ;;  %v1290_v52 = vld [vmem:[#allocation9 + $0x1e0] sm:$0xff] }
 0x1c5   :  { %v5980_v3 = vcombine.low %v1327_v62, %v1331_v63 }
 0x1c7   :  { %1067 = vmatpush1.bf16.msra.mxu1 %v6759_v4  ;;  %3132 = vmatpush1.bf16.msra.mxu0 %v5900_v5  ;;  %v1230_v4 = vld [vmem:[#allocation9] sm:$0xff] }
 0x1c8   :  { %1068 = vmatprep.subr.bf16.mxu1 %v6764_v6  ;;  %3133 = vmatprep.subr.bf16.mxu0 %v5909_v7  ;;  %v1234_v5 = vld [vmem:[#allocation9 + $0x20] sm:$0xff] }
 0x1c9   :  { %v6787_v6 = vld [vmem:[#allocation6 + $0x2b8] ss:$20 sps:$4 sm:$0xff]   ;;  %v5883_v7 = vcombine.high %v1230_v4, %v1234_v5 }
 0x1cb   :  { %1069 = vmatpush1.bf16.msra.mxu1 %v6762_v10  ;;  %3134 = vmatpush1.bf16.msra.mxu0 %v5908_v11  ;;  %v1335_v10 = vld [vmem:[#allocation9 + $0x348] sm:$0xff] }
 0x1cc   :  { %1070 = vmatprep.subr.bf16.mxu1 %v6767_v12  ;;  %3135 = vmatprep.subr.bf16.mxu0 %v5917_v14  ;;  %v1339_v11 = vld [vmem:[#allocation9 + $0x368] sm:$0xff]  ;;  %v5882_v12 = vcombine.low %v1230_v4, %v1234_v5  ;;  %v1310_v4 = vld [vmem:[#allocation9 + $0x280] sm:$0xff] }
 0x1cd   :  { %v5988_v14 = vcombine.low %v1335_v10, %v1339_v11  ;;  %v5989_v15 = vcombine.high %v1335_v10, %v1339_v11  ;;  %v1314_v5 = vld [vmem:[#allocation9 + $0x2a0] sm:$0xff] }
 0x1ce   :  { %v5962_v10 = vcombine.low %v1310_v4, %v1314_v5 }
 0x1cf   :  { %1071 = vmatpush1.bf16.msra.mxu1 %v6765_v17  ;;  %3136 = vmatpush1.bf16.msra.mxu0 %v5916_v18  ;;  %v1246_v17 = vld [vmem:[#allocation9 + $0x80] sm:$0xff] }
 0x1d0   :  { %1072 = vmatprep.subr.bf16.mxu1 %v6770_v20  ;;  %3137 = vmatprep.subr.bf16.mxu0 %v5925_v21  ;;  %v1250_v18 = vld [vmem:[#allocation9 + $0xa0] sm:$0xff]  ;;  %v1343_v20 = vld [vmem:[#allocation9 + $0x388] sm:$0xff]  ;;  %v5890_v21 = vcombine.low %v1238_v8, %v1242_v9 }
 0x1d1   :  { %v5898_v29 = vcombine.low %v1246_v17, %v1250_v18  ;;  %v1318_v8 = vld [vmem:[#allocation9 + $0x2c0] sm:$0xff] }
 0x1d2   :  { %v1322_v9 = vld [vmem:[#allocation9 + $0x2e0] sm:$0xff] }
 0x1d3   :  { %1073 = vmatpush1.bf16.msra.mxu1 %v6768_v24  ;;  %3138 = vmatpush1.bf16.msra.mxu0 %v5924_v25  ;;  %v5899_v24 = vcombine.high %v1246_v17, %v1250_v18  ;;  %v1254_v25 = vld [vmem:[#allocation9 + $0xc0] sm:$0xff]  ;;  %v5971_v11 = vcombine.high %v1318_v8, %v1322_v9 }
 0x1d4   :  { %1074 = vmatprep.subr.bf16.mxu1 %v6773_v26  ;;  %3139 = vmatprep.subr.bf16.mxu0 %v5933_v27  ;;  %v1258_v26 = vld [vmem:[#allocation9 + $0xe0] sm:$0xff]  ;;  %v1351_v27 = vld [vmem:[#allocation9 + $0x3c8] sm:$0xff] }
 0x1d5   :  { %v5906_v34 = vcombine.low %v1254_v25, %v1258_v26  ;;  %v1334_v17 = vld [vmem:[#allocation9 + $0x340] sm:$0xff] }
 0x1d6   :  { %v1338_v18 = vld [vmem:[#allocation9 + $0x360] sm:$0xff] }
 0x1d7   :  { %1075 = vmatpush1.bf16.msra.mxu1 %v6771_v30  ;;  %3140 = vmatpush1.bf16.msra.mxu0 %v5932_v31  ;;  %v6004_v30 = vcombine.low %v1351_v27, %v1355_v28  ;;  %v6005_v31 = vcombine.high %v1351_v27, %v1355_v28 }
 0x1d8   :  { %1076 = vmatprep.subr.bf16.mxu1 %v6776_v32  ;;  %3141 = vmatprep.subr.bf16.mxu0 %v5941_v33  ;;  %v1262_v32 = vld [vmem:[#allocation9 + $0x100] sm:$0xff] }
 0x1d9   :  { %v1266_v33 = vld [vmem:[#allocation9 + $0x120] sm:$0xff] }
 0x1db   :  { %1077 = vmatpush1.bf16.msra.mxu1 %v6774_v36  ;;  %3142 = vmatpush1.bf16.msra.mxu0 %v5940_v37  ;;  %v7687_v36 = vld [vmem:[#allocation9 + $0x420] sm:$0xff]  ;;  %v7689_v37 = vld [vmem:[#allocation9 + $0x408] sm:$0xff] }
 0x1dc   :  { %1078 = vmatprep.subr.bf16.mxu1 %v6779_v38  ;;  %3143 = vmatprep.subr.bf16.mxu0 %v5949_v39  ;;  %v5915_v38 = vcombine.high %v1262_v32, %v1266_v33  ;;  %v6010_v39 = vcombine.low %v7685_v35, %v7687_v36 }
 0x1df   :  { %1079 = vmatpush1.bf16.msra.mxu1 %v6777_v42  ;;  %3144 = vmatpush1.bf16.msra.mxu0 %v5948_v43  ;;  %v1274_v42 = vld [vmem:[#allocation9 + $0x160] sm:$0xff]  ;;  %v6012_v43 = vcombine.low %v7689_v37, %v7693_v40 }
 0x1e0   :  { %1089 = vmatprep.subr.bf16.mxu1 %v6782_v44  ;;  %3145 = vmatprep.subr.bf16.mxu0 %v5957_v45  ;;  %v6013_v44 = vcombine.high %v7689_v37, %v7693_v40  ;;  %v5914_v45 = vcombine.low %v1262_v32, %v1266_v33  ;;  %v5923_v46 = vcombine.high %v1270_v41, %v1274_v42  ;;  %v1390_v37 = vld [vmem:[#allocation9 + $0x500] sm:$0xff]  ;;  %v1391_v40 = vld [vmem:[#allocation9 + $0x508] sm:$0xff] }
 0x1e2   :  { %1081 = vmatmul.mubr.bf16.vlgmr.msra.gmra.mrb[8].mxu1 %v7667_v13  ;;  %v5981_v13 = vcombine.high %v1327_v62, %v1331_v63 }
 0x1e3   :  { %1090 = vmatpush1.bf16.msra.mxu1 %v6780_v48  ;;  %1121 = vmatprep.mubr.bf16.mxu1 %v7459_v53  ;;  %v1282_v48 = vld [vmem:[#allocation9 + $0x1a0] sm:$0xff] }
 0x1e4   :  { %1091 = vmatprep.subr.bf16.mxu1 %v6785_v49  ;;  %3146 = vmatpush1.bf16.msra.mxu0 %v5956_v50  ;;  %v5922_v49 = vcombine.low %v1270_v41, %v1274_v42  ;;  %v5931_v50 = vcombine.high %v1278_v47, %v1282_v48  ;;  %v5930_v54 = vcombine.low %v1278_v47, %v1282_v48 }
 0x1e5   :  { %3147 = vmatprep.subr.bf16.mxu0 %v5965_v51  ;;  %v1286_v51 = vld [vmem:[#allocation9 + $0x1c0] sm:$0xff] }
 0x1e6   :  { %v5938_v62 = vcombine.low %v1286_v51, %v1290_v52 }
 0x1e7   :  { %1092 = vmatpush1.bf16.msra.mxu1 %v6783_v57  ;;  %v5939_v57 = vcombine.high %v1286_v51, %v1290_v52 }
 0x1e8   :  { %6545 = vmatprep.subr.bf16.mxu1 %v7456_v0  ;;  %3148 = vmatpush1.bf16.msra.mxu0 %v5964_v59  ;;  %v1294_v59 = vld [vmem:[#allocation9 + $0x200] sm:$0xff] }
 0x1e9   :  { %3149 = vmatprep.subr.bf16.mxu0 %v5973_v60  ;;  %v1298_v60 = vld [vmem:[#allocation9 + $0x220] sm:$0xff] }
 0x1ea   :  { %v5947_v63 = vcombine.high %v1294_v59, %v1298_v60 }
 0x1ec   :  { %3150 = vmatpush1.bf16.msra.mxu0 %v5972_v1  ;;  %v1302_v1 = vld [vmem:[#allocation9 + $0x240] sm:$0xff] }
 0x1ed   :  { %3151 = vmatprep.subr.bf16.mxu0 %v5981_v13  ;;  %v1306_v13 = vld [vmem:[#allocation9 + $0x260] sm:$0xff] }
 0x1ee   :  { %5880 = vmatmul.mubr.msk.bf16.vlgmr.msra.gmra.mrb[8].mxu1 %vm962_vm6, %v7670_v19 }
 0x1ef   :  { %6546 = vmatpush3.bf16.msra.mxu1 %v6786_v2  ;;  %6549 = vmatprep.mubr.msk.bf16.mxu1 %vm7458_vm2, %v7456_v0  ;;  %v5946_v2 = vcombine.low %v1294_v59, %v1298_v60  ;;  %v1370_v59 = vld [vmem:[#allocation9 + $0x460] sm:$0xff]  ;;  %v1367_v60 = vld [vmem:[#allocation9 + $0x448] sm:$0xff] }
 0x1f0   :  { %6547 = vmatprep.subr.bf16.mxu1 %v7456_v0  ;;  %3152 = vmatpush1.bf16.msra.mxu0 %v5980_v3  ;;  %v1347_v0 = vld [vmem:[#allocation9 + $0x3a8] sm:$0xff]  ;;  %v5955_v3 = vcombine.high %v1302_v1, %v1306_v13 }
 0x1f1   :  { %3153 = vmatprep.subr.bf16.mxu0 %v5989_v15  ;;  %v5996_v22 = vcombine.low %v1343_v20, %v1347_v0  ;;  %v5997_v23 = vcombine.high %v1343_v20, %v1347_v0  ;;  %v5970_v15 = vcombine.low %v1318_v8, %v1322_v9  ;;  %v5987_v0 = vcombine.high %v1334_v17, %v1338_v18 }
 0x1f3   :  { %6548 = vmatpush3.bf16.msra.mxu1 %v6787_v6  ;;  %v5954_v6 = vcombine.low %v1302_v1, %v1306_v13 }
 0x1f4   :  { %3004 = vmatprep.subr.bf16.mxu1 %v5883_v7  ;;  %3154 = vmatpush1.bf16.msra.mxu0 %v5988_v14  ;;  %v5963_v7 = vcombine.high %v1310_v4, %v1314_v5  ;;  %v1330_v14 = vld [vmem:[#allocation9 + $0x320] sm:$0xff] }
 0x1f5   :  { %3155 = vmatprep.subr.bf16.mxu0 %v5997_v23  ;;  %v5986_v23 = vcombine.low %v1334_v17, %v1338_v18  ;;  %v1374_v4 = vld [vmem:[#allocation9 + $0x480] sm:$0xff] }
 0x1f6   :  { %6550 = vmatmul.mubr.msk.bf16.vlgmr.msra.gmra.mrb[12].mxu1 %vm962_vm6, %v7670_v19  ;;  %v5907_v19 = vcombine.high %v1254_v25, %v1258_v26  ;;  %v1350_v25 = vld [vmem:[#allocation9 + $0x3c0] sm:$0xff] }
 0x1f7   :  { %3005 = vmatpush1.bf16.msra.mxu1 %v5882_v12  ;;  %v1326_v12 = vld [vmem:[#allocation9 + $0x300] sm:$0xff] }
 0x1f8   :  { %3006 = vmatprep.subr.bf16.mxu1 %v5891_v16  ;;  %3156 = vmatpush1.bf16.msra.mxu0 %v5996_v22  ;;  %v5979_v16 = vcombine.high %v1326_v12, %v1330_v14  ;;  %v5978_v20 = vcombine.low %v1326_v12, %v1330_v14  ;;  %v1346_v22 = vld [vmem:[#allocation9 + $0x3a0] sm:$0xff] }
 0x1f9   :  { %3157 = vmatprep.subr.bf16.mxu0 %v6005_v31  ;;  %v1354_v26 = vld [vmem:[#allocation9 + $0x3e0] sm:$0xff]  ;;  %v7701_v31 = vld [vmem:[#allocation7] sm:$0x1f] }
 0x1fa   :  { %v6003_v28 = vcombine.high %v1350_v25, %v1354_v26  ;;  %v476_v33 = vrot.slane %v7701_v31, %v7659_v58  ;;  %v1378_v5 = vld [vmem:[#allocation9 + $0x4a0] sm:$0xff] }
 0x1fb   :  { %3007 = vmatpush1.bf16.msra.mxu1 %v5890_v21  ;;  %v1342_v21 = vld [vmem:[#allocation9 + $0x380] sm:$0xff]  ;;  %v6026_v17 = vcombine.low %v1374_v4, %v1378_v5 }
 0x1fc   :  { %3008 = vmatprep.subr.bf16.mxu1 %v5899_v24  ;;  %3158 = vmatpush1.bf16.msra.mxu0 %v6004_v30  ;;  %v5995_v24 = vcombine.high %v1342_v21, %v1346_v22  ;;  %v5994_v27 = vcombine.low %v1342_v21, %v1346_v22  ;;  %v6011_v30 = vcombine.high %v7685_v35, %v7687_v36  ;;  %v1382_v12 = vld [vmem:[#allocation9 + $0x4c0] sm:$0xff] }
 0x1fd   :  { %3168 = vmatprep.subr.bf16.mxu0 %v6013_v44  ;;  %v1386_v14 = vld [vmem:[#allocation9 + $0x4e0] sm:$0xff] }
 0x1fe   :  { %v6035_v35 = vcombine.high %v1382_v12, %v1386_v14 }
 0x1ff   :  { %3009 = vmatpush1.bf16.msra.mxu1 %v5898_v29  ;;  %v6002_v29 = vcombine.low %v1350_v25, %v1354_v26  ;;  %v1399_v25 = vld [vmem:[#allocation9 + $0x548] sm:$0xff] }
 0x200   :  { %3010 = vmatprep.subr.bf16.mxu1 %v5907_v19  ;;  %v472_v19 = vrot.slane %v7701_v31, %v7656_v56  ;;  %v1403_v26 = vld [vmem:[#allocation9 + $0x568] sm:$0xff] }
 0x203   :  { %3011 = vmatpush1.bf16.msra.mxu1 %v5906_v34 }
 0x204   :  { %3012 = vmatprep.subr.bf16.mxu1 %v5915_v38 }
 0x207   :  { %3013 = vmatpush1.bf16.msra.mxu1 %v5914_v45 }
 0x208   :  { %3014 = vmatprep.subr.bf16.mxu1 %v5923_v46 }
 0x20b   :  { %3015 = vmatpush1.bf16.msra.mxu1 %v5922_v49 }
 0x20c   :  { %3016 = vmatprep.subr.bf16.mxu1 %v5931_v50 }
 0x20f   :  { %3017 = vmatpush1.bf16.msra.mxu1 %v5930_v54  ;;  %v1366_v54 = vld [vmem:[#allocation9 + $0x440] sm:$0xff] }
 0x210   :  { %3018 = vmatprep.subr.bf16.mxu1 %v5939_v57  ;;  %v6018_v8 = vcombine.low %v1366_v54, %v1370_v59 }
 0x213   :  { %3019 = vmatpush1.bf16.msra.mxu1 %v5938_v62  ;;  %v1371_v62 = vld [vmem:[#allocation9 + $0x468] sm:$0xff] }
 0x214   :  { %3020 = vmatprep.subr.bf16.mxu1 %v5947_v63  ;;  %v6020_v9 = vcombine.low %v1367_v60, %v1371_v62 }
 0x217   :  { %3021 = vmatpush1.bf16.msra.mxu1 %v5946_v2  ;;  %v6019_v2 = vcombine.high %v1366_v54, %v1370_v59 }
 0x218   :  { %3022 = vmatprep.subr.bf16.mxu1 %v5955_v3  ;;  %v6021_v3 = vcombine.high %v1367_v60, %v1371_v62 }
 0x21b   :  { %3023 = vmatpush1.bf16.msra.mxu1 %v5954_v6  ;;  %v1375_v6 = vld [vmem:[#allocation9 + $0x488] sm:$0xff] }
 0x21c   :  { %3024 = vmatprep.subr.bf16.mxu1 %v5963_v7  ;;  %v1379_v7 = vld [vmem:[#allocation9 + $0x4a8] sm:$0xff] }
 0x21d   :  { %v6028_v18 = vcombine.low %v1375_v6, %v1379_v7 }
 0x21f   :  { %3025 = vmatpush1.bf16.msra.mxu1 %v5962_v10  ;;  %v6027_v10 = vcombine.high %v1374_v4, %v1378_v5  ;;  %v1427_v4 = vld [vmem:[#allocation9 + $0x628] sm:$0xff] }
 0x220   :  { %3026 = vmatprep.subr.bf16.mxu1 %v5971_v11  ;;  %v6029_v11 = vcombine.high %v1375_v6, %v1379_v7 }
 0x223   :  { %3027 = vmatpush1.bf16.msra.mxu1 %v5970_v15  ;;  %v1383_v15 = vld [vmem:[#allocation9 + $0x4c8] sm:$0xff] }
 0x224   :  { %3028 = vmatprep.subr.bf16.mxu1 %v5979_v16  ;;  %v1387_v16 = vld [vmem:[#allocation9 + $0x4e8] sm:$0xff] }
 0x225   :  { %v6037_v36 = vcombine.high %v1383_v15, %v1387_v16 }
 0x227   :  { %3029 = vmatpush1.bf16.msra.mxu1 %v5978_v20  ;;  %v6034_v20 = vcombine.low %v1382_v12, %v1386_v14  ;;  %v1435_v12 = vld [vmem:[#allocation9 + $0x668] sm:$0xff] }
 0x228   :  { %3030 = vmatprep.subr.bf16.mxu1 %v5987_v0  ;;  %v6036_v0 = vcombine.low %v1383_v15, %v1387_v16 }
 0x22b   :  { %3031 = vmatpush1.bf16.msra.mxu1 %v5986_v23  ;;  %v1398_v23 = vld [vmem:[#allocation9 + $0x540] sm:$0xff] }
 0x22c   :  { %3032 = vmatprep.subr.bf16.mxu1 %v5995_v24  ;;  %v1402_v24 = vld [vmem:[#allocation9 + $0x560] sm:$0xff] }
 0x22f   :  { %3033 = vmatpush1.bf16.msra.mxu1 %v5994_v27 }
 0x230   :  { %3034 = vmatprep.subr.bf16.mxu1 %v6003_v28 }
 0x233   :  { %3035 = vmatpush1.bf16.msra.mxu1 %v6002_v29  ;;  %v6051_v29 = vcombine.high %v1398_v23, %v1402_v24 }
 0x234   :  { %3045 = vmatprep.subr.bf16.mxu1 %v6011_v30  ;;  %v6053_v30 = vcombine.high %v1399_v25, %v1403_v26 }
 0x271   :  { %v1000_v32 = vpop.f32.mrb[0].mxu0 }
 0x272   :  { %v1002_v34 = vpop.f32.mrb[1].mxu0  ;;  %v1001_v41 = vadd.f32 %v1000_v32, %v472_v19  ;;  %v1406_v19 = vld [vmem:[#allocation9 + $0x580] sm:$0xff] }
 0x273   :  { %v1004_v38 = vpop.f32.mrb[2].mxu0  ;;  %v1003_v44 = vadd.f32 %v1002_v34, %v476_v33  ;;  %v1410_v32 = vld [vmem:[#allocation9 + $0x5a0] sm:$0xff]  ;;  %v1407_v33 = vld [vmem:[#allocation9 + $0x588] sm:$0xff] }
 0x274   :  { %v1005_v42 = vpop.f32.mrb[3].mxu0  ;;  %v1411_v34 = vld [vmem:[#allocation9 + $0x5a8] sm:$0xff]  ;;  %v6050_v38 = vcombine.low %v1398_v23, %v1402_v24 }
 0x275   :  { %v1041_v45 = vpop.f32.mrb[4].mxu1  ;;  %v6060_v59 = vcombine.low %v1407_v33, %v1411_v34  ;;  %v1451_v23 = vld [vmem:[#allocation9 + $0x6e8] sm:$0xff] }
 0x276   :  { %v1042_v46 = vadd.f32 %v1041_v45, %v1001_v41  ;;  %v1043_v47 = vpop.f32.mrb[5].mxu1  ;;  %v6052_v41 = vcombine.low %v1399_v25, %v1403_v26  ;;  %v6061_v45 = vcombine.high %v1407_v33, %v1411_v34 }
 0x277   :  { %v1044_v48 = vadd.f32 %v1043_v47, %v1003_v44  ;;  %v1045_v49 = vpop.f32.mrb[6].mxu1  ;;  %v6059_v44 = vcombine.high %v1406_v19, %v1410_v32 }
 0x278   :  { %vm1210_vm7 = vcmp.gt.f32.partialorder %v1042_v46, 0.0  ;;  %v1215_v50 = vmul.f32 0.01, %v1042_v46  ;;  %v1046_v51 = vpop.f32.mrb[7].mxu1  ;;  %v1415_v49 = vld [vmem:[#allocation9 + $0x5c8] sm:$0xff] }
 0x279   :  { %vm1211_vm8 = vcmp.gt.f32.partialorder %v1044_v48, 0.0  ;;  %v1216_v52 = vmul.f32 0.01, %v1044_v48 }
 0x27a   :  { %v1220_v57 = vsel %vm1210_vm7, %v1042_v46, %v1215_v50  ;;  %v1414_v46 = vld [vmem:[#allocation9 + $0x5c0] sm:$0xff]  ;;  %v1419_v50 = vld [vmem:[#allocation9 + $0x5e8] sm:$0xff] }
 0x27b   :  { %v1221_v63 = vsel %vm1211_vm8, %v1044_v48, %v1216_v52  ;;  %v7709_v13 = vpack.c.bf16 %v1220_v57, %v1220_v57  ;;  %v1418_v48 = vld [vmem:[#allocation9 + $0x5e0] sm:$0xff]  ;;  %v6058_v57 = vcombine.low %v1406_v19, %v1410_v32  ;;  %v6069_v62 = vcombine.high %v1415_v49, %v1419_v50  ;;  %v1459_v19 = vld [vmem:[#allocation9 + $0x728] sm:$0xff] }
 0x27c   :  { %v7707_v1 = vpack.c.bf16 %v1221_v63, %v1221_v63  ;;  %v6067_v60 = vcombine.high %v1414_v46, %v1418_v48  ;;  %v1422_v63 = vld [vmem:[#allocation9 + $0x600] sm:$0xff]  ;;  %v6066_v5 = vcombine.low %v1414_v46, %v1418_v48  ;;  %v6068_v6 = vcombine.low %v1415_v49, %v1419_v50 }
 0x27d   :  { %v1470_v50 = vld [vmem:[#allocation9 + $0x780] sm:$0xff] }
 0x27e   :  { %3036 = vmatprep.mubr.bf16.mxu1 %v7707_v1  ;;  %3159 = vmatprep.mubr.bf16.mxu0 %v7707_v1 }
 0x27f   :  { %3037 = vmatmul.mubr.bf16.vlgmr.msra.gmra.mrb[16].mxu1 %v7709_v13  ;;  %3160 = vmatmul.mubr.bf16.vlgmr.msra.gmra.mrb[8].mxu0 %v7709_v13 }
 0x280   :  { %3046 = vmatpush1.bf16.msra.mxu1 %v6010_v39  ;;  %3169 = vmatpush1.bf16.msra.mxu0 %v6012_v43  ;;  %v1394_v39 = vld [vmem:[#allocation9 + $0x520] sm:$0xff]  ;;  %v1395_v43 = vld [vmem:[#allocation9 + $0x528] sm:$0xff] }
 0x281   :  { %3047 = vmatprep.subr.bf16.mxu1 %v6019_v2  ;;  %3170 = vmatprep.subr.bf16.mxu0 %v6021_v3  ;;  %v6043_v21 = vcombine.high %v1390_v37, %v1394_v39  ;;  %v6045_v22 = vcombine.high %v1391_v40, %v1395_v43  ;;  %v6042_v27 = vcombine.low %v1390_v37, %v1394_v39  ;;  %v1426_v2 = vld [vmem:[#allocation9 + $0x620] sm:$0xff]  ;;  %v1423_v3 = vld [vmem:[#allocation9 + $0x608] sm:$0xff] }
 0x282   :  { %v6044_v28 = vcombine.low %v1391_v40, %v1395_v43  ;;  %v6075_v7 = vcombine.high %v1422_v63, %v1426_v2  ;;  %v6074_v14 = vcombine.low %v1422_v63, %v1426_v2  ;;  %v6076_v15 = vcombine.low %v1423_v3, %v1427_v4  ;;  %v1443_v37 = vld [vmem:[#allocation9 + $0x6a8] sm:$0xff]  ;;  %v1478_v2 = vld [vmem:[#allocation9 + $0x7c0] sm:$0xff] }
 0x284   :  { %3048 = vmatpush1.bf16.msra.mxu1 %v6018_v8  ;;  %3171 = vmatpush1.bf16.msra.mxu0 %v6020_v9  ;;  %v6077_v8 = vcombine.high %v1423_v3, %v1427_v4  ;;  %v1430_v9 = vld [vmem:[#allocation9 + $0x640] sm:$0xff]  ;;  %v1479_v4 = vld [vmem:[#allocation9 + $0x7c8] sm:$0xff] }
 0x285   :  { %3049 = vmatprep.subr.bf16.mxu1 %v6027_v10  ;;  %3172 = vmatprep.subr.bf16.mxu0 %v6029_v11  ;;  %v1434_v10 = vld [vmem:[#allocation9 + $0x660] sm:$0xff]  ;;  %v1431_v11 = vld [vmem:[#allocation9 + $0x648] sm:$0xff] }
 0x286   :  { %v6083_v16 = vcombine.high %v1430_v9, %v1434_v10  ;;  %v6082_v39 = vcombine.low %v1430_v9, %v1434_v10  ;;  %v6084_v40 = vcombine.low %v1431_v11, %v1435_v12  ;;  %v1482_v3 = vld [vmem:[#allocation9 + $0x7e0] sm:$0xff] }
 0x287   :  { %v1486_v10 = vld [vmem:[#allocation9 + $0x800] sm:$0xff] }
 0x288   :  { %3050 = vmatpush1.bf16.msra.mxu1 %v6026_v17  ;;  %3173 = vmatpush1.bf16.msra.mxu0 %v6028_v18  ;;  %v6085_v17 = vcombine.high %v1431_v11, %v1435_v12  ;;  %v1438_v18 = vld [vmem:[#allocation9 + $0x680] sm:$0xff]  ;;  %v1487_v12 = vld [vmem:[#allocation9 + $0x808] sm:$0xff] }
 0x289   :  { %3051 = vmatprep.subr.bf16.mxu1 %v6035_v35  ;;  %3174 = vmatprep.subr.bf16.mxu0 %v6037_v36  ;;  %v1442_v35 = vld [vmem:[#allocation9 + $0x6a0] sm:$0xff]  ;;  %v1439_v36 = vld [vmem:[#allocation9 + $0x688] sm:$0xff] }
 0x28a   :  { %v6091_v43 = vcombine.high %v1438_v18, %v1442_v35  ;;  %v6090_v24 = vcombine.low %v1438_v18, %v1442_v35  ;;  %v6092_v25 = vcombine.low %v1439_v36, %v1443_v37  ;;  %v1490_v11 = vld [vmem:[#allocation9 + $0x820] sm:$0xff]  ;;  %v7724_v35 = vsub.s32 3, %v7653_v55 }
 0x28c   :  { %3052 = vmatpush1.bf16.msra.mxu1 %v6034_v20  ;;  %3175 = vmatpush1.bf16.msra.mxu0 %v6036_v0  ;;  %v6093_v20 = vcombine.high %v1439_v36, %v1443_v37  ;;  %v1446_v0 = vld [vmem:[#allocation9 + $0x6c0] sm:$0xff]  ;;  %v480_v36 = vrot.slane %v7701_v31, %v7664_v61  ;;  %v484_v37 = vrot.slane %v7701_v31, %v7724_v35 }
 0x28d   :  { %3053 = vmatprep.subr.bf16.mxu1 %v6043_v21  ;;  %3176 = vmatprep.subr.bf16.mxu0 %v6045_v22  ;;  %v1450_v21 = vld [vmem:[#allocation9 + $0x6e0] sm:$0xff]  ;;  %v1447_v22 = vld [vmem:[#allocation9 + $0x6c8] sm:$0xff] }
 0x28e   :  { %v6099_v26 = vcombine.high %v1446_v0, %v1450_v21  ;;  %v6098_v32 = vcombine.low %v1446_v0, %v1450_v21  ;;  %v6100_v33 = vcombine.low %v1447_v22, %v1451_v23 }
 0x290   :  { %3054 = vmatpush1.bf16.msra.mxu1 %v6042_v27  ;;  %3177 = vmatpush1.bf16.msra.mxu0 %v6044_v28  ;;  %v6101_v27 = vcombine.high %v1447_v22, %v1451_v23  ;;  %v1454_v28 = vld [vmem:[#allocation9 + $0x700] sm:$0xff] }
 0x291   :  { %v6483_v42 = vpop.f32.mrb[4].mxu0  ;;  %3055 = vmatprep.subr.bf16.mxu1 %v6051_v29  ;;  %3178 = vmatprep.subr.bf16.mxu0 %v6053_v30  ;;  %v1458_v29 = vld [vmem:[#allocation9 + $0x720] sm:$0xff]  ;;  %v1455_v30 = vld [vmem:[#allocation9 + $0x708] sm:$0xff] }
 0x292   :  { %v6484_v47 = vpop.f32.mrb[5].mxu0  ;;  %v6107_v34 = vcombine.high %v1454_v28, %v1458_v29  ;;  %v6106_v46 = vcombine.low %v1454_v28, %v1458_v29  ;;  %v1498_v28 = vld [vmem:[#allocation9 + $0x860] sm:$0xff]  ;;  %v1495_v29 = vld [vmem:[#allocation9 + $0x848] sm:$0xff] }
 0x293   :  { %v7721_v51 = vadd.f32 %v6484_v47, %v6483_v42  ;;  %v6486_v52 = vpop.f32.mrb[6].mxu0  ;;  %v1466_v42 = vld [vmem:[#allocation9 + $0x760] sm:$0xff]  ;;  %v6108_v47 = vcombine.low %v1455_v30, %v1459_v19 }
 0x294   :  { %v6487_v54 = vpop.f32.mrb[7].mxu0  ;;  %3056 = vmatpush1.bf16.msra.mxu1 %v6050_v38  ;;  %3179 = vmatpush1.bf16.msra.mxu0 %v6052_v41  ;;  %v6109_v38 = vcombine.high %v1455_v30, %v1459_v19  ;;  %v1462_v41 = vld [vmem:[#allocation9 + $0x740] sm:$0xff]  ;;  %v1499_v30 = vld [vmem:[#allocation9 + $0x868] sm:$0xff] }
 0x295   :  { %3057 = vmatprep.subr.bf16.mxu1 %v6059_v44  ;;  %3180 = vmatprep.subr.bf16.mxu0 %v6061_v45  ;;  %v1463_v44 = vld [vmem:[#allocation9 + $0x748] sm:$0xff]  ;;  %v6115_v48 = vcombine.high %v1462_v41, %v1466_v42  ;;  %v1474_v52 = vld [vmem:[#allocation9 + $0x7a0] sm:$0xff] }
 0x296   :  { %v1467_v45 = vld [vmem:[#allocation9 + $0x768] sm:$0xff] }
 0x297   :  { %v6117_v49 = vcombine.high %v1463_v44, %v1467_v45  ;;  %v1471_v54 = vld [vmem:[#allocation9 + $0x788] sm:$0xff] }
 0x298   :  { %3058 = vmatpush1.bf16.msra.mxu1 %v6058_v57  ;;  %3181 = vmatpush1.bf16.msra.mxu0 %v6060_v59  ;;  %v1475_v57 = vld [vmem:[#allocation9 + $0x7a8] sm:$0xff]  ;;  %v6114_v59 = vcombine.low %v1462_v41, %v1466_v42 }
 0x299   :  { %3059 = vmatprep.subr.bf16.mxu1 %v6067_v60  ;;  %3182 = vmatprep.subr.bf16.mxu0 %v6069_v62  ;;  %v6116_v60 = vcombine.low %v1463_v44, %v1467_v45  ;;  %v6123_v62 = vcombine.high %v1470_v50, %v1474_v52  ;;  %v6125_v63 = vcombine.high %v1471_v54, %v1475_v57 }
 0x29a   :  { %v6149_v45 = vcombine.high %v1495_v29, %v1499_v30 }
 0x29c   :  { %3060 = vmatpush1.bf16.msra.mxu1 %v6066_v5  ;;  %3183 = vmatpush1.bf16.msra.mxu0 %v6068_v6  ;;  %v1483_v5 = vld [vmem:[#allocation9 + $0x7e8] sm:$0xff]  ;;  %v6122_v6 = vcombine.low %v1470_v50, %v1474_v52 }
 0x29d   :  { %3061 = vmatprep.subr.bf16.mxu1 %v6075_v7  ;;  %3184 = vmatprep.subr.bf16.mxu0 %v6077_v8  ;;  %v6124_v7 = vcombine.low %v1471_v54, %v1475_v57  ;;  %v6131_v8 = vcombine.high %v1478_v2, %v1482_v3  ;;  %v6133_v9 = vcombine.high %v1479_v4, %v1483_v5  ;;  %v1507_v50 = vld [vmem:[#allocation9 + $0x8a8] sm:$0xff] }
 0x29e   :  { %v6148_v57 = vcombine.low %v1495_v29, %v1499_v30 }
 0x2a0   :  { %3062 = vmatpush1.bf16.msra.mxu1 %v6074_v14  ;;  %3185 = vmatpush1.bf16.msra.mxu0 %v6076_v15  ;;  %v1491_v14 = vld [vmem:[#allocation9 + $0x828] sm:$0xff]  ;;  %v6130_v15 = vcombine.low %v1478_v2, %v1482_v3 }
 0x2a1   :  { %3063 = vmatprep.subr.bf16.mxu1 %v6083_v16  ;;  %3186 = vmatprep.subr.bf16.mxu0 %v6085_v17  ;;  %v6132_v16 = vcombine.low %v1479_v4, %v1483_v5  ;;  %v6139_v17 = vcombine.high %v1486_v10, %v1490_v11  ;;  %v6141_v18 = vcombine.high %v1487_v12, %v1491_v14  ;;  %v1511_v2 = vld [vmem:[#allocation9 + $0x8c8] sm:$0xff] }
 0x2a2   :  { %v1515_v3 = vld [vmem:[#allocation9 + $0x8e8] sm:$0xff] }
 0x2a4   :  { %3064 = vmatpush1.bf16.msra.mxu1 %v6082_v39  ;;  %3187 = vmatpush1.bf16.msra.mxu0 %v6084_v40  ;;  %v487_v39 = vsub.s32 4, %v7653_v55 }
 0x2a5   :  { %3065 = vmatprep.subr.bf16.mxu1 %v6091_v43  ;;  %3188 = vmatprep.subr.bf16.mxu0 %v6093_v20 }
 0x2a8   :  { %3066 = vmatpush1.bf16.msra.mxu1 %v6090_v24  ;;  %3189 = vmatpush1.bf16.msra.mxu0 %v6092_v25  ;;  %v488_v24 = vrot.slane %v7701_v31, %v487_v39  ;;  %v1502_v31 = vld [vmem:[#allocation9 + $0x880] sm:$0xff] }
 0x2a9   :  { %3067 = vmatprep.subr.bf16.mxu1 %v6099_v26  ;;  %3190 = vmatprep.subr.bf16.mxu0 %v6101_v27  ;;  %v1494_v26 = vld [vmem:[#allocation9 + $0x840] sm:$0xff] }
 0x2aa   :  { %v6147_v44 = vcombine.high %v1494_v26, %v1498_v28  ;;  %v6146_v54 = vcombine.low %v1494_v26, %v1498_v28  ;;  %v1249_v26 = vld [vmem:[#allocation9 + $0x98] sm:$0xff] }
 0x2ac   :  { %3068 = vmatpush1.bf16.msra.mxu1 %v6098_v32  ;;  %3191 = vmatpush1.bf16.msra.mxu0 %v6100_v33  ;;  %v1165_v33 = vadd.f32 %v7721_v51, %v488_v24  ;;  %v1248_v24 = vld [vmem:[#allocation9 + $0x90] sm:$0xff] }
 0x2ad   :  { %3069 = vmatprep.subr.bf16.mxu1 %v6107_v34  ;;  %3192 = vmatprep.subr.bf16.mxu0 %v6109_v38  ;;  %v6138_v34 = vcombine.low %v1486_v10, %v1490_v11  ;;  %v6140_v38 = vcombine.low %v1487_v12, %v1491_v14  ;;  %v1236_v10 = vld [vmem:[#allocation9 + $0x30] sm:$0xff]  ;;  %v1233_v11 = vld [vmem:[#allocation9 + $0x18] sm:$0xff] }
 0x2ae   :  { %v1237_v12 = vld [vmem:[#allocation9 + $0x38] sm:$0xff] }
 0x2b0   :  { %3070 = vmatpush1.bf16.msra.mxu1 %v6106_v46  ;;  %3193 = vmatpush1.bf16.msra.mxu0 %v6108_v47 }
 0x2b1   :  { %3071 = vmatprep.subr.bf16.mxu1 %v6115_v48  ;;  %3194 = vmatprep.subr.bf16.mxu0 %v6117_v49  ;;  %v1506_v48 = vld [vmem:[#allocation9 + $0x8a0] sm:$0xff]  ;;  %v1503_v49 = vld [vmem:[#allocation9 + $0x888] sm:$0xff] }
 0x2b2   :  { %v6154_v4 = vcombine.low %v1502_v31, %v1506_v48  ;;  %v6156_v5 = vcombine.low %v1503_v49, %v1507_v50 }
 0x2b4   :  { %3072 = vmatpush1.bf16.msra.mxu1 %v6114_v59  ;;  %3195 = vmatpush1.bf16.msra.mxu0 %v6116_v60  ;;  %v6155_v59 = vcombine.high %v1502_v31, %v1506_v48  ;;  %v6157_v60 = vcombine.high %v1503_v49, %v1507_v50  ;;  %v1268_v48 = vld [vmem:[#allocation9 + $0x130] sm:$0xff]  ;;  %v1269_v49 = vld [vmem:[#allocation9 + $0x138] sm:$0xff] }
 0x2b5   :  { %3073 = vmatprep.subr.bf16.mxu1 %v6123_v62  ;;  %3196 = vmatprep.subr.bf16.mxu0 %v6125_v63  ;;  %v1510_v62 = vld [vmem:[#allocation9 + $0x8c0] sm:$0xff] }
 0x2b6   :  { %v1514_v63 = vld [vmem:[#allocation9 + $0x8e0] sm:$0xff] }
 0x2b7   :  { %v6162_v14 = vcombine.low %v1510_v62, %v1514_v63 }
 0x2b8   :  { %3074 = vmatpush1.bf16.msra.mxu1 %v6122_v6  ;;  %3197 = vmatpush1.bf16.msra.mxu0 %v6124_v7  ;;  %v6163_v6 = vcombine.high %v1510_v62, %v1514_v63  ;;  %v6165_v7 = vcombine.high %v1511_v2, %v1515_v3  ;;  %v1277_v62 = vld [vmem:[#allocation9 + $0x178] sm:$0xff] }
 0x2b9   :  { %3075 = vmatprep.subr.bf16.mxu1 %v6131_v8  ;;  %3198 = vmatprep.subr.bf16.mxu0 %v6133_v9  ;;  %v1232_v8 = vld [vmem:[#allocation9 + $0x10] sm:$0xff] }
 0x2bc   :  { %3076 = vmatpush1.bf16.msra.mxu1 %v6130_v15  ;;  %3199 = vmatpush1.bf16.msra.mxu0 %v6132_v16  ;;  %v6164_v15 = vcombine.low %v1511_v2, %v1515_v3  ;;  %v5887_v16 = vcombine.high %v1232_v8, %v1236_v10 }
 0x2bd   :  { %3086 = vmatprep.subr.bf16.mxu1 %v6139_v17  ;;  %3209 = vmatprep.subr.bf16.mxu0 %v6141_v18  ;;  %v5889_v17 = vcombine.high %v1233_v11, %v1237_v12 }
 0x2c1   :  { %v1123_v40 = vpop.f32.mrb[8].mxu1 }
 0x2c2   :  { %v6564_v43 = vadd.f32 %v1123_v40, %v480_v36  ;;  %v1125_v20 = vpop.f32.mrb[9].mxu1  ;;  %v1240_v36 = vld [vmem:[#allocation9 + $0x50] sm:$0xff]  ;;  %v1241_v40 = vld [vmem:[#allocation9 + $0x58] sm:$0xff] }
 0x2c3   :  { %v6565_v0 = vadd.f32 %v1125_v20, %v484_v37  ;;  %v1127_v21 = vpop.f32.mrb[10].mxu1  ;;  %v1244_v37 = vld [vmem:[#allocation9 + $0x70] sm:$0xff]  ;;  %v5886_v20 = vcombine.low %v1232_v8, %v1236_v10  ;;  %v1285_v8 = vld [vmem:[#allocation9 + $0x1b8] sm:$0xff] }
 0x2c4   :  { %vm1212_vm9 = vcmp.gt.f32.partialorder %v6564_v43, 0.0  ;;  %v1217_v22 = vmul.f32 0.01, %v6564_v43  ;;  %v1128_v23 = vpop.f32.mrb[11].mxu1  ;;  %v5888_v21 = vcombine.low %v1233_v11, %v1237_v12  ;;  %v5894_v28 = vcombine.low %v1240_v36, %v1244_v37 }
 0x2c5   :  { %vm1213_vm10 = vcmp.gt.f32.partialorder %v6565_v0, 0.0  ;;  %v1218_v25 = vmul.f32 0.01, %v6565_v0 }
 0x2c6   :  { %v1222_v27 = vsel %vm1212_vm9, %v6564_v43, %v1217_v22  ;;  %v1245_v43 = vld [vmem:[#allocation9 + $0x78] sm:$0xff]  ;;  %v5895_v22 = vcombine.high %v1240_v36, %v1244_v37 }
 0x2c7   :  { %v1223_v19 = vsel %vm1213_vm10, %v6565_v0, %v1218_v25  ;;  %v7737_v41 = vpack.c.bf16 %v1222_v27, %v1222_v27  ;;  %v5897_v23 = vcombine.high %v1241_v40, %v1245_v43  ;;  %v1252_v25 = vld [vmem:[#allocation9 + $0xb0] sm:$0xff]  ;;  %v1253_v27 = vld [vmem:[#allocation9 + $0xb8] sm:$0xff]  ;;  %v5896_v29 = vcombine.low %v1241_v40, %v1245_v43 }
 0x2c8   :  { %v7734_v32 = vpack.c.bf16 %v1223_v19, %v1223_v19  ;;  %v5903_v30 = vcombine.high %v1248_v24, %v1252_v25  ;;  %v5905_v19 = vcombine.high %v1249_v26, %v1253_v27  ;;  %v1296_v43 = vld [vmem:[#allocation9 + $0x210] sm:$0xff] }
 0x2c9   :  { %v1204_v42 = vpop.f32.mrb[12].mxu1 }
 0x2ca   :  { %v1205_v46 = vadd.f32 %v1204_v42, %v1165_v33  ;;  %v6551_v47 = vpop.f32.mrb[13].mxu1  ;;  %3077 = vmatprep.mubr.bf16.mxu1 %v7734_v32  ;;  %3200 = vmatprep.mubr.bf16.mxu0 %v7734_v32  ;;  %v1256_v33 = vld [vmem:[#allocation9 + $0xd0] sm:$0xff]  ;;  %v1261_v42 = vld [vmem:[#allocation9 + $0xf8] sm:$0xff] }
 0x2cb   :  { %v1207_v52 = vpop.f32.mrb[14].mxu1  ;;  %3078 = vmatmul.mubr.bf16.vlgmr.msra.gmra.mrb[16].mxu1 %v7737_v41  ;;  %3201 = vmatmul.mubr.bf16.vlgmr.msra.gmra.mrb[8].mxu0 %v7737_v41  ;;  %v1264_v47 = vld [vmem:[#allocation9 + $0x110] sm:$0xff] }
 0x2cc   :  { %3087 = vmatpush1.bf16.msra.mxu1 %v6138_v34  ;;  %3210 = vmatpush1.bf16.msra.mxu0 %v6140_v38  ;;  %v6552_v51 = vpop.f32.mrb[15].mxu1  ;;  %v1219_v9 = vmul.f32 0.01, %v1205_v46  ;;  %vm1214_vm11 = vcmp.gt.f32.partialorder %v1205_v46, 0.0  ;;  %v1260_v34 = vld [vmem:[#allocation9 + $0xf0] sm:$0xff]  ;;  %v1257_v38 = vld [vmem:[#allocation9 + $0xd8] sm:$0xff]  ;;  %v5918_v63 = vcombine.low %v1264_v47, %v1268_v48 }
 0x2cd   :  { %3088 = vmatprep.subr.bf16.mxu1 %v6147_v44  ;;  %3211 = vmatprep.subr.bf16.mxu0 %v6149_v45  ;;  %v5902_v44 = vcombine.low %v1248_v24, %v1252_v25  ;;  %v5904_v45 = vcombine.low %v1249_v26, %v1253_v27  ;;  %v5911_v31 = vcombine.high %v1256_v33, %v1260_v34  ;;  %v1304_v27 = vld [vmem:[#allocation9 + $0x250] sm:$0xff] }
 0x2ce   :  { %3118 = vmatprep.mubr.bf16.mxu1 %v7459_v53  ;;  %3241 = vmatprep.mubr.bf16.mxu0 %v7459_v53  ;;  %v1224_v18 = vsel %vm1214_vm11, %v1205_v46, %v1219_v9  ;;  %v5913_v46 = vcombine.high %v1257_v38, %v1261_v42  ;;  %v5910_v50 = vcombine.low %v1256_v33, %v1260_v34 }
 0x2cf   :  { %v7745_v0 = vpack.c.bf16 %v1224_v18, %v1224_v18  ;;  %v5912_v52 = vcombine.low %v1257_v38, %v1261_v42  ;;  %v5919_v51 = vcombine.high %v1264_v47, %v1268_v48  ;;  %v1312_v42 = vld [vmem:[#allocation9 + $0x290] sm:$0xff] }
 0x2d0   :  { %3089 = vmatpush1.bf16.msra.mxu1 %v6146_v54  ;;  %3212 = vmatpush1.bf16.msra.mxu0 %v6148_v57  ;;  %v1272_v57 = vld [vmem:[#allocation9 + $0x150] sm:$0xff] }
 0x2d1   :  { %3090 = vmatprep.subr.bf16.mxu1 %v6155_v59  ;;  %3213 = vmatprep.subr.bf16.mxu0 %v6157_v60  ;;  %v1276_v59 = vld [vmem:[#allocation9 + $0x170] sm:$0xff]  ;;  %v1273_v60 = vld [vmem:[#allocation9 + $0x158] sm:$0xff] }
 0x2d2   :  { %v5927_v3 = vcombine.high %v1272_v57, %v1276_v59  ;;  %v5926_v9 = vcombine.low %v1272_v57, %v1276_v59  ;;  %v5928_v10 = vcombine.low %v1273_v60, %v1277_v62 }
 0x2d4   :  { %3091 = vmatpush1.bf16.msra.mxu1 %v6154_v4  ;;  %3214 = vmatpush1.bf16.msra.mxu0 %v6156_v5  ;;  %v5929_v4 = vcombine.high %v1273_v60, %v1277_v62  ;;  %v1280_v5 = vld [vmem:[#allocation9 + $0x190] sm:$0xff] }
 0x2d5   :  { %3092 = vmatprep.subr.bf16.mxu1 %v6163_v6  ;;  %3215 = vmatprep.subr.bf16.mxu0 %v6165_v7  ;;  %v1284_v6 = vld [vmem:[#allocation9 + $0x1b0] sm:$0xff]  ;;  %v1281_v7 = vld [vmem:[#allocation9 + $0x198] sm:$0xff] }
 0x2d6   :  { %v5935_v11 = vcombine.high %v1280_v5, %v1284_v6  ;;  %v5937_v12 = vcombine.high %v1281_v7, %v1285_v8  ;;  %v5934_v18 = vcombine.low %v1280_v5, %v1284_v6  ;;  %v5936_v36 = vcombine.low %v1281_v7, %v1285_v8  ;;  %v1328_v62 = vld [vmem:[#allocation9 + $0x310] sm:$0xff] }
 0x2d7   :  { %v1336_v8 = vld [vmem:[#allocation9 + $0x350] sm:$0xff] }
 0x2d8   :  { %3093 = vmatpush1.bf16.msra.mxu1 %v6162_v14  ;;  %3216 = vmatpush1.bf16.msra.mxu0 %v6164_v15  ;;  %v1288_v14 = vld [vmem:[#allocation9 + $0x1d0] sm:$0xff] }
 0x2d9   :  { %3250 = vmatprep.subr.bf16.mxu1 %v5887_v16  ;;  %3373 = vmatprep.subr.bf16.mxu0 %v5889_v17  ;;  %v1292_v15 = vld [vmem:[#allocation9 + $0x1f0] sm:$0xff]  ;;  %v1289_v16 = vld [vmem:[#allocation9 + $0x1d8] sm:$0xff] }
 0x2da   :  { %v1293_v17 = vld [vmem:[#allocation9 + $0x1f8] sm:$0xff]  ;;  %v5943_v37 = vcombine.high %v1288_v14, %v1292_v15 }
 0x2db   :  { %6170 = vmatmul.mubr.msk.bf16.vlgmr.msra.gmra.mrb[16].mxu1 %vm3000_vm12, %v7745_v0  ;;  %6171 = vmatmul.mubr.msk.bf16.vlgmr.msra.gmra.mrb[8].mxu0 %vm3000_vm12, %v7745_v0  ;;  %v5945_v40 = vcombine.high %v1289_v16, %v1293_v17  ;;  %v5944_v24 = vcombine.low %v1289_v16, %v1293_v17  ;;  %v1344_v17 = vld [vmem:[#allocation9 + $0x390] sm:$0xff] }
 0x2dc   :  { %3251 = vmatpush1.bf16.msra.mxu1 %v5886_v20  ;;  %3282 = vmatprep.mubr.bf16.mxu1 %v7707_v1  ;;  %v1300_v20 = vld [vmem:[#allocation9 + $0x230] sm:$0xff] }
 0x2dd   :  { %3374 = vmatpush1.bf16.msra.mxu0 %v5888_v21  ;;  %3405 = vmatprep.mubr.bf16.mxu0 %v7707_v1  ;;  %v1265_v1 = vld [vmem:[#allocation9 + $0x118] sm:$0xff]  ;;  %v5951_v25 = vcombine.high %v1296_v43, %v1300_v20 }
 0x2de   :  { %3252 = vmatprep.subr.bf16.mxu1 %v5895_v22  ;;  %3375 = vmatprep.subr.bf16.mxu0 %v5897_v23  ;;  %v5921_v54 = vcombine.high %v1265_v1, %v1269_v49  ;;  %v5920_v2 = vcombine.low %v1265_v1, %v1269_v49  ;;  %v1297_v21 = vld [vmem:[#allocation9 + $0x218] sm:$0xff]  ;;  %v5942_v23 = vcombine.low %v1288_v14, %v1292_v15  ;;  %v1320_v49 = vld [vmem:[#allocation9 + $0x2d0] sm:$0xff] }
 0x2df   :  { %v1301_v22 = vld [vmem:[#allocation9 + $0x238] sm:$0xff] }
 0x2e0   :  { %3253 = vmatpush1.bf16.msra.mxu1 %v5894_v28  ;;  %v5953_v26 = vcombine.high %v1297_v21, %v1301_v22  ;;  %v1308_v28 = vld [vmem:[#allocation9 + $0x270] sm:$0xff]  ;;  %v5952_v33 = vcombine.low %v1297_v21, %v1301_v22 }
 0x2e1   :  { %3376 = vmatpush1.bf16.msra.mxu0 %v5896_v29  ;;  %3254 = vmatprep.subr.bf16.mxu1 %v5903_v30  ;;  %v1305_v29 = vld [vmem:[#allocation9 + $0x258] sm:$0xff]  ;;  %v5959_v34 = vcombine.high %v1304_v27, %v1308_v28  ;;  %v1352_v22 = vld [vmem:[#allocation9 + $0x3d0] sm:$0xff] }
 0x2e2   :  { %3377 = vmatprep.subr.bf16.mxu0 %v5905_v19  ;;  %v1309_v30 = vld [vmem:[#allocation9 + $0x278] sm:$0xff]  ;;  %v5950_v19 = vcombine.low %v1296_v43, %v1300_v20 }
 0x2e3   :  { %v5961_v38 = vcombine.high %v1305_v29, %v1309_v30  ;;  %v5960_v47 = vcombine.low %v1305_v29, %v1309_v30  ;;  %v1360_v30 = vld [vmem:[#allocation9 + $0x410] sm:$0xff] }
 0x2e4   :  { %3255 = vmatpush1.bf16.msra.mxu1 %v5902_v44  ;;  %v1316_v44 = vld [vmem:[#allocation9 + $0x2b0] sm:$0xff] }
 0x2e5   :  { %3378 = vmatpush1.bf16.msra.mxu0 %v5904_v45  ;;  %3256 = vmatprep.subr.bf16.mxu1 %v5911_v31  ;;  %v1313_v45 = vld [vmem:[#allocation9 + $0x298] sm:$0xff]  ;;  %v5967_v48 = vcombine.high %v1312_v42, %v1316_v44 }
 0x2e6   :  { %3379 = vmatprep.subr.bf16.mxu0 %v5913_v46  ;;  %v1317_v31 = vld [vmem:[#allocation9 + $0x2b8] sm:$0xff]  ;;  %v5958_v46 = vcombine.low %v1304_v27, %v1308_v28 }
 0x2e7   :  { %v5969_v1 = vcombine.high %v1313_v45, %v1317_v31  ;;  %v5968_v57 = vcombine.low %v1313_v45, %v1317_v31  ;;  %v1368_v31 = vld [vmem:[#allocation9 + $0x450] sm:$0xff] }
 0x2e8   :  { %3257 = vmatpush1.bf16.msra.mxu1 %v5910_v50  ;;  %v1324_v50 = vld [vmem:[#allocation9 + $0x2f0] sm:$0xff] }
 0x2e9   :  { %3380 = vmatpush1.bf16.msra.mxu0 %v5912_v52  ;;  %3258 = vmatprep.subr.bf16.mxu1 %v5919_v51  ;;  %v1321_v52 = vld [vmem:[#allocation9 + $0x2d8] sm:$0xff]  ;;  %v5975_v59 = vcombine.high %v1320_v49, %v1324_v50 }
 0x2ea   :  { %3381 = vmatprep.subr.bf16.mxu0 %v5921_v54  ;;  %v1325_v51 = vld [vmem:[#allocation9 + $0x2f8] sm:$0xff]  ;;  %v5966_v54 = vcombine.low %v1312_v42, %v1316_v44 }
 0x2eb   :  { %v5977_v60 = vcombine.high %v1321_v52, %v1325_v51  ;;  %v5976_v5 = vcombine.low %v1321_v52, %v1325_v51  ;;  %v1376_v52 = vld [vmem:[#allocation9 + $0x490] sm:$0xff] }
 0x2ec   :  { %3259 = vmatpush1.bf16.msra.mxu1 %v5918_v63  ;;  %v1332_v63 = vld [vmem:[#allocation9 + $0x330] sm:$0xff] }
 0x2ed   :  { %3382 = vmatpush1.bf16.msra.mxu0 %v5920_v2  ;;  %3260 = vmatprep.subr.bf16.mxu1 %v5927_v3  ;;  %v1329_v2 = vld [vmem:[#allocation9 + $0x318] sm:$0xff]  ;;  %v5983_v6 = vcombine.high %v1328_v62, %v1332_v63  ;;  %v1380_v51 = vld [vmem:[#allocation9 + $0x4b0] sm:$0xff] }
 0x2ee   :  { %3383 = vmatprep.subr.bf16.mxu0 %v5929_v4  ;;  %v1333_v3 = vld [vmem:[#allocation9 + $0x338] sm:$0xff]  ;;  %v5974_v4 = vcombine.low %v1320_v49, %v1324_v50 }
 0x2ef   :  { %v5985_v7 = vcombine.high %v1329_v2, %v1333_v3  ;;  %v5984_v14 = vcombine.low %v1329_v2, %v1333_v3  ;;  %v1384_v3 = vld [vmem:[#allocation9 + $0x4d0] sm:$0xff] }
 0x2f0   :  { %3261 = vmatpush1.bf16.msra.mxu1 %v5926_v9  ;;  %v1340_v9 = vld [vmem:[#allocation9 + $0x370] sm:$0xff] }
 0x2f1   :  { %3384 = vmatpush1.bf16.msra.mxu0 %v5928_v10  ;;  %3262 = vmatprep.subr.bf16.mxu1 %v5935_v11  ;;  %v1337_v10 = vld [vmem:[#allocation9 + $0x358] sm:$0xff]  ;;  %v5991_v15 = vcombine.high %v1336_v8, %v1340_v9 }
 0x2f2   :  { %3385 = vmatprep.subr.bf16.mxu0 %v5937_v12  ;;  %v1341_v11 = vld [vmem:[#allocation9 + $0x378] sm:$0xff]  ;;  %v5982_v12 = vcombine.low %v1328_v62, %v1332_v63  ;;  %v6031_v63 = vcombine.high %v1376_v52, %v1380_v51 }
 0x2f3   :  { %v5993_v16 = vcombine.high %v1337_v10, %v1341_v11  ;;  %v5992_v43 = vcombine.low %v1337_v10, %v1341_v11  ;;  %v1392_v10 = vld [vmem:[#allocation9 + $0x510] sm:$0xff] }
 0x2f4   :  { %3263 = vmatpush1.bf16.msra.mxu1 %v5934_v18  ;;  %v1348_v18 = vld [vmem:[#allocation9 + $0x3b0] sm:$0xff] }
 0x2f5   :  { %3386 = vmatpush1.bf16.msra.mxu0 %v5936_v36  ;;  %3264 = vmatprep.subr.bf16.mxu1 %v5943_v37  ;;  %v1345_v36 = vld [vmem:[#allocation9 + $0x398] sm:$0xff]  ;;  %v5999_v20 = vcombine.high %v1344_v17, %v1348_v18  ;;  %v1396_v11 = vld [vmem:[#allocation9 + $0x530] sm:$0xff] }
 0x2f6   :  { %3387 = vmatprep.subr.bf16.mxu0 %v5945_v40  ;;  %v1349_v37 = vld [vmem:[#allocation9 + $0x3b8] sm:$0xff]  ;;  %v5990_v40 = vcombine.low %v1336_v8, %v1340_v9 }
 0x2f7   :  { %v6001_v21 = vcombine.high %v1345_v36, %v1349_v37  ;;  %v6000_v27 = vcombine.low %v1345_v36, %v1349_v37  ;;  %v1404_v36 = vld [vmem:[#allocation9 + $0x570] sm:$0xff]  ;;  %v1401_v37 = vld [vmem:[#allocation9 + $0x558] sm:$0xff] }
 0x2f8   :  { %3265 = vmatpush1.bf16.msra.mxu1 %v5942_v23  ;;  %v1356_v23 = vld [vmem:[#allocation9 + $0x3f0] sm:$0xff] }
 0x2f9   :  { %3388 = vmatpush1.bf16.msra.mxu0 %v5944_v24  ;;  %3266 = vmatprep.subr.bf16.mxu1 %v5951_v25  ;;  %v1353_v24 = vld [vmem:[#allocation9 + $0x3d8] sm:$0xff]  ;;  %v6007_v28 = vcombine.high %v1352_v22, %v1356_v23 }
 0x2fa   :  { %3389 = vmatprep.subr.bf16.mxu0 %v5953_v26  ;;  %v1357_v25 = vld [vmem:[#allocation9 + $0x3f8] sm:$0xff]  ;;  %v5998_v26 = vcombine.low %v1344_v17, %v1348_v18  ;;  %v1400_v18 = vld [vmem:[#allocation9 + $0x550] sm:$0xff] }
 0x2fb   :  { %v6009_v29 = vcombine.high %v1353_v24, %v1357_v25  ;;  %v6008_v42 = vcombine.low %v1353_v24, %v1357_v25  ;;  %v1412_v24 = vld [vmem:[#allocation9 + $0x5b0] sm:$0xff]  ;;  %v1409_v25 = vld [vmem:[#allocation9 + $0x598] sm:$0xff] }
 0x2fc   :  { %3267 = vmatpush1.bf16.msra.mxu1 %v5950_v19  ;;  %v1364_v19 = vld [vmem:[#allocation9 + $0x430] sm:$0xff] }
 0x2fd   :  { %3390 = vmatpush1.bf16.msra.mxu0 %v5952_v33  ;;  %3268 = vmatprep.subr.bf16.mxu1 %v5959_v34  ;;  %v1361_v33 = vld [vmem:[#allocation9 + $0x418] sm:$0xff]  ;;  %v6015_v44 = vcombine.high %v1360_v30, %v1364_v19 }
 0x2fe   :  { %3391 = vmatprep.subr.bf16.mxu0 %v5961_v38  ;;  %v1365_v34 = vld [vmem:[#allocation9 + $0x438] sm:$0xff]  ;;  %v6006_v38 = vcombine.low %v1352_v22, %v1356_v23  ;;  %v1408_v23 = vld [vmem:[#allocation9 + $0x590] sm:$0xff] }
 0x2ff   :  { %v6017_v45 = vcombine.high %v1361_v33, %v1365_v34  ;;  %v6016_v49 = vcombine.low %v1361_v33, %v1365_v34  ;;  %v1420_v33 = vld [vmem:[#allocation9 + $0x5f0] sm:$0xff]  ;;  %v1417_v34 = vld [vmem:[#allocation9 + $0x5d8] sm:$0xff] }
 0x300   :  { %3269 = vmatpush1.bf16.msra.mxu1 %v5958_v46  ;;  %v1372_v46 = vld [vmem:[#allocation9 + $0x470] sm:$0xff] }
 0x301   :  { %3392 = vmatpush1.bf16.msra.mxu0 %v5960_v47  ;;  %3270 = vmatprep.subr.bf16.mxu1 %v5967_v48  ;;  %v6014_v47 = vcombine.low %v1360_v30, %v1364_v19  ;;  %v1369_v48 = vld [vmem:[#allocation9 + $0x458] sm:$0xff]  ;;  %v6023_v50 = vcombine.high %v1368_v31, %v1372_v46  ;;  %v1416_v19 = vld [vmem:[#allocation9 + $0x5d0] sm:$0xff] }
 0x302   :  { %3393 = vmatprep.subr.bf16.mxu0 %v5969_v1  ;;  %v1373_v1 = vld [vmem:[#allocation9 + $0x478] sm:$0xff] }
 0x303   :  { %v6024_v62 = vcombine.low %v1369_v48, %v1373_v1 }
 0x304   :  { %3271 = vmatpush1.bf16.msra.mxu1 %v5966_v54  ;;  %v6025_v54 = vcombine.high %v1369_v48, %v1373_v1  ;;  %v1425_v48 = vld [vmem:[#allocation9 + $0x618] sm:$0xff] }
 0x305   :  { %3394 = vmatpush1.bf16.msra.mxu0 %v5968_v57  ;;  %3272 = vmatprep.subr.bf16.mxu1 %v5975_v59  ;;  %v1377_v57 = vld [vmem:[#allocation9 + $0x498] sm:$0xff] }
 0x306   :  { %3395 = vmatprep.subr.bf16.mxu0 %v5977_v60  ;;  %v1381_v59 = vld [vmem:[#allocation9 + $0x4b8] sm:$0xff]  ;;  %v6022_v60 = vcombine.low %v1368_v31, %v1372_v46  ;;  %v1424_v46 = vld [vmem:[#allocation9 + $0x610] sm:$0xff] }
 0x307   :  { %v6033_v2 = vcombine.high %v1377_v57, %v1381_v59  ;;  %v1429_v1 = vld [vmem:[#allocation9 + $0x638] sm:$0xff] }
 0x308   :  { %3273 = vmatpush1.bf16.msra.mxu1 %v5974_v4  ;;  %v1388_v4 = vld [vmem:[#allocation9 + $0x4f0] sm:$0xff] }
 0x309   :  { %3396 = vmatpush1.bf16.msra.mxu0 %v5976_v5  ;;  %3274 = vmatprep.subr.bf16.mxu1 %v5983_v6  ;;  %v1385_v5 = vld [vmem:[#allocation9 + $0x4d8] sm:$0xff]  ;;  %v6039_v8 = vcombine.high %v1384_v3, %v1388_v4 }
 0x30a   :  { %3397 = vmatprep.subr.bf16.mxu0 %v5985_v7  ;;  %v1389_v6 = vld [vmem:[#allocation9 + $0x4f8] sm:$0xff]  ;;  %v6030_v7 = vcombine.low %v1376_v52, %v1380_v51  ;;  %v6081_v51 = vcombine.high %v1425_v48, %v1429_v1 }
 0x30b   :  { %v6041_v9 = vcombine.high %v1385_v5, %v1389_v6 }
 0x30c   :  { %3275 = vmatpush1.bf16.msra.mxu1 %v5982_v12  ;;  %v1393_v12 = vld [vmem:[#allocation9 + $0x518] sm:$0xff] }
 0x30d   :  { %3398 = vmatpush1.bf16.msra.mxu0 %v5984_v14  ;;  %3276 = vmatprep.subr.bf16.mxu1 %v5991_v15  ;;  %v1397_v14 = vld [vmem:[#allocation9 + $0x538] sm:$0xff]  ;;  %v6040_v15 = vcombine.low %v1385_v5, %v1389_v6  ;;  %v1444_v5 = vld [vmem:[#allocation9 + $0x6b0] sm:$0xff] }
 0x30e   :  { %3399 = vmatprep.subr.bf16.mxu0 %v5993_v16  ;;  %v6047_v16 = vcombine.high %v1392_v10, %v1396_v11  ;;  %v6049_v17 = vcombine.high %v1393_v12, %v1397_v14  ;;  %v1441_v6 = vld [vmem:[#allocation9 + $0x698] sm:$0xff] }
 0x310   :  { %3277 = vmatpush1.bf16.msra.mxu1 %v5990_v40  ;;  %v1405_v40 = vld [vmem:[#allocation9 + $0x578] sm:$0xff] }
 0x311   :  { %3400 = vmatpush1.bf16.msra.mxu0 %v5992_v43  ;;  %3278 = vmatprep.subr.bf16.mxu1 %v5999_v20  ;;  %v6046_v43 = vcombine.low %v1392_v10, %v1396_v11  ;;  %v6048_v20 = vcombine.low %v1393_v12, %v1397_v14  ;;  %v6057_v22 = vcombine.high %v1401_v37, %v1405_v40  ;;  %v1448_v11 = vld [vmem:[#allocation9 + $0x6d0] sm:$0xff]  ;;  %v1449_v14 = vld [vmem:[#allocation9 + $0x6d8] sm:$0xff] }
 0x312   :  { %3401 = vmatprep.subr.bf16.mxu0 %v6001_v21  ;;  %v6055_v21 = vcombine.high %v1400_v18, %v1404_v36  ;;  %v1452_v12 = vld [vmem:[#allocation9 + $0x6f0] sm:$0xff] }
 0x314   :  { %3279 = vmatpush1.bf16.msra.mxu1 %v5998_v26  ;;  %v1413_v26 = vld [vmem:[#allocation9 + $0x5b8] sm:$0xff] }
 0x315   :  { %3402 = vmatpush1.bf16.msra.mxu0 %v6000_v27  ;;  %3280 = vmatprep.subr.bf16.mxu1 %v6007_v28  ;;  %v6054_v27 = vcombine.low %v1400_v18, %v1404_v36  ;;  %v6056_v28 = vcombine.low %v1401_v37, %v1405_v40  ;;  %v6065_v30 = vcombine.high %v1409_v25, %v1413_v26  ;;  %v1456_v36 = vld [vmem:[#allocation9 + $0x710] sm:$0xff]  ;;  %v1457_v40 = vld [vmem:[#allocation9 + $0x718] sm:$0xff] }
 0x316   :  { %3403 = vmatprep.subr.bf16.mxu0 %v6009_v29  ;;  %v6063_v29 = vcombine.high %v1408_v23, %v1412_v24  ;;  %v1460_v37 = vld [vmem:[#allocation9 + $0x730] sm:$0xff] }
 0x318   :  { %3281 = vmatpush1.bf16.msra.mxu1 %v6006_v38  ;;  %v1421_v38 = vld [vmem:[#allocation9 + $0x5f8] sm:$0xff] }
 0x319   :  { %3404 = vmatpush1.bf16.msra.mxu0 %v6008_v42  ;;  %3291 = vmatprep.subr.bf16.mxu1 %v6015_v44  ;;  %v6062_v42 = vcombine.low %v1408_v23, %v1412_v24  ;;  %v6064_v44 = vcombine.low %v1409_v25, %v1413_v26  ;;  %v6073_v31 = vcombine.high %v1417_v34, %v1421_v38  ;;  %v1464_v24 = vld [vmem:[#allocation9 + $0x750] sm:$0xff]  ;;  %v1465_v26 = vld [vmem:[#allocation9 + $0x758] sm:$0xff] }
 0x31a   :  { %3414 = vmatprep.subr.bf16.mxu0 %v6017_v45  ;;  %v6071_v45 = vcombine.high %v1416_v19, %v1420_v33  ;;  %v1468_v25 = vld [vmem:[#allocation9 + $0x770] sm:$0xff] }
 0x31b   :  { %3283 = vmatmul.mubr.bf16.vlgmr.msra.gmra.mrb[20].mxu1 %v7709_v13 }
 0x31c   :  { %3406 = vmatmul.mubr.bf16.vlgmr.msra.gmra.mrb[12].mxu0 %v7709_v13  ;;  %3292 = vmatpush1.bf16.msra.mxu1 %v6014_v47  ;;  %v6032_v13 = vcombine.low %v1377_v57, %v1381_v59  ;;  %v1428_v47 = vld [vmem:[#allocation9 + $0x630] sm:$0xff]  ;;  %v1433_v59 = vld [vmem:[#allocation9 + $0x658] sm:$0xff] }
 0x31d   :  { %3323 = vmatprep.mubr.bf16.mxu1 %v7734_v32  ;;  %3415 = vmatpush1.bf16.msra.mxu0 %v6016_v49  ;;  %v6070_v49 = vcombine.low %v1416_v19, %v1420_v33  ;;  %v6079_v52 = vcombine.high %v1424_v46, %v1428_v47  ;;  %v1436_v57 = vld [vmem:[#allocation9 + $0x670] sm:$0xff] }
 0x31e   :  { %3446 = vmatprep.mubr.bf16.mxu0 %v7734_v32  ;;  %3293 = vmatprep.subr.bf16.mxu1 %v6023_v50  ;;  %v6038_v32 = vcombine.low %v1384_v3, %v1388_v4  ;;  %v6072_v50 = vcombine.low %v1417_v34, %v1421_v38  ;;  %v1440_v4 = vld [vmem:[#allocation9 + $0x690] sm:$0xff]  ;;  %v1473_v38 = vld [vmem:[#allocation9 + $0x798] sm:$0xff] }
 0x31f   :  { %3416 = vmatprep.subr.bf16.mxu0 %v6025_v54  ;;  %v1432_v54 = vld [vmem:[#allocation9 + $0x650] sm:$0xff] }
 0x320   :  { %3294 = vmatpush1.bf16.msra.mxu1 %v6022_v60  ;;  %v1437_v60 = vld [vmem:[#allocation9 + $0x678] sm:$0xff]  ;;  %v1472_v33 = vld [vmem:[#allocation9 + $0x790] sm:$0xff] }
 0x321   :  { %3417 = vmatpush1.bf16.msra.mxu0 %v6024_v62  ;;  %3295 = vmatprep.subr.bf16.mxu1 %v6031_v63  ;;  %v6078_v62 = vcombine.low %v1424_v46, %v1428_v47  ;;  %v6080_v63 = vcombine.low %v1425_v48, %v1429_v1  ;;  %v6089_v3 = vcombine.high %v1433_v59, %v1437_v60  ;;  %v1476_v34 = vld [vmem:[#allocation9 + $0x7b0] sm:$0xff]  ;;  %v1481_v1 = vld [vmem:[#allocation9 + $0x7d8] sm:$0xff] }
 0x322   :  { %3418 = vmatprep.subr.bf16.mxu0 %v6033_v2  ;;  %v6087_v2 = vcombine.high %v1432_v54, %v1436_v57  ;;  %v1480_v47 = vld [vmem:[#allocation9 + $0x7d0] sm:$0xff] }
 0x323   :  { %v1484_v48 = vld [vmem:[#allocation9 + $0x7f0] sm:$0xff] }
 0x324   :  { %3296 = vmatpush1.bf16.msra.mxu1 %v6030_v7  ;;  %v1445_v7 = vld [vmem:[#allocation9 + $0x6b8] sm:$0xff] }
 0x325   :  { %3419 = vmatpush1.bf16.msra.mxu0 %v6032_v13  ;;  %3297 = vmatprep.subr.bf16.mxu1 %v6039_v8  ;;  %v6086_v13 = vcombine.low %v1432_v54, %v1436_v57  ;;  %v6088_v8 = vcombine.low %v1433_v59, %v1437_v60  ;;  %v6097_v10 = vcombine.high %v1441_v6, %v1445_v7  ;;  %v1488_v57 = vld [vmem:[#allocation9 + $0x810] sm:$0xff]  ;;  %v1489_v60 = vld [vmem:[#allocation9 + $0x818] sm:$0xff] }
 0x326   :  { %3420 = vmatprep.subr.bf16.mxu0 %v6041_v9  ;;  %v6095_v9 = vcombine.high %v1440_v4, %v1444_v5  ;;  %v1492_v59 = vld [vmem:[#allocation9 + $0x830] sm:$0xff] }
 0x328   :  { %3298 = vmatpush1.bf16.msra.mxu1 %v6038_v32  ;;  %v1453_v32 = vld [vmem:[#allocation9 + $0x6f8] sm:$0xff] }
 0x329   :  { %3421 = vmatpush1.bf16.msra.mxu0 %v6040_v15  ;;  %3299 = vmatprep.subr.bf16.mxu1 %v6047_v16  ;;  %v6094_v15 = vcombine.low %v1440_v4, %v1444_v5  ;;  %v6096_v16 = vcombine.low %v1441_v6, %v1445_v7  ;;  %v6105_v18 = vcombine.high %v1449_v14, %v1453_v32  ;;  %v1496_v5 = vld [vmem:[#allocation9 + $0x850] sm:$0xff]  ;;  %v1497_v7 = vld [vmem:[#allocation9 + $0x858] sm:$0xff] }
 0x32a   :  { %3422 = vmatprep.subr.bf16.mxu0 %v6049_v17  ;;  %v6103_v17 = vcombine.high %v1448_v11, %v1452_v12  ;;  %v1500_v6 = vld [vmem:[#allocation9 + $0x870] sm:$0xff] }
 0x32c   :  { %3300 = vmatpush1.bf16.msra.mxu1 %v6046_v43  ;;  %v1461_v43 = vld [vmem:[#allocation9 + $0x738] sm:$0xff] }
 0x32d   :  { %3423 = vmatpush1.bf16.msra.mxu0 %v6048_v20  ;;  %3301 = vmatprep.subr.bf16.mxu1 %v6055_v21  ;;  %v6102_v20 = vcombine.low %v1448_v11, %v1452_v12  ;;  %v6104_v21 = vcombine.low %v1449_v14, %v1453_v32  ;;  %v6113_v23 = vcombine.high %v1457_v40, %v1461_v43  ;;  %v1504_v12 = vld [vmem:[#allocation9 + $0x890] sm:$0xff]  ;;  %v1505_v32 = vld [vmem:[#allocation9 + $0x898] sm:$0xff] }
 0x32e   :  { %3424 = vmatprep.subr.bf16.mxu0 %v6057_v22  ;;  %v6111_v22 = vcombine.high %v1456_v36, %v1460_v37  ;;  %v1508_v14 = vld [vmem:[#allocation9 + $0x8b0] sm:$0xff] }
 0x330   :  { %3302 = vmatpush1.bf16.msra.mxu1 %v6054_v27  ;;  %v1469_v27 = vld [vmem:[#allocation9 + $0x778] sm:$0xff] }
 0x331   :  { %3425 = vmatpush1.bf16.msra.mxu0 %v6056_v28  ;;  %3303 = vmatprep.subr.bf16.mxu1 %v6063_v29  ;;  %v6110_v28 = vcombine.low %v1456_v36, %v1460_v37  ;;  %v6112_v29 = vcombine.low %v1457_v40, %v1461_v43  ;;  %v6121_v19 = vcombine.high %v1465_v26, %v1469_v27  ;;  %v1512_v37 = vld [vmem:[#allocation9 + $0x8d0] sm:$0xff]  ;;  %v1513_v43 = vld [vmem:[#allocation9 + $0x8d8] sm:$0xff] }
 0x332   :  { %3426 = vmatprep.subr.bf16.mxu0 %v6065_v30  ;;  %v6119_v30 = vcombine.high %v1464_v24, %v1468_v25  ;;  %v1516_v40 = vld [vmem:[#allocation9 + $0x8f0] sm:$0xff] }
 0x334   :  { %3304 = vmatpush1.bf16.msra.mxu1 %v6062_v42  ;;  %v1477_v42 = vld [vmem:[#allocation9 + $0x7b8] sm:$0xff] }
 0x335   :  { %3427 = vmatpush1.bf16.msra.mxu0 %v6064_v44  ;;  %3305 = vmatprep.subr.bf16.mxu1 %v6071_v45  ;;  %v6118_v44 = vcombine.low %v1464_v24, %v1468_v25  ;;  %v6120_v45 = vcombine.low %v1465_v26, %v1469_v27  ;;  %v6129_v46 = vcombine.high %v1473_v38, %v1477_v42  ;;  %v6790_v26 = vld [vmem:[#allocation12 + $0x4] ss:$16 sps:$4 sm:$0xff]   ;;  %v6793_v27 = vld [vmem:[#allocation12 + $0xc] ss:$16 sps:$4 sm:$0xff]  }
 0x336   :  { %3428 = vmatprep.subr.bf16.mxu0 %v6073_v31  ;;  %v6127_v31 = vcombine.high %v1472_v33, %v1476_v34  ;;  %v6166_v24 = vcombine.low %v1512_v37, %v1516_v40 }
 0x338   :  { %3306 = vmatpush1.bf16.msra.mxu1 %v6070_v49  ;;  %v1485_v49 = vld [vmem:[#allocation9 + $0x7f8] sm:$0xff] }
 0x339   :  { %3429 = vmatpush1.bf16.msra.mxu0 %v6072_v50  ;;  %3307 = vmatprep.subr.bf16.mxu1 %v6079_v52  ;;  %v6126_v50 = vcombine.low %v1472_v33, %v1476_v34  ;;  %v6128_v52 = vcombine.low %v1473_v38, %v1477_v42  ;;  %v6137_v54 = vcombine.high %v1481_v1, %v1485_v49  ;;  %v6797_v33 = vld [vmem:[#allocation12 + $0x28] ss:$16 sps:$4 sm:$0xff]   ;;  %v6802_v34 = vld [vmem:[#allocation12 + $0x44] ss:$16 sps:$4 sm:$0xff]   ;;  %v6805_v38 = vld [vmem:[#allocation12 + $0x4c] ss:$16 sps:$4 sm:$0xff]  }
 0x33a   :  { %3430 = vmatprep.subr.bf16.mxu0 %v6081_v51  ;;  %v6135_v51 = vcombine.high %v1480_v47, %v1484_v48  ;;  %v6800_v42 = vld [vmem:[#allocation12 + $0x40] ss:$16 sps:$4 sm:$0xff]  }
 0x33c   :  { %3308 = vmatpush1.bf16.msra.mxu1 %v6078_v62  ;;  %v1493_v62 = vld [vmem:[#allocation9 + $0x838] sm:$0xff] }
 0x33d   :  { %3431 = vmatpush1.bf16.msra.mxu0 %v6080_v63  ;;  %3309 = vmatprep.subr.bf16.mxu1 %v6087_v2  ;;  %v6134_v63 = vcombine.low %v1480_v47, %v1484_v48  ;;  %v6136_v2 = vcombine.low %v1481_v1, %v1485_v49  ;;  %v6145_v4 = vcombine.high %v1489_v60, %v1493_v62  ;;  %v6814_v47 = vld [vmem:[#allocation12 + $0x84] ss:$16 sps:$4 sm:$0xff]   ;;  %v6817_v48 = vld [vmem:[#allocation12 + $0x8c] ss:$16 sps:$4 sm:$0xff]   ;;  %v6812_v1 = vld [vmem:[#allocation12 + $0x80] ss:$16 sps:$4 sm:$0xff]  }
 0x33e   :  { %3432 = vmatprep.subr.bf16.mxu0 %v6089_v3  ;;  %v6143_v3 = vcombine.high %v1488_v57, %v1492_v59  ;;  %v6815_v49 = vld [vmem:[#allocation12 + $0x88] ss:$16 sps:$4 sm:$0xff]  }
 0x340   :  { %3310 = vmatpush1.bf16.msra.mxu1 %v6086_v13  ;;  %v1501_v13 = vld [vmem:[#allocation9 + $0x878] sm:$0xff] }
 0x341   :  { %3433 = vmatpush1.bf16.msra.mxu0 %v6088_v8  ;;  %3311 = vmatprep.subr.bf16.mxu1 %v6095_v9  ;;  %v6142_v8 = vcombine.low %v1488_v57, %v1492_v59  ;;  %v6144_v9 = vcombine.low %v1489_v60, %v1493_v62  ;;  %v6153_v11 = vcombine.high %v1497_v7, %v1501_v13  ;;  %v6826_v57 = vld [vmem:[#allocation12 + $0xc4] ss:$16 sps:$4 sm:$0xff]   ;;  %v6829_v59 = vld [vmem:[#allocation12 + $0xcc] ss:$16 sps:$4 sm:$0xff]   ;;  %v6824_v60 = vld [vmem:[#allocation12 + $0xc0] ss:$16 sps:$4 sm:$0xff]  }
 0x342   :  { %3434 = vmatprep.subr.bf16.mxu0 %v6097_v10  ;;  %v6151_v10 = vcombine.high %v1496_v5, %v1500_v6  ;;  %v6827_v62 = vld [vmem:[#allocation12 + $0xc8] ss:$16 sps:$4 sm:$0xff]  }
 0x344   :  { %3312 = vmatpush1.bf16.msra.mxu1 %v6094_v15  ;;  %v1509_v15 = vld [vmem:[#allocation9 + $0x8b8] sm:$0xff] }
 0x345   :  { %3435 = vmatpush1.bf16.msra.mxu0 %v6096_v16  ;;  %3313 = vmatprep.subr.bf16.mxu1 %v6103_v17  ;;  %v6150_v16 = vcombine.low %v1496_v5, %v1500_v6  ;;  %v6152_v17 = vcombine.low %v1497_v7, %v1501_v13  ;;  %v6161_v36 = vcombine.high %v1505_v32, %v1509_v15  ;;  %v6838_v5 = vld [vmem:[#allocation12 + $0x104] ss:$16 sps:$4 sm:$0xff]   ;;  %v6841_v6 = vld [vmem:[#allocation12 + $0x10c] ss:$16 sps:$4 sm:$0xff]   ;;  %v6836_v7 = vld [vmem:[#allocation12 + $0x100] ss:$16 sps:$4 sm:$0xff]  }
 0x346   :  { %3436 = vmatprep.subr.bf16.mxu0 %v6105_v18  ;;  %v6159_v18 = vcombine.high %v1504_v12, %v1508_v14  ;;  %v6839_v13 = vld [vmem:[#allocation12 + $0x108] ss:$16 sps:$4 sm:$0xff]  }
 0x348   :  { %3314 = vmatpush1.bf16.msra.mxu1 %v6102_v20  ;;  %v1517_v20 = vld [vmem:[#allocation9 + $0x8f8] sm:$0xff] }
 0x349   :  { %3437 = vmatpush1.bf16.msra.mxu0 %v6104_v21  ;;  %3315 = vmatprep.subr.bf16.mxu1 %v6111_v22  ;;  %v6158_v21 = vcombine.low %v1504_v12, %v1508_v14  ;;  %v6167_v22 = vcombine.high %v1512_v37, %v1516_v40  ;;  %v6168_v25 = vcombine.low %v1513_v43, %v1517_v20  ;;  %v6850_v12 = vld [vmem:[#allocation12 + $0x144] ss:$16 sps:$4 sm:$0xff]   ;;  %v6853_v14 = vld [vmem:[#allocation12 + $0x14c] ss:$16 sps:$4 sm:$0xff]  }
 0x34a   :  { %3438 = vmatprep.subr.bf16.mxu0 %v6113_v23  ;;  %v6169_v23 = vcombine.high %v1513_v43, %v1517_v20  ;;  %v6862_v37 = vld [vmem:[#allocation12 + $0x184] ss:$16 sps:$4 sm:$0xff]   ;;  %v6865_v40 = vld [vmem:[#allocation12 + $0x18c] ss:$16 sps:$4 sm:$0xff]   ;;  %v6860_v43 = vld [vmem:[#allocation12 + $0x180] ss:$16 sps:$4 sm:$0xff]  }
 0x34b   :  { %v6863_v20 = vld [vmem:[#allocation12 + $0x188] ss:$16 sps:$4 sm:$0xff]  }
 0x34c   :  { %3316 = vmatpush1.bf16.msra.mxu1 %v6110_v28  ;;  %v6788_v28 = vld [vmem:[#allocation12] ss:$16 sps:$4 sm:$0xff]  }
 0x34d   :  { %3439 = vmatpush1.bf16.msra.mxu0 %v6112_v29  ;;  %3317 = vmatprep.subr.bf16.mxu1 %v6119_v30  ;;  %v6796_v29 = vld [vmem:[#allocation12 + $0x24] ss:$16 sps:$4 sm:$0xff]   ;;  %v6799_v30 = vld [vmem:[#allocation12 + $0x2c] ss:$16 sps:$4 sm:$0xff]  }
 0x34e   :  { %3440 = vmatprep.subr.bf16.mxu0 %v6121_v19  ;;  %v6794_v19 = vld [vmem:[#allocation12 + $0x20] ss:$16 sps:$4 sm:$0xff]  }
 0x350   :  { %3318 = vmatpush1.bf16.msra.mxu1 %v6118_v44  ;;  %v6803_v44 = vld [vmem:[#allocation12 + $0x48] ss:$16 sps:$4 sm:$0xff]  }
 0x351   :  { %3441 = vmatpush1.bf16.msra.mxu0 %v6120_v45  ;;  %3319 = vmatprep.subr.bf16.mxu1 %v6127_v31  ;;  %v6808_v45 = vld [vmem:[#allocation12 + $0x64] ss:$16 sps:$4 sm:$0xff]   ;;  %v6811_v31 = vld [vmem:[#allocation12 + $0x6c] ss:$16 sps:$4 sm:$0xff]  }
 0x352   :  { %3442 = vmatprep.subr.bf16.mxu0 %v6129_v46  ;;  %v6806_v46 = vld [vmem:[#allocation12 + $0x60] ss:$16 sps:$4 sm:$0xff]  }
 0x354   :  { %3320 = vmatpush1.bf16.msra.mxu1 %v6126_v50  ;;  %v6820_v50 = vld [vmem:[#allocation12 + $0xa4] ss:$16 sps:$4 sm:$0xff]  }
 0x355   :  { %3443 = vmatpush1.bf16.msra.mxu0 %v6128_v52  ;;  %3321 = vmatprep.subr.bf16.mxu1 %v6135_v51  ;;  %v6823_v52 = vld [vmem:[#allocation12 + $0xac] ss:$16 sps:$4 sm:$0xff]   ;;  %v6818_v51 = vld [vmem:[#allocation12 + $0xa0] ss:$16 sps:$4 sm:$0xff]  }
 0x356   :  { %3444 = vmatprep.subr.bf16.mxu0 %v6137_v54  ;;  %v6821_v54 = vld [vmem:[#allocation12 + $0xa8] ss:$16 sps:$4 sm:$0xff]  }
 0x358   :  { %3322 = vmatpush1.bf16.msra.mxu1 %v6134_v63  ;;  %v6832_v63 = vld [vmem:[#allocation12 + $0xe4] ss:$16 sps:$4 sm:$0xff]  }
 0x359   :  { %3445 = vmatpush1.bf16.msra.mxu0 %v6136_v2  ;;  %3332 = vmatprep.subr.bf16.mxu1 %v6143_v3  ;;  %v6835_v2 = vld [vmem:[#allocation12 + $0xec] ss:$16 sps:$4 sm:$0xff]   ;;  %v6830_v3 = vld [vmem:[#allocation12 + $0xe0] ss:$16 sps:$4 sm:$0xff]  }
 0x35a   :  { %3455 = vmatprep.subr.bf16.mxu0 %v6145_v4  ;;  %v6833_v4 = vld [vmem:[#allocation12 + $0xe8] ss:$16 sps:$4 sm:$0xff]  }
 0x35b   :  { %3324 = vmatmul.mubr.bf16.vlgmr.msra.gmra.mrb[20].mxu1 %v7737_v41 }
 0x35c   :  { %3447 = vmatmul.mubr.bf16.vlgmr.msra.gmra.mrb[12].mxu0 %v7737_v41  ;;  %3333 = vmatpush1.bf16.msra.mxu1 %v6142_v8  ;;  %v6160_v41 = vcombine.low %v1505_v32, %v1509_v15  ;;  %v6844_v8 = vld [vmem:[#allocation12 + $0x124] ss:$16 sps:$4 sm:$0xff]   ;;  %v6848_v32 = vld [vmem:[#allocation12 + $0x140] ss:$16 sps:$4 sm:$0xff]   ;;  %v6851_v15 = vld [vmem:[#allocation12 + $0x148] ss:$16 sps:$4 sm:$0xff]  }
 0x35d   :  { %3456 = vmatpush1.bf16.msra.mxu0 %v6144_v9  ;;  %3334 = vmatprep.subr.bf16.mxu1 %v6151_v10  ;;  %v6847_v9 = vld [vmem:[#allocation12 + $0x12c] ss:$16 sps:$4 sm:$0xff]   ;;  %v6842_v10 = vld [vmem:[#allocation12 + $0x120] ss:$16 sps:$4 sm:$0xff]  }
 0x35e   :  { %3457 = vmatprep.subr.bf16.mxu0 %v6153_v11  ;;  %3364 = vmatprep.mubr.bf16.mxu1 %v7459_v53  ;;  %v6845_v11 = vld [vmem:[#allocation12 + $0x128] ss:$16 sps:$4 sm:$0xff]  }
 0x35f   :  { %3487 = vmatprep.mubr.bf16.mxu0 %v7459_v53  ;;  %v6791_v53 = vld [vmem:[#allocation12 + $0x8] ss:$16 sps:$4 sm:$0xff]  }
 0x360   :  { %3335 = vmatpush1.bf16.msra.mxu1 %v6150_v16  ;;  %v6856_v16 = vld [vmem:[#allocation12 + $0x164] ss:$16 sps:$4 sm:$0xff]  }
 0x361   :  { %3458 = vmatpush1.bf16.msra.mxu0 %v6152_v17  ;;  %3336 = vmatprep.subr.bf16.mxu1 %v6159_v18  ;;  %v6859_v17 = vld [vmem:[#allocation12 + $0x16c] ss:$16 sps:$4 sm:$0xff]   ;;  %v6854_v18 = vld [vmem:[#allocation12 + $0x160] ss:$16 sps:$4 sm:$0xff]  }
 0x362   :  { %3459 = vmatprep.subr.bf16.mxu0 %v6161_v36  ;;  %v6857_v36 = vld [vmem:[#allocation12 + $0x168] ss:$16 sps:$4 sm:$0xff]  }
 0x364   :  { %3337 = vmatpush1.bf16.msra.mxu1 %v6158_v21  ;;  %v6868_v21 = vld [vmem:[#allocation12 + $0x1a4] ss:$16 sps:$4 sm:$0xff]  }
 0x365   :  { %3460 = vmatpush1.bf16.msra.mxu0 %v6160_v41  ;;  %3338 = vmatprep.subr.bf16.mxu1 %v6167_v22  ;;  %v6871_v41 = vld [vmem:[#allocation12 + $0x1ac] ss:$16 sps:$4 sm:$0xff]   ;;  %v6866_v22 = vld [vmem:[#allocation12 + $0x1a0] ss:$16 sps:$4 sm:$0xff]  }
 0x366   :  { %3461 = vmatprep.subr.bf16.mxu0 %v6169_v23  ;;  %v6869_v23 = vld [vmem:[#allocation12 + $0x1a8] ss:$16 sps:$4 sm:$0xff]  }
 0x368   :  { %3339 = vmatpush1.bf16.msra.mxu1 %v6166_v24  ;;  %v6874_v24 = vld [vmem:[#allocation12 + $0x1c4] ss:$16 sps:$4 sm:$0xff]  }
 0x369   :  { %3462 = vmatpush1.bf16.msra.mxu0 %v6168_v25  ;;  %5086 = vmatprep.subr.bf16.mxu1 %v6790_v26  ;;  %v6877_v25 = vld [vmem:[#allocation12 + $0x1cc] ss:$16 sps:$4 sm:$0xff]   ;;  %v6872_v26 = vld [vmem:[#allocation12 + $0x1c0] ss:$16 sps:$4 sm:$0xff]  }
 0x36a   :  { %5250 = vmatprep.subr.bf16.mxu0 %v6793_v27  ;;  %v6875_v27 = vld [vmem:[#allocation12 + $0x1c8] ss:$16 sps:$4 sm:$0xff]  }
 0x36b   :  { %6172 = vmatmul.mubr.msk.bf16.vlgmr.msra.gmra.mrb[20].mxu1 %vm3000_vm12, %v7745_v0 }
 0x36c   :  { %6173 = vmatmul.mubr.msk.bf16.vlgmr.msra.gmra.mrb[12].mxu0 %vm3000_vm12, %v7745_v0  ;;  %5087 = vmatpush1.bf16.msra.mxu1 %v6788_v28  ;;  %v6809_v0 = vld [vmem:[#allocation12 + $0x68] ss:$16 sps:$4 sm:$0xff]   ;;  %v6880_v28 = vld [vmem:[#allocation12 + $0x1e4] ss:$16 sps:$4 sm:$0xff]  }
 0x36d   :  { %5251 = vmatpush1.bf16.msra.mxu0 %v6791_v53  ;;  %5088 = vmatprep.subr.bf16.mxu1 %v6796_v29  ;;  %v6883_v53 = vld [vmem:[#allocation12 + $0x1ec] ss:$16 sps:$4 sm:$0xff]   ;;  %v6878_v29 = vld [vmem:[#allocation12 + $0x1e0] ss:$16 sps:$4 sm:$0xff]  }
 0x36e   :  { %5252 = vmatprep.subr.bf16.mxu0 %v6799_v30  ;;  %v6881_v30 = vld [vmem:[#allocation12 + $0x1e8] ss:$16 sps:$4 sm:$0xff]  }
 0x370   :  { %5089 = vmatpush1.bf16.msra.mxu1 %v6794_v19  ;;  %v6886_v19 = vld [vmem:[#allocation12 + $0x204] ss:$16 sps:$4 sm:$0xff]  }
 0x371   :  { %5253 = vmatpush1.bf16.msra.mxu0 %v6797_v33  ;;  %5090 = vmatprep.subr.bf16.mxu1 %v6802_v34  ;;  %v6889_v33 = vld [vmem:[#allocation12 + $0x20c] ss:$16 sps:$4 sm:$0xff]  }
 0x372   :  { %5254 = vmatprep.subr.bf16.mxu0 %v6805_v38  ;;  %v7765_v34 = vld [vmem:[#allocation10] sm:$0xff] }
 0x373   :  { %v1523_v38 = vrot.slane %v7765_v34, %v7656_v56 }
 0x374   :  { %5091 = vmatpush1.bf16.msra.mxu1 %v6800_v42  ;;  %v1527_v42 = vrot.slane %v7765_v34, %v7659_v58 }
 0x375   :  { %5255 = vmatpush1.bf16.msra.mxu0 %v6803_v44  ;;  %5092 = vmatprep.subr.bf16.mxu1 %v6808_v45  ;;  %v1535_v44 = vrot.slane %v7765_v34, %v7724_v35 }
 0x376   :  { %5256 = vmatprep.subr.bf16.mxu0 %v6811_v31 }
 0x378   :  { %5093 = vmatpush1.bf16.msra.mxu1 %v6806_v46 }
 0x379   :  { %5257 = vmatpush1.bf16.msra.mxu0 %v6809_v0  ;;  %5094 = vmatprep.subr.bf16.mxu1 %v6814_v47 }
 0x37a   :  { %5258 = vmatprep.subr.bf16.mxu0 %v6817_v48 }
 0x37c   :  { %5095 = vmatpush1.bf16.msra.mxu1 %v6812_v1 }
 0x37d   :  { %5259 = vmatpush1.bf16.msra.mxu0 %v6815_v49  ;;  %5096 = vmatprep.subr.bf16.mxu1 %v6820_v50 }
 0x37e   :  { %5260 = vmatprep.subr.bf16.mxu0 %v6823_v52 }
 0x380   :  { %5097 = vmatpush1.bf16.msra.mxu1 %v6818_v51 }
 0x381   :  { %5261 = vmatpush1.bf16.msra.mxu0 %v6821_v54  ;;  %5098 = vmatprep.subr.bf16.mxu1 %v6826_v57 }
 0x382   :  { %5262 = vmatprep.subr.bf16.mxu0 %v6829_v59 }
 0x384   :  { %5099 = vmatpush1.bf16.msra.mxu1 %v6824_v60 }
 0x385   :  { %5263 = vmatpush1.bf16.msra.mxu0 %v6827_v62  ;;  %5100 = vmatprep.subr.bf16.mxu1 %v6832_v63 }
 0x386   :  { %5264 = vmatprep.subr.bf16.mxu0 %v6835_v2  ;;  %v6884_v2 = vld [vmem:[#allocation12 + $0x200] ss:$16 sps:$4 sm:$0xff]  }
 0x388   :  { %5101 = vmatpush1.bf16.msra.mxu1 %v6830_v3  ;;  %v6887_v3 = vld [vmem:[#allocation12 + $0x208] ss:$16 sps:$4 sm:$0xff]  }
 0x389   :  { %5265 = vmatpush1.bf16.msra.mxu0 %v6833_v4  ;;  %5102 = vmatprep.subr.bf16.mxu1 %v6838_v5 }
 0x38a   :  { %5266 = vmatprep.subr.bf16.mxu0 %v6841_v6  ;;  %v6892_v6 = vld [vmem:[#allocation12 + $0x224] ss:$16 sps:$4 sm:$0xff]  }
 0x38c   :  { %5103 = vmatpush1.bf16.msra.mxu1 %v6836_v7  ;;  %v6895_v7 = vld [vmem:[#allocation12 + $0x22c] ss:$16 sps:$4 sm:$0xff]  }
 0x38d   :  { %5267 = vmatpush1.bf16.msra.mxu0 %v6839_v13  ;;  %5104 = vmatprep.subr.bf16.mxu1 %v6844_v8  ;;  %v6890_v8 = vld [vmem:[#allocation12 + $0x220] ss:$16 sps:$4 sm:$0xff]  }
 0x38e   :  { %5268 = vmatprep.subr.bf16.mxu0 %v6847_v9  ;;  %v6893_v9 = vld [vmem:[#allocation12 + $0x228] ss:$16 sps:$4 sm:$0xff]  }
 0x390   :  { %5105 = vmatpush1.bf16.msra.mxu1 %v6842_v10  ;;  %v6898_v10 = vld [vmem:[#allocation12 + $0x244] ss:$16 sps:$4 sm:$0xff]  }
 0x391   :  { %5269 = vmatpush1.bf16.msra.mxu0 %v6845_v11  ;;  %5106 = vmatprep.subr.bf16.mxu1 %v6850_v12  ;;  %v6901_v11 = vld [vmem:[#allocation12 + $0x24c] ss:$16 sps:$4 sm:$0xff]   ;;  %v6896_v12 = vld [vmem:[#allocation12 + $0x240] ss:$16 sps:$4 sm:$0xff]  }
 0x392   :  { %5270 = vmatprep.subr.bf16.mxu0 %v6853_v14  ;;  %v6899_v14 = vld [vmem:[#allocation12 + $0x248] ss:$16 sps:$4 sm:$0xff]  }
 0x394   :  { %5107 = vmatpush1.bf16.msra.mxu1 %v6848_v32  ;;  %v6904_v32 = vld [vmem:[#allocation12 + $0x264] ss:$16 sps:$4 sm:$0xff]  }
 0x395   :  { %5271 = vmatpush1.bf16.msra.mxu0 %v6851_v15  ;;  %5108 = vmatprep.subr.bf16.mxu1 %v6856_v16  ;;  %v6907_v15 = vld [vmem:[#allocation12 + $0x26c] ss:$16 sps:$4 sm:$0xff]   ;;  %v6902_v16 = vld [vmem:[#allocation12 + $0x260] ss:$16 sps:$4 sm:$0xff]  }
 0x396   :  { %5272 = vmatprep.subr.bf16.mxu0 %v6859_v17  ;;  %v6905_v17 = vld [vmem:[#allocation12 + $0x268] ss:$16 sps:$4 sm:$0xff]  }
 0x398   :  { %5109 = vmatpush1.bf16.msra.mxu1 %v6854_v18  ;;  %v6910_v18 = vld [vmem:[#allocation12 + $0x284] ss:$16 sps:$4 sm:$0xff]  }
 0x399   :  { %5273 = vmatpush1.bf16.msra.mxu0 %v6857_v36  ;;  %5110 = vmatprep.subr.bf16.mxu1 %v6862_v37  ;;  %v6913_v36 = vld [vmem:[#allocation12 + $0x28c] ss:$16 sps:$4 sm:$0xff]   ;;  %v6908_v37 = vld [vmem:[#allocation12 + $0x280] ss:$16 sps:$4 sm:$0xff]  }
 0x39a   :  { %5274 = vmatprep.subr.bf16.mxu0 %v6865_v40  ;;  %v6911_v40 = vld [vmem:[#allocation12 + $0x288] ss:$16 sps:$4 sm:$0xff]  }
 0x39c   :  { %5111 = vmatpush1.bf16.msra.mxu1 %v6860_v43  ;;  %v6916_v43 = vld [vmem:[#allocation12 + $0x2a4] ss:$16 sps:$4 sm:$0xff]  }
 0x39d   :  { %5275 = vmatpush1.bf16.msra.mxu0 %v6863_v20  ;;  %5112 = vmatprep.subr.bf16.mxu1 %v6868_v21  ;;  %v6919_v20 = vld [vmem:[#allocation12 + $0x2ac] ss:$16 sps:$4 sm:$0xff]   ;;  %v6914_v21 = vld [vmem:[#allocation12 + $0x2a0] ss:$16 sps:$4 sm:$0xff]  }
 0x39e   :  { %5276 = vmatprep.subr.bf16.mxu0 %v6871_v41  ;;  %v6917_v41 = vld [vmem:[#allocation12 + $0x2a8] ss:$16 sps:$4 sm:$0xff]  }
 0x3a0   :  { %5113 = vmatpush1.bf16.msra.mxu1 %v6866_v22  ;;  %v6922_v22 = vld [vmem:[#allocation12 + $0x2c4] ss:$16 sps:$4 sm:$0xff]  }
 0x3a1   :  { %5277 = vmatpush1.bf16.msra.mxu0 %v6869_v23  ;;  %5114 = vmatprep.subr.bf16.mxu1 %v6874_v24  ;;  %v6925_v23 = vld [vmem:[#allocation12 + $0x2cc] ss:$16 sps:$4 sm:$0xff]   ;;  %v6920_v24 = vld [vmem:[#allocation12 + $0x2c0] ss:$16 sps:$4 sm:$0xff]  }
 0x3a2   :  { %5278 = vmatprep.subr.bf16.mxu0 %v6877_v25  ;;  %v6923_v25 = vld [vmem:[#allocation12 + $0x2c8] ss:$16 sps:$4 sm:$0xff]  }
 0x3a4   :  { %5115 = vmatpush1.bf16.msra.mxu1 %v6872_v26  ;;  %v6928_v26 = vld [vmem:[#allocation12 + $0x2e4] ss:$16 sps:$4 sm:$0xff]  }
 0x3a5   :  { %5279 = vmatpush1.bf16.msra.mxu0 %v6875_v27  ;;  %5116 = vmatprep.subr.bf16.mxu1 %v6880_v28  ;;  %v6931_v27 = vld [vmem:[#allocation12 + $0x2ec] ss:$16 sps:$4 sm:$0xff]   ;;  %v6926_v28 = vld [vmem:[#allocation12 + $0x2e0] ss:$16 sps:$4 sm:$0xff]  }
 0x3a6   :  { %5280 = vmatprep.subr.bf16.mxu0 %v6883_v53  ;;  %v6929_v53 = vld [vmem:[#allocation12 + $0x2e8] ss:$16 sps:$4 sm:$0xff]  }
 0x3a8   :  { %5117 = vmatpush1.bf16.msra.mxu1 %v6878_v29  ;;  %v6934_v29 = vld [vmem:[#allocation12 + $0x304] ss:$16 sps:$4 sm:$0xff]  }
 0x3a9   :  { %5281 = vmatpush1.bf16.msra.mxu0 %v6881_v30  ;;  %5127 = vmatprep.subr.bf16.mxu1 %v6886_v19  ;;  %v6937_v30 = vld [vmem:[#allocation12 + $0x30c] ss:$16 sps:$4 sm:$0xff]   ;;  %v6932_v19 = vld [vmem:[#allocation12 + $0x300] ss:$16 sps:$4 sm:$0xff]  }
 0x3aa   :  { %5291 = vmatprep.subr.bf16.mxu0 %v6889_v33  ;;  %v6935_v33 = vld [vmem:[#allocation12 + $0x308] ss:$16 sps:$4 sm:$0xff]  }
 0x3ae   :  { %v3120_v45 = vpop.f32.mrb[16].mxu1  ;;  %v7773_v31 = vpop.f32.mrb[8].mxu0 }
 0x3af   :  { %v6566_v46 = vadd.f32 %v3120_v45, %v1523_v38  ;;  %v3122_v0 = vpop.f32.mrb[17].mxu1  ;;  %v3245_v47 = vpop.f32.mrb[9].mxu0  ;;  %v6940_v38 = vld [vmem:[#allocation12 + $0x324] ss:$16 sps:$4 sm:$0xff]   ;;  %v6941_v45 = vld [vmem:[#allocation12 + $0x328] ss:$16 sps:$4 sm:$0xff]  }
 0x3b0   :  { %v6567_v48 = vadd.f32 %v3122_v0, %v1527_v42  ;;  %v6569_v1 = vadd.f32 %v3245_v47, %v1535_v44  ;;  %v3124_v49 = vpop.f32.mrb[18].mxu1  ;;  %v3247_v50 = vpop.f32.mrb[10].mxu0  ;;  %v6943_v42 = vld [vmem:[#allocation12 + $0x32c] ss:$16 sps:$4 sm:$0xff]   ;;  %v6938_v44 = vld [vmem:[#allocation12 + $0x320] ss:$16 sps:$4 sm:$0xff]  }
 0x3b1   :  { %vm3496_vm13 = vcmp.gt.f32.partialorder %v6566_v46, 0.0  ;;  %v3504_v52 = vmul.f32 0.01, %v6566_v46  ;;  %v3125_v59 = vpop.f32.mrb[19].mxu1  ;;  %v3248_v60 = vpop.f32.mrb[11].mxu0 }
 0x3b2   :  { %vm3497_vm14 = vcmp.gt.f32.partialorder %v6567_v48, 0.0  ;;  %v3505_v51 = vmul.f32 0.01, %v6567_v48  ;;  %vm3499_vm15 = vcmp.gt.f32.partialorder %v6569_v1, 0.0  ;;  %v3507_v54 = vmul.f32 0.01, %v6569_v1 }
 0x3b3   :  { %v3512_v57 = vsel %vm3496_vm13, %v6566_v46, %v3504_v52  ;;  %v6946_v46 = vld [vmem:[#allocation12 + $0x344] ss:$16 sps:$4 sm:$0xff]   ;;  %v6949_v0 = vld [vmem:[#allocation12 + $0x34c] ss:$16 sps:$4 sm:$0xff]   ;;  %v6944_v47 = vld [vmem:[#allocation12 + $0x340] ss:$16 sps:$4 sm:$0xff]  }
 0x3b4   :  { %v3513_v62 = vsel %vm3497_vm14, %v6567_v48, %v3505_v51  ;;  %v3515_v4 = vsel %vm3499_vm15, %v6569_v1, %v3507_v54  ;;  %v3520_v5 = vpack.c.bf16 %v3512_v57, %v3512_v57  ;;  %v6947_v48 = vld [vmem:[#allocation12 + $0x348] ss:$16 sps:$4 sm:$0xff]   ;;  %v6952_v1 = vld [vmem:[#allocation12 + $0x364] ss:$16 sps:$4 sm:$0xff]   ;;  %v6955_v49 = vld [vmem:[#allocation12 + $0x36c] ss:$16 sps:$4 sm:$0xff]  }
 0x3b5   :  { %v3521_v63 = vpack.c.bf16 %v3513_v62, %v3513_v62  ;;  %v3523_v13 = vpack.c.bf16 %v3515_v4, %v3515_v4  ;;  %v6950_v50 = vld [vmem:[#allocation12 + $0x360] ss:$16 sps:$4 sm:$0xff]   ;;  %v6953_v52 = vld [vmem:[#allocation12 + $0x368] ss:$16 sps:$4 sm:$0xff]   ;;  %v6958_v51 = vld [vmem:[#allocation12 + $0x384] ss:$16 sps:$4 sm:$0xff]  }
 0x3b6   :  { %v6961_v54 = vld [vmem:[#allocation12 + $0x38c] ss:$16 sps:$4 sm:$0xff]   ;;  %v6956_v57 = vld [vmem:[#allocation12 + $0x380] ss:$16 sps:$4 sm:$0xff]   ;;  %v6959_v59 = vld [vmem:[#allocation12 + $0x388] ss:$16 sps:$4 sm:$0xff]  }
 0x3b7   :  { %5118 = vmatprep.mubr.bf16.mxu1 %v3521_v63  ;;  %5282 = vmatprep.mubr.bf16.mxu0 %v3521_v63  ;;  %v6964_v60 = vld [vmem:[#allocation12 + $0x3a4] ss:$16 sps:$4 sm:$0xff]   ;;  %v6967_v62 = vld [vmem:[#allocation12 + $0x3ac] ss:$16 sps:$4 sm:$0xff]   ;;  %v1531_v63 = vrot.slane %v7765_v34, %v7664_v61 }
 0x3b8   :  { %5119 = vmatmul.mubr.bf16.vlgmr.msra.gmra.mrb[24].mxu1 %v3520_v5  ;;  %5283 = vmatmul.mubr.bf16.vlgmr.msra.gmra.mrb[16].mxu0 %v3520_v5  ;;  %v6970_v4 = vld [vmem:[#allocation12 + $0x3c4] ss:$16 sps:$4 sm:$0xff]   ;;  %v6973_v5 = vld [vmem:[#allocation12 + $0x3cc] ss:$16 sps:$4 sm:$0xff]  }
 0x3b9   :  { %5128 = vmatpush1.bf16.msra.mxu1 %v6884_v2  ;;  %5292 = vmatpush1.bf16.msra.mxu0 %v6887_v3  ;;  %v6962_v2 = vld [vmem:[#allocation12 + $0x3a0] ss:$16 sps:$4 sm:$0xff]   ;;  %v6965_v3 = vld [vmem:[#allocation12 + $0x3a8] ss:$16 sps:$4 sm:$0xff]  }
 0x3ba   :  { %5159 = vmatprep.mubr.bf16.mxu1 %v3523_v13  ;;  %5323 = vmatprep.mubr.bf16.mxu0 %v3523_v13  ;;  %v6971_v13 = vld [vmem:[#allocation12 + $0x3c8] ss:$16 sps:$4 sm:$0xff]  }
 0x3bb   :  { %5129 = vmatprep.subr.bf16.mxu1 %v6892_v6  ;;  %5293 = vmatprep.subr.bf16.mxu0 %v6895_v7  ;;  %v6568_v6 = vadd.f32 %v7773_v31, %v1531_v63  ;;  %v6968_v7 = vld [vmem:[#allocation12 + $0x3c0] ss:$16 sps:$4 sm:$0xff]  }
 0x3bc   :  { %v6980_v31 = vld [vmem:[#allocation12 + $0x400] ss:$16 sps:$4 sm:$0xff]  }
 0x3bd   :  { %5130 = vmatpush1.bf16.msra.mxu1 %v6890_v8  ;;  %5294 = vmatpush1.bf16.msra.mxu0 %v6893_v9  ;;  %v6976_v8 = vld [vmem:[#allocation12 + $0x3e4] ss:$16 sps:$4 sm:$0xff]   ;;  %v6979_v9 = vld [vmem:[#allocation12 + $0x3ec] ss:$16 sps:$4 sm:$0xff]   ;;  %vm3498_vm0 = vcmp.gt.f32.partialorder %v6568_v6, 0.0 }
 0x3be   :  { %5131 = vmatprep.subr.bf16.mxu1 %v6898_v10  ;;  %5295 = vmatprep.subr.bf16.mxu0 %v6901_v11  ;;  %v3506_v10 = vmul.f32 0.01, %v6568_v6  ;;  %v6974_v11 = vld [vmem:[#allocation12 + $0x3e0] ss:$16 sps:$4 sm:$0xff]  }
 0x3bf   :  { %v7040_v63 = vld [vmem:[#allocation12 + $0x540] ss:$16 sps:$4 sm:$0xff]  }
 0x3c1   :  { %5132 = vmatpush1.bf16.msra.mxu1 %v6896_v12  ;;  %5296 = vmatpush1.bf16.msra.mxu0 %v6899_v14  ;;  %v6977_v12 = vld [vmem:[#allocation12 + $0x3e8] ss:$16 sps:$4 sm:$0xff]   ;;  %v6982_v14 = vld [vmem:[#allocation12 + $0x404] ss:$16 sps:$4 sm:$0xff]  }
 0x3c2   :  { %5133 = vmatprep.subr.bf16.mxu1 %v6904_v32  ;;  %5297 = vmatprep.subr.bf16.mxu0 %v6907_v15  ;;  %v6985_v32 = vld [vmem:[#allocation12 + $0x40c] ss:$16 sps:$4 sm:$0xff]   ;;  %v3514_v15 = vsel %vm3498_vm0, %v6568_v6, %v3506_v10  ;;  %v7049_v6 = vld [vmem:[#allocation12 + $0x568] ss:$16 sps:$4 sm:$0xff]   ;;  %v7060_v10 = vld [vmem:[#allocation12 + $0x5a4] ss:$16 sps:$4 sm:$0xff]  }
 0x3c5   :  { %5134 = vmatpush1.bf16.msra.mxu1 %v6902_v16  ;;  %5298 = vmatpush1.bf16.msra.mxu0 %v6905_v17  ;;  %v6983_v16 = vld [vmem:[#allocation12 + $0x408] ss:$16 sps:$4 sm:$0xff]   ;;  %v3522_v17 = vpack.c.bf16 %v3514_v15, %v3514_v15  ;;  %v7069_v15 = vld [vmem:[#allocation12 + $0x5cc] ss:$16 sps:$4 sm:$0xff]  }
 0x3c6   :  { %5135 = vmatprep.subr.bf16.mxu1 %v6910_v18  ;;  %5299 = vmatprep.subr.bf16.mxu0 %v6913_v36  ;;  %v6988_v18 = vld [vmem:[#allocation12 + $0x424] ss:$16 sps:$4 sm:$0xff]   ;;  %v6991_v36 = vld [vmem:[#allocation12 + $0x42c] ss:$16 sps:$4 sm:$0xff]  }
 0x3c9   :  { %5136 = vmatpush1.bf16.msra.mxu1 %v6908_v37  ;;  %5300 = vmatpush1.bf16.msra.mxu0 %v6911_v40  ;;  %v6986_v37 = vld [vmem:[#allocation12 + $0x420] ss:$16 sps:$4 sm:$0xff]   ;;  %v6989_v40 = vld [vmem:[#allocation12 + $0x428] ss:$16 sps:$4 sm:$0xff]  }
 0x3ca   :  { %5137 = vmatprep.subr.bf16.mxu1 %v6916_v43  ;;  %5301 = vmatprep.subr.bf16.mxu0 %v6919_v20  ;;  %v6994_v43 = vld [vmem:[#allocation12 + $0x444] ss:$16 sps:$4 sm:$0xff]   ;;  %v6997_v20 = vld [vmem:[#allocation12 + $0x44c] ss:$16 sps:$4 sm:$0xff]  }
 0x3cd   :  { %5138 = vmatpush1.bf16.msra.mxu1 %v6914_v21  ;;  %5302 = vmatpush1.bf16.msra.mxu0 %v6917_v41  ;;  %v6992_v21 = vld [vmem:[#allocation12 + $0x440] ss:$16 sps:$4 sm:$0xff]   ;;  %v6995_v41 = vld [vmem:[#allocation12 + $0x448] ss:$16 sps:$4 sm:$0xff]  }
 0x3ce   :  { %5139 = vmatprep.subr.bf16.mxu1 %v6922_v22  ;;  %5303 = vmatprep.subr.bf16.mxu0 %v6925_v23  ;;  %v7000_v22 = vld [vmem:[#allocation12 + $0x464] ss:$16 sps:$4 sm:$0xff]   ;;  %v7003_v23 = vld [vmem:[#allocation12 + $0x46c] ss:$16 sps:$4 sm:$0xff]  }
 0x3d1   :  { %5140 = vmatpush1.bf16.msra.mxu1 %v6920_v24  ;;  %5304 = vmatpush1.bf16.msra.mxu0 %v6923_v25  ;;  %v6998_v24 = vld [vmem:[#allocation12 + $0x460] ss:$16 sps:$4 sm:$0xff]   ;;  %v7001_v25 = vld [vmem:[#allocation12 + $0x468] ss:$16 sps:$4 sm:$0xff]  }
 0x3d2   :  { %5141 = vmatprep.subr.bf16.mxu1 %v6928_v26  ;;  %5305 = vmatprep.subr.bf16.mxu0 %v6931_v27  ;;  %v7006_v26 = vld [vmem:[#allocation12 + $0x484] ss:$16 sps:$4 sm:$0xff]   ;;  %v7009_v27 = vld [vmem:[#allocation12 + $0x48c] ss:$16 sps:$4 sm:$0xff]  }
 0x3d5   :  { %5142 = vmatpush1.bf16.msra.mxu1 %v6926_v28  ;;  %5306 = vmatpush1.bf16.msra.mxu0 %v6929_v53  ;;  %v7004_v28 = vld [vmem:[#allocation12 + $0x480] ss:$16 sps:$4 sm:$0xff]   ;;  %v7007_v53 = vld [vmem:[#allocation12 + $0x488] ss:$16 sps:$4 sm:$0xff]  }
 0x3d6   :  { %5143 = vmatprep.subr.bf16.mxu1 %v6934_v29  ;;  %5307 = vmatprep.subr.bf16.mxu0 %v6937_v30  ;;  %v7012_v29 = vld [vmem:[#allocation12 + $0x4a4] ss:$16 sps:$4 sm:$0xff]   ;;  %v7015_v30 = vld [vmem:[#allocation12 + $0x4ac] ss:$16 sps:$4 sm:$0xff]  }
 0x3d9   :  { %5144 = vmatpush1.bf16.msra.mxu1 %v6932_v19  ;;  %5308 = vmatpush1.bf16.msra.mxu0 %v6935_v33  ;;  %v7010_v19 = vld [vmem:[#allocation12 + $0x4a0] ss:$16 sps:$4 sm:$0xff]   ;;  %v7013_v33 = vld [vmem:[#allocation12 + $0x4a8] ss:$16 sps:$4 sm:$0xff]  }
 0x3da   :  { %5145 = vmatprep.subr.bf16.mxu1 %v6940_v38  ;;  %5309 = vmatprep.subr.bf16.mxu0 %v6943_v42  ;;  %v7018_v38 = vld [vmem:[#allocation12 + $0x4c4] ss:$16 sps:$4 sm:$0xff]   ;;  %v7021_v42 = vld [vmem:[#allocation12 + $0x4cc] ss:$16 sps:$4 sm:$0xff]  }
 0x3dd   :  { %5146 = vmatpush1.bf16.msra.mxu1 %v6938_v44  ;;  %5310 = vmatpush1.bf16.msra.mxu0 %v6941_v45  ;;  %v7016_v44 = vld [vmem:[#allocation12 + $0x4c0] ss:$16 sps:$4 sm:$0xff]   ;;  %v7019_v45 = vld [vmem:[#allocation12 + $0x4c8] ss:$16 sps:$4 sm:$0xff]  }
 0x3de   :  { %5147 = vmatprep.subr.bf16.mxu1 %v6946_v46  ;;  %5311 = vmatprep.subr.bf16.mxu0 %v6949_v0  ;;  %v7024_v46 = vld [vmem:[#allocation12 + $0x4e4] ss:$16 sps:$4 sm:$0xff]   ;;  %v7027_v0 = vld [vmem:[#allocation12 + $0x4ec] ss:$16 sps:$4 sm:$0xff]  }
 0x3e1   :  { %5148 = vmatpush1.bf16.msra.mxu1 %v6944_v47  ;;  %5312 = vmatpush1.bf16.msra.mxu0 %v6947_v48  ;;  %v7022_v47 = vld [vmem:[#allocation12 + $0x4e0] ss:$16 sps:$4 sm:$0xff]   ;;  %v7025_v48 = vld [vmem:[#allocation12 + $0x4e8] ss:$16 sps:$4 sm:$0xff]  }
 0x3e2   :  { %5149 = vmatprep.subr.bf16.mxu1 %v6952_v1  ;;  %5313 = vmatprep.subr.bf16.mxu0 %v6955_v49  ;;  %v7030_v1 = vld [vmem:[#allocation12 + $0x504] ss:$16 sps:$4 sm:$0xff]   ;;  %v7033_v49 = vld [vmem:[#allocation12 + $0x50c] ss:$16 sps:$4 sm:$0xff]  }
 0x3e5   :  { %5150 = vmatpush1.bf16.msra.mxu1 %v6950_v50  ;;  %5314 = vmatpush1.bf16.msra.mxu0 %v6953_v52  ;;  %v7028_v50 = vld [vmem:[#allocation12 + $0x500] ss:$16 sps:$4 sm:$0xff]   ;;  %v7031_v52 = vld [vmem:[#allocation12 + $0x508] ss:$16 sps:$4 sm:$0xff]  }
 0x3e6   :  { %5151 = vmatprep.subr.bf16.mxu1 %v6958_v51  ;;  %5315 = vmatprep.subr.bf16.mxu0 %v6961_v54  ;;  %v7036_v51 = vld [vmem:[#allocation12 + $0x524] ss:$16 sps:$4 sm:$0xff]   ;;  %v7039_v54 = vld [vmem:[#allocation12 + $0x52c] ss:$16 sps:$4 sm:$0xff]  }
 0x3e9   :  { %5152 = vmatpush1.bf16.msra.mxu1 %v6956_v57  ;;  %5316 = vmatpush1.bf16.msra.mxu0 %v6959_v59  ;;  %v7034_v57 = vld [vmem:[#allocation12 + $0x520] ss:$16 sps:$4 sm:$0xff]   ;;  %v7037_v59 = vld [vmem:[#allocation12 + $0x528] ss:$16 sps:$4 sm:$0xff]  }
 0x3ea   :  { %5153 = vmatprep.subr.bf16.mxu1 %v6964_v60  ;;  %5317 = vmatprep.subr.bf16.mxu0 %v6967_v62  ;;  %v7042_v60 = vld [vmem:[#allocation12 + $0x544] ss:$16 sps:$4 sm:$0xff]   ;;  %v7045_v62 = vld [vmem:[#allocation12 + $0x54c] ss:$16 sps:$4 sm:$0xff]  }
 0x3ed   :  { %5154 = vmatpush1.bf16.msra.mxu1 %v6962_v2  ;;  %5318 = vmatpush1.bf16.msra.mxu0 %v6965_v3  ;;  %v7043_v2 = vld [vmem:[#allocation12 + $0x548] ss:$16 sps:$4 sm:$0xff]   ;;  %v7048_v3 = vld [vmem:[#allocation12 + $0x564] ss:$16 sps:$4 sm:$0xff]  }
 0x3ee   :  { %5155 = vmatprep.subr.bf16.mxu1 %v6970_v4  ;;  %5319 = vmatprep.subr.bf16.mxu0 %v6973_v5  ;;  %v7051_v4 = vld [vmem:[#allocation12 + $0x56c] ss:$16 sps:$4 sm:$0xff]   ;;  %v7046_v5 = vld [vmem:[#allocation12 + $0x560] ss:$16 sps:$4 sm:$0xff]  }
 0x3f1   :  { %5156 = vmatpush1.bf16.msra.mxu1 %v6968_v7  ;;  %5320 = vmatpush1.bf16.msra.mxu0 %v6971_v13  ;;  %v7054_v7 = vld [vmem:[#allocation12 + $0x584] ss:$16 sps:$4 sm:$0xff]   ;;  %v7057_v13 = vld [vmem:[#allocation12 + $0x58c] ss:$16 sps:$4 sm:$0xff]  }
 0x3f2   :  { %5157 = vmatprep.subr.bf16.mxu1 %v6976_v8  ;;  %5321 = vmatprep.subr.bf16.mxu0 %v6979_v9  ;;  %v7052_v8 = vld [vmem:[#allocation12 + $0x580] ss:$16 sps:$4 sm:$0xff]   ;;  %v7055_v9 = vld [vmem:[#allocation12 + $0x588] ss:$16 sps:$4 sm:$0xff]  }
 0x3f5   :  { %5158 = vmatpush1.bf16.msra.mxu1 %v6974_v11  ;;  %5322 = vmatpush1.bf16.msra.mxu0 %v6977_v12  ;;  %v7063_v11 = vld [vmem:[#allocation12 + $0x5ac] ss:$16 sps:$4 sm:$0xff]   ;;  %v7058_v12 = vld [vmem:[#allocation12 + $0x5a0] ss:$16 sps:$4 sm:$0xff]  }
 0x3f6   :  { %5168 = vmatprep.subr.bf16.mxu1 %v6982_v14  ;;  %5332 = vmatprep.subr.bf16.mxu0 %v6985_v32  ;;  %v7061_v14 = vld [vmem:[#allocation12 + $0x5a8] ss:$16 sps:$4 sm:$0xff]   ;;  %v7066_v32 = vld [vmem:[#allocation12 + $0x5c4] ss:$16 sps:$4 sm:$0xff]  }
 0x3f8   :  { %5160 = vmatmul.mubr.bf16.vlgmr.msra.gmra.mrb[24].mxu1 %v3522_v17  ;;  %5324 = vmatmul.mubr.bf16.vlgmr.msra.gmra.mrb[16].mxu0 %v3522_v17  ;;  %v7072_v17 = vld [vmem:[#allocation12 + $0x5e4] ss:$16 sps:$4 sm:$0xff]  }
 0x3f9   :  { %5169 = vmatpush1.bf16.msra.mxu1 %v6980_v31  ;;  %5333 = vmatpush1.bf16.msra.mxu0 %v6983_v16  ;;  %v7064_v31 = vld [vmem:[#allocation12 + $0x5c0] ss:$16 sps:$4 sm:$0xff]   ;;  %v7067_v16 = vld [vmem:[#allocation12 + $0x5c8] ss:$16 sps:$4 sm:$0xff]  }
 0x3fa   :  { %5170 = vmatprep.subr.bf16.mxu1 %v6988_v18  ;;  %5334 = vmatprep.subr.bf16.mxu0 %v6991_v36  ;;  %v7075_v18 = vld [vmem:[#allocation12 + $0x5ec] ss:$16 sps:$4 sm:$0xff]   ;;  %v7070_v36 = vld [vmem:[#allocation12 + $0x5e0] ss:$16 sps:$4 sm:$0xff]  }
 0x3fd   :  { %5171 = vmatpush1.bf16.msra.mxu1 %v6986_v37  ;;  %5335 = vmatpush1.bf16.msra.mxu0 %v6989_v40  ;;  %v7073_v37 = vld [vmem:[#allocation12 + $0x5e8] ss:$16 sps:$4 sm:$0xff]   ;;  %v7078_v40 = vld [vmem:[#allocation12 + $0x604] ss:$16 sps:$4 sm:$0xff]  }
 0x3fe   :  { %5172 = vmatprep.subr.bf16.mxu1 %v6994_v43  ;;  %5336 = vmatprep.subr.bf16.mxu0 %v6997_v20  ;;  %v7081_v43 = vld [vmem:[#allocation12 + $0x60c] ss:$16 sps:$4 sm:$0xff]   ;;  %v1542_v20 = vsub.s32 5, %v7653_v55 }
 0x401   :  { %5173 = vmatpush1.bf16.msra.mxu1 %v6992_v21  ;;  %5337 = vmatpush1.bf16.msra.mxu0 %v6995_v41  ;;  %v1550_v21 = vsub.s32 7, %v7653_v55  ;;  %v1539_v41 = vrot.slane %v7765_v34, %v487_v39 }
 0x402   :  { %5174 = vmatprep.subr.bf16.mxu1 %v7000_v22  ;;  %5338 = vmatprep.subr.bf16.mxu0 %v7003_v23  ;;  %v1543_v22 = vrot.slane %v7765_v34, %v1542_v20  ;;  %v7127_v20 = vld [vmem:[#allocation12 + $0x708] ss:$16 sps:$4 sm:$0xff]  }
 0x403   :  { %v1551_v23 = vrot.slane %v7765_v34, %v1550_v21  ;;  %v7132_v21 = vld [vmem:[#allocation12 + $0x724] ss:$16 sps:$4 sm:$0xff]  }
 0x405   :  { %5175 = vmatpush1.bf16.msra.mxu1 %v6998_v24  ;;  %5339 = vmatpush1.bf16.msra.mxu0 %v7001_v25 }
 0x406   :  { %5176 = vmatprep.subr.bf16.mxu1 %v7006_v26  ;;  %5340 = vmatprep.subr.bf16.mxu0 %v7009_v27 }
 0x409   :  { %5177 = vmatpush1.bf16.msra.mxu1 %v7004_v28  ;;  %5341 = vmatpush1.bf16.msra.mxu0 %v7007_v53 }
 0x40a   :  { %5178 = vmatprep.subr.bf16.mxu1 %v7012_v29  ;;  %5342 = vmatprep.subr.bf16.mxu0 %v7015_v30 }
 0x40d   :  { %5179 = vmatpush1.bf16.msra.mxu1 %v7010_v19  ;;  %5343 = vmatpush1.bf16.msra.mxu0 %v7013_v33 }
 0x40e   :  { %5180 = vmatprep.subr.bf16.mxu1 %v7018_v38  ;;  %5344 = vmatprep.subr.bf16.mxu0 %v7021_v42 }
 0x411   :  { %5181 = vmatpush1.bf16.msra.mxu1 %v7016_v44  ;;  %5345 = vmatpush1.bf16.msra.mxu0 %v7019_v45 }
 0x412   :  { %5182 = vmatprep.subr.bf16.mxu1 %v7024_v46  ;;  %5346 = vmatprep.subr.bf16.mxu0 %v7027_v0 }
 0x415   :  { %5183 = vmatpush1.bf16.msra.mxu1 %v7022_v47  ;;  %5347 = vmatpush1.bf16.msra.mxu0 %v7025_v48  ;;  %v7076_v47 = vld [vmem:[#allocation12 + $0x600] ss:$16 sps:$4 sm:$0xff]   ;;  %v7079_v48 = vld [vmem:[#allocation12 + $0x608] ss:$16 sps:$4 sm:$0xff]  }
 0x416   :  { %5184 = vmatprep.subr.bf16.mxu1 %v7030_v1  ;;  %5348 = vmatprep.subr.bf16.mxu0 %v7033_v49 }
 0x419   :  { %5185 = vmatpush1.bf16.msra.mxu1 %v7028_v50  ;;  %5349 = vmatpush1.bf16.msra.mxu0 %v7031_v52  ;;  %v7084_v50 = vld [vmem:[#allocation12 + $0x624] ss:$16 sps:$4 sm:$0xff]   ;;  %v7087_v52 = vld [vmem:[#allocation12 + $0x62c] ss:$16 sps:$4 sm:$0xff]  }
 0x41a   :  { %5186 = vmatprep.subr.bf16.mxu1 %v7036_v51  ;;  %5350 = vmatprep.subr.bf16.mxu0 %v7039_v54  ;;  %v7082_v54 = vld [vmem:[#allocation12 + $0x620] ss:$16 sps:$4 sm:$0xff]  }
 0x41d   :  { %5187 = vmatpush1.bf16.msra.mxu1 %v7034_v57  ;;  %5351 = vmatpush1.bf16.msra.mxu0 %v7037_v59  ;;  %v7085_v57 = vld [vmem:[#allocation12 + $0x628] ss:$16 sps:$4 sm:$0xff]   ;;  %v7090_v59 = vld [vmem:[#allocation12 + $0x644] ss:$16 sps:$4 sm:$0xff]  }
 0x41e   :  { %5188 = vmatprep.subr.bf16.mxu1 %v7042_v60  ;;  %5352 = vmatprep.subr.bf16.mxu0 %v7045_v62  ;;  %v7093_v60 = vld [vmem:[#allocation12 + $0x64c] ss:$16 sps:$4 sm:$0xff]   ;;  %v7088_v62 = vld [vmem:[#allocation12 + $0x640] ss:$16 sps:$4 sm:$0xff]  }
 0x421   :  { %5189 = vmatpush1.bf16.msra.mxu1 %v7040_v63  ;;  %5353 = vmatpush1.bf16.msra.mxu0 %v7043_v2  ;;  %v7091_v63 = vld [vmem:[#allocation12 + $0x648] ss:$16 sps:$4 sm:$0xff]   ;;  %v7096_v2 = vld [vmem:[#allocation12 + $0x664] ss:$16 sps:$4 sm:$0xff]  }
 0x422   :  { %5190 = vmatprep.subr.bf16.mxu1 %v7048_v3  ;;  %5354 = vmatprep.subr.bf16.mxu0 %v7051_v4  ;;  %v7099_v3 = vld [vmem:[#allocation12 + $0x66c] ss:$16 sps:$4 sm:$0xff]   ;;  %v7094_v4 = vld [vmem:[#allocation12 + $0x660] ss:$16 sps:$4 sm:$0xff]  }
 0x425   :  { %5191 = vmatpush1.bf16.msra.mxu1 %v7046_v5  ;;  %5355 = vmatpush1.bf16.msra.mxu0 %v7049_v6  ;;  %v7097_v5 = vld [vmem:[#allocation12 + $0x668] ss:$16 sps:$4 sm:$0xff]   ;;  %v7102_v6 = vld [vmem:[#allocation12 + $0x684] ss:$16 sps:$4 sm:$0xff]  }
 0x426   :  { %5192 = vmatprep.subr.bf16.mxu1 %v7054_v7  ;;  %5356 = vmatprep.subr.bf16.mxu0 %v7057_v13  ;;  %v7105_v7 = vld [vmem:[#allocation12 + $0x68c] ss:$16 sps:$4 sm:$0xff]   ;;  %v7100_v13 = vld [vmem:[#allocation12 + $0x680] ss:$16 sps:$4 sm:$0xff]  }
 0x429   :  { %5193 = vmatpush1.bf16.msra.mxu1 %v7052_v8  ;;  %5357 = vmatpush1.bf16.msra.mxu0 %v7055_v9  ;;  %v7103_v8 = vld [vmem:[#allocation12 + $0x688] ss:$16 sps:$4 sm:$0xff]   ;;  %v7108_v9 = vld [vmem:[#allocation12 + $0x6a4] ss:$16 sps:$4 sm:$0xff]  }
 0x42a   :  { %5194 = vmatprep.subr.bf16.mxu1 %v7060_v10  ;;  %5358 = vmatprep.subr.bf16.mxu0 %v7063_v11  ;;  %v7111_v10 = vld [vmem:[#allocation12 + $0x6ac] ss:$16 sps:$4 sm:$0xff]   ;;  %v7106_v11 = vld [vmem:[#allocation12 + $0x6a0] ss:$16 sps:$4 sm:$0xff]  }
 0x42d   :  { %5195 = vmatpush1.bf16.msra.mxu1 %v7058_v12  ;;  %5359 = vmatpush1.bf16.msra.mxu0 %v7061_v14  ;;  %v7109_v12 = vld [vmem:[#allocation12 + $0x6a8] ss:$16 sps:$4 sm:$0xff]   ;;  %v7114_v14 = vld [vmem:[#allocation12 + $0x6c4] ss:$16 sps:$4 sm:$0xff]  }
 0x42e   :  { %5196 = vmatprep.subr.bf16.mxu1 %v7066_v32  ;;  %5360 = vmatprep.subr.bf16.mxu0 %v7069_v15  ;;  %v7117_v32 = vld [vmem:[#allocation12 + $0x6cc] ss:$16 sps:$4 sm:$0xff]   ;;  %v7112_v15 = vld [vmem:[#allocation12 + $0x6c0] ss:$16 sps:$4 sm:$0xff]  }
 0x431   :  { %5197 = vmatpush1.bf16.msra.mxu1 %v7064_v31  ;;  %5361 = vmatpush1.bf16.msra.mxu0 %v7067_v16  ;;  %v7115_v31 = vld [vmem:[#allocation12 + $0x6c8] ss:$16 sps:$4 sm:$0xff]   ;;  %v7120_v16 = vld [vmem:[#allocation12 + $0x6e4] ss:$16 sps:$4 sm:$0xff]  }
 0x432   :  { %5198 = vmatprep.subr.bf16.mxu1 %v7072_v17  ;;  %5362 = vmatprep.subr.bf16.mxu0 %v7075_v18  ;;  %v7123_v17 = vld [vmem:[#allocation12 + $0x6ec] ss:$16 sps:$4 sm:$0xff]   ;;  %v7118_v18 = vld [vmem:[#allocation12 + $0x6e0] ss:$16 sps:$4 sm:$0xff]  }
 0x435   :  { %5199 = vmatpush1.bf16.msra.mxu1 %v7070_v36  ;;  %5363 = vmatpush1.bf16.msra.mxu0 %v7073_v37  ;;  %v7121_v36 = vld [vmem:[#allocation12 + $0x6e8] ss:$16 sps:$4 sm:$0xff]   ;;  %v7126_v37 = vld [vmem:[#allocation12 + $0x704] ss:$16 sps:$4 sm:$0xff]  }
 0x436   :  { %5209 = vmatprep.subr.bf16.mxu1 %v7078_v40  ;;  %5373 = vmatprep.subr.bf16.mxu0 %v7081_v43  ;;  %v7129_v40 = vld [vmem:[#allocation12 + $0x70c] ss:$16 sps:$4 sm:$0xff]   ;;  %v7124_v43 = vld [vmem:[#allocation12 + $0x700] ss:$16 sps:$4 sm:$0xff]  }
 0x43e   :  { %v3366_v24 = vpop.f32.mrb[20].mxu1 }
 0x43f   :  { %v6570_v25 = vadd.f32 %v3366_v24, %v1539_v41  ;;  %v7785_v26 = vpop.f32.mrb[12].mxu0  ;;  %v3368_v27 = vpop.f32.mrb[21].mxu1  ;;  %v7135_v41 = vld [vmem:[#allocation12 + $0x72c] ss:$16 sps:$4 sm:$0xff]   ;;  %v7138_v24 = vld [vmem:[#allocation12 + $0x744] ss:$16 sps:$4 sm:$0xff]  }
 0x440   :  { %v6571_v28 = vadd.f32 %v3368_v27, %v1543_v22  ;;  %v3491_v53 = vpop.f32.mrb[13].mxu0  ;;  %v3370_v29 = vpop.f32.mrb[22].mxu1  ;;  %v7130_v22 = vld [vmem:[#allocation12 + $0x720] ss:$16 sps:$4 sm:$0xff]  }
 0x441   :  { %vm3500_vm1 = vcmp.gt.f32.partialorder %v6570_v25, 0.0  ;;  %v3508_v30 = vmul.f32 0.01, %v6570_v25  ;;  %v6573_v19 = vadd.f32 %v3491_v53, %v1551_v23  ;;  %v3493_v33 = vpop.f32.mrb[14].mxu0  ;;  %v3371_v38 = vpop.f32.mrb[23].mxu1 }
 0x442   :  { %vm3501_vm2 = vcmp.gt.f32.partialorder %v6571_v28, 0.0  ;;  %v3509_v42 = vmul.f32 0.01, %v6571_v28  ;;  %v3494_v45 = vpop.f32.mrb[15].mxu0  ;;  %v7133_v23 = vld [vmem:[#allocation12 + $0x728] ss:$16 sps:$4 sm:$0xff]  }
 0x443   :  { %v3516_v39 = vsel %vm3500_vm1, %v6570_v25, %v3508_v30  ;;  %vm3503_vm3 = vcmp.gt.f32.partialorder %v6573_v19, 0.0  ;;  %v3511_v44 = vmul.f32 0.01, %v6573_v19  ;;  %v7141_v25 = vld [vmem:[#allocation12 + $0x74c] ss:$16 sps:$4 sm:$0xff]  }
 0x444   :  { %v3517_v46 = vsel %vm3501_vm2, %v6571_v28, %v3509_v42  ;;  %v3524_v49 = vpack.c.bf16 %v3516_v39, %v3516_v39  ;;  %v7136_v27 = vld [vmem:[#allocation12 + $0x740] ss:$16 sps:$4 sm:$0xff]   ;;  %v7139_v28 = vld [vmem:[#allocation12 + $0x748] ss:$16 sps:$4 sm:$0xff]   ;;  %v7144_v53 = vld [vmem:[#allocation12 + $0x764] ss:$16 sps:$4 sm:$0xff]  }
 0x445   :  { %v3525_v0 = vpack.c.bf16 %v3517_v46, %v3517_v46  ;;  %v3519_v1 = vsel %vm3503_vm3, %v6573_v19, %v3511_v44  ;;  %v7147_v29 = vld [vmem:[#allocation12 + $0x76c] ss:$16 sps:$4 sm:$0xff]   ;;  %v7142_v30 = vld [vmem:[#allocation12 + $0x760] ss:$16 sps:$4 sm:$0xff]   ;;  %v7145_v19 = vld [vmem:[#allocation12 + $0x768] ss:$16 sps:$4 sm:$0xff]  }
 0x446   :  { %v3527_v51 = vpack.c.bf16 %v3519_v1, %v3519_v1  ;;  %v7150_v33 = vld [vmem:[#allocation12 + $0x784] ss:$16 sps:$4 sm:$0xff]   ;;  %v7153_v38 = vld [vmem:[#allocation12 + $0x78c] ss:$16 sps:$4 sm:$0xff]   ;;  %v1546_v42 = vsub.s32 6, %v7653_v55 }
 0x447   :  { %5200 = vmatprep.mubr.bf16.mxu1 %v3525_v0  ;;  %5364 = vmatprep.mubr.bf16.mxu0 %v3525_v0  ;;  %v7148_v39 = vld [vmem:[#allocation12 + $0x780] ss:$16 sps:$4 sm:$0xff]   ;;  %v7151_v44 = vld [vmem:[#allocation12 + $0x788] ss:$16 sps:$4 sm:$0xff]   ;;  %v7156_v45 = vld [vmem:[#allocation12 + $0x7a4] ss:$16 sps:$4 sm:$0xff]  }
 0x448   :  { %5201 = vmatmul.mubr.bf16.vlgmr.msra.gmra.mrb[24].mxu1 %v3524_v49  ;;  %5365 = vmatmul.mubr.bf16.vlgmr.msra.gmra.mrb[16].mxu0 %v3524_v49  ;;  %v7159_v46 = vld [vmem:[#allocation12 + $0x7ac] ss:$16 sps:$4 sm:$0xff]   ;;  %v1547_v0 = vrot.slane %v7765_v34, %v1546_v42  ;;  %v7162_v1 = vld [vmem:[#allocation12 + $0x7c4] ss:$16 sps:$4 sm:$0xff]   ;;  %v7166_v34 = vld [vmem:[#allocation12 + $0x7e0] ss:$16 sps:$4 sm:$0xff]  }
 0x449   :  { %5210 = vmatpush1.bf16.msra.mxu1 %v7076_v47  ;;  %5374 = vmatpush1.bf16.msra.mxu0 %v7079_v48  ;;  %v7154_v47 = vld [vmem:[#allocation12 + $0x7a0] ss:$16 sps:$4 sm:$0xff]   ;;  %v7157_v48 = vld [vmem:[#allocation12 + $0x7a8] ss:$16 sps:$4 sm:$0xff]   ;;  %v7165_v49 = vld [vmem:[#allocation12 + $0x7cc] ss:$16 sps:$4 sm:$0xff]  }
 0x44a   :  { %5241 = vmatprep.mubr.bf16.mxu1 %v3527_v51  ;;  %5405 = vmatprep.mubr.bf16.mxu0 %v3527_v51  ;;  %v6572_v55 = vadd.f32 %v7785_v26, %v1547_v0  ;;  %v7168_v51 = vld [vmem:[#allocation12 + $0x7e4] ss:$16 sps:$4 sm:$0xff]  }
 0x44b   :  { %5211 = vmatprep.subr.bf16.mxu1 %v7084_v50  ;;  %5375 = vmatprep.subr.bf16.mxu0 %v7087_v52  ;;  %v7160_v50 = vld [vmem:[#allocation12 + $0x7c0] ss:$16 sps:$4 sm:$0xff]   ;;  %v7163_v52 = vld [vmem:[#allocation12 + $0x7c8] ss:$16 sps:$4 sm:$0xff]  }
 0x44c   :  { %vm3502_vm4 = vcmp.gt.f32.partialorder %v6572_v55, 0.0  ;;  %v7174_v26 = vld [vmem:[#allocation15] sm:$0xff]  }
 0x44d   :  { %5212 = vmatpush1.bf16.msra.mxu1 %v7082_v54  ;;  %5376 = vmatpush1.bf16.msra.mxu0 %v7085_v57  ;;  %v7171_v54 = vld [vmem:[#allocation12 + $0x7ec] ss:$16 sps:$4 sm:$0xff]   ;;  %v3510_v57 = vmul.f32 0.01, %v6572_v55 }
 0x44e   :  { %5213 = vmatprep.subr.bf16.mxu1 %v7090_v59  ;;  %5377 = vmatprep.subr.bf16.mxu0 %v7093_v60  ;;  %v7169_v59 = vld [vmem:[#allocation12 + $0x7e8] ss:$16 sps:$4 sm:$0xff]  }
 0x44f   :  { %v7172_v60 = vld [vmem:[#allocation15 + $0x40] sm:$0xff]  }
 0x451   :  { %5214 = vmatpush1.bf16.msra.mxu1 %v7088_v62  ;;  %5378 = vmatpush1.bf16.msra.mxu0 %v7091_v63  ;;  %v7173_v62 = vld [vmem:[#allocation15 + $0xc0] sm:$0xff]   ;;  %v3518_v63 = vsel %vm3502_vm4, %v6572_v55, %v3510_v57 }
 0x452   :  { %5215 = vmatprep.subr.bf16.mxu1 %v7096_v2  ;;  %5379 = vmatprep.subr.bf16.mxu0 %v7099_v3  ;;  %v7175_v2 = vld [vmem:[#allocation15 + $0x80] sm:$0xff]   ;;  %v3526_v3 = vpack.c.bf16 %v3518_v63, %v3518_v63 }
 0x455   :  { %5216 = vmatpush1.bf16.msra.mxu1 %v7094_v4  ;;  %5380 = vmatpush1.bf16.msra.mxu0 %v7097_v5  ;;  %v7176_v4 = vld [vmem:[#allocation15 + $0x48] sm:$0xff]  }
 0x456   :  { %5217 = vmatprep.subr.bf16.mxu1 %v7102_v6  ;;  %5381 = vmatprep.subr.bf16.mxu0 %v7105_v7  ;;  %v7177_v5 = vld [vmem:[#allocation15 + $0xc8] sm:$0xff]  }
 0x457   :  { %v7178_v6 = vld [vmem:[#allocation15 + $0x8] sm:$0xff]  }
 0x458   :  { %v7179_v7 = vld [vmem:[#allocation15 + $0x88] sm:$0xff]  }
 0x459   :  { %5218 = vmatpush1.bf16.msra.mxu1 %v7100_v13  ;;  %5382 = vmatpush1.bf16.msra.mxu0 %v7103_v8  ;;  %v7180_v13 = vld [vmem:[#allocation15 + $0x50] sm:$0xff]  }
 0x45a   :  { %5219 = vmatprep.subr.bf16.mxu1 %v7108_v9  ;;  %5383 = vmatprep.subr.bf16.mxu0 %v7111_v10  ;;  %v7181_v8 = vld [vmem:[#allocation15 + $0xd0] sm:$0xff]  }
 0x45b   :  { %v7182_v9 = vld [vmem:[#allocation15 + $0x10] sm:$0xff]  }
 0x45c   :  { %v7183_v10 = vld [vmem:[#allocation15 + $0x90] sm:$0xff]  }
 0x45d   :  { %5220 = vmatpush1.bf16.msra.mxu1 %v7106_v11  ;;  %5384 = vmatpush1.bf16.msra.mxu0 %v7109_v12  ;;  %v7184_v11 = vld [vmem:[#allocation15 + $0x58] sm:$0xff]  }
 0x45e   :  { %5221 = vmatprep.subr.bf16.mxu1 %v7114_v14  ;;  %5385 = vmatprep.subr.bf16.mxu0 %v7117_v32  ;;  %v7185_v12 = vld [vmem:[#allocation15 + $0xd8] sm:$0xff]  }
 0x45f   :  { %v7186_v14 = vld [vmem:[#allocation15 + $0x18] sm:$0xff]  }
 0x460   :  { %v7187_v32 = vld [vmem:[#allocation15 + $0x98] sm:$0xff]  }
 0x461   :  { %5222 = vmatpush1.bf16.msra.mxu1 %v7112_v15  ;;  %5386 = vmatpush1.bf16.msra.mxu0 %v7115_v31  ;;  %v7188_v15 = vld [vmem:[#allocation15 + $0x60] sm:$0xff]  }
 0x462   :  { %5223 = vmatprep.subr.bf16.mxu1 %v7120_v16  ;;  %5387 = vmatprep.subr.bf16.mxu0 %v7123_v17  ;;  %v7189_v31 = vld [vmem:[#allocation15 + $0xe0] sm:$0xff]  }
 0x463   :  { %v7190_v16 = vld [vmem:[#allocation15 + $0x20] sm:$0xff]  }
 0x464   :  { %v7191_v17 = vld [vmem:[#allocation15 + $0xa0] sm:$0xff]  }
 0x465   :  { %5224 = vmatpush1.bf16.msra.mxu1 %v7118_v18  ;;  %5388 = vmatpush1.bf16.msra.mxu0 %v7121_v36  ;;  %v7192_v18 = vld [vmem:[#allocation15 + $0x68] sm:$0xff]  }
 0x466   :  { %5225 = vmatprep.subr.bf16.mxu1 %v7126_v37  ;;  %5389 = vmatprep.subr.bf16.mxu0 %v7129_v40  ;;  %v7193_v36 = vld [vmem:[#allocation15 + $0xe8] sm:$0xff]  }
 0x467   :  { %v7194_v37 = vld [vmem:[#allocation15 + $0x28] sm:$0xff]  }
 0x468   :  { %v7195_v40 = vld [vmem:[#allocation15 + $0xa8] sm:$0xff]  }
 0x469   :  { %5226 = vmatpush1.bf16.msra.mxu1 %v7124_v43  ;;  %5390 = vmatpush1.bf16.msra.mxu0 %v7127_v20  ;;  %v7196_v43 = vld [vmem:[#allocation15 + $0x70] sm:$0xff]  }
 0x46a   :  { %5227 = vmatprep.subr.bf16.mxu1 %v7132_v21  ;;  %5391 = vmatprep.subr.bf16.mxu0 %v7135_v41  ;;  %v7197_v20 = vld [vmem:[#allocation15 + $0xf0] sm:$0xff]  }
 0x46b   :  { %v7198_v21 = vld [vmem:[#allocation15 + $0x30] sm:$0xff]  }
 0x46c   :  { %v7199_v41 = vld [vmem:[#allocation15 + $0xb0] sm:$0xff]  }
 0x46d   :  { %5228 = vmatpush1.bf16.msra.mxu1 %v7130_v22  ;;  %5392 = vmatpush1.bf16.msra.mxu0 %v7133_v23  ;;  %v7200_v22 = vld [vmem:[#allocation15 + $0x78] sm:$0xff]  }
 0x46e   :  { %5229 = vmatprep.subr.bf16.mxu1 %v7138_v24  ;;  %5393 = vmatprep.subr.bf16.mxu0 %v7141_v25  ;;  %v7201_v23 = vld [vmem:[#allocation15 + $0xf8] sm:$0xff]  }
 0x46f   :  { %v7202_v24 = vld [vmem:[#allocation15 + $0x38] sm:$0xff]  }
 0x470   :  { %v7203_v25 = vld [vmem:[#allocation15 + $0xb8] sm:$0xff]  }
 0x471   :  { %5230 = vmatpush1.bf16.msra.mxu1 %v7136_v27  ;;  %5394 = vmatpush1.bf16.msra.mxu0 %v7139_v28  ;;  %v3784_v27 = vld [vmem:[#allocation13] sm:$0xf] }
 0x472   :  { %5231 = vmatprep.subr.bf16.mxu1 %v7144_v53  ;;  %5395 = vmatprep.subr.bf16.mxu0 %v7147_v29  ;;  %v3789_v28 = vrot.slane %v3784_v27, %v7656_v56  ;;  %v3797_v53 = vrot.slane %v3784_v27, %v7664_v61  ;;  %v3793_v29 = vrot.slane %v3784_v27, %v7659_v58 }
 0x475   :  { %5232 = vmatpush1.bf16.msra.mxu1 %v7142_v30  ;;  %5396 = vmatpush1.bf16.msra.mxu0 %v7145_v19  ;;  %v3801_v30 = vrot.slane %v3784_v27, %v7724_v35 }
 0x476   :  { %5233 = vmatprep.subr.bf16.mxu1 %v7150_v33  ;;  %5397 = vmatprep.subr.bf16.mxu0 %v7153_v38 }
 0x479   :  { %5234 = vmatpush1.bf16.msra.mxu1 %v7148_v39  ;;  %5398 = vmatpush1.bf16.msra.mxu0 %v7151_v44 }
 0x47a   :  { %5235 = vmatprep.subr.bf16.mxu1 %v7156_v45  ;;  %5399 = vmatprep.subr.bf16.mxu0 %v7159_v46 }
 0x47d   :  { %5236 = vmatpush1.bf16.msra.mxu1 %v7154_v47  ;;  %5400 = vmatpush1.bf16.msra.mxu0 %v7157_v48 }
 0x47e   :  { %5237 = vmatprep.subr.bf16.mxu1 %v7162_v1  ;;  %5401 = vmatprep.subr.bf16.mxu0 %v7165_v49 }
 0x481   :  { %5238 = vmatpush1.bf16.msra.mxu1 %v7160_v50  ;;  %5402 = vmatpush1.bf16.msra.mxu0 %v7163_v52 }
 0x482   :  { %5239 = vmatprep.subr.bf16.mxu1 %v7168_v51  ;;  %5403 = vmatprep.subr.bf16.mxu0 %v7171_v54 }
 0x485   :  { %5240 = vmatpush1.bf16.msra.mxu1 %v7166_v34  ;;  %5404 = vmatpush1.bf16.msra.mxu0 %v7169_v59 }
 0x486   :  { %6492 = vmatprep.subr.bf16.mxu1 %v7172_v60  ;;  %6514 = vmatprep.subr.bf16.mxu0 %v7173_v62  ;;  %v6430_v62 = vld [vmem:[#allocation16] ss:$0 sm:$0xff] }
 0x488   :  { %5242 = vmatmul.mubr.bf16.vlgmr.msra.gmra.mrb[24].mxu1 %v3526_v3  ;;  %5406 = vmatmul.mubr.bf16.vlgmr.msra.gmra.mrb[16].mxu0 %v3526_v3 }
 0x489   :  { %6493 = vmatpush3.bf16.msra.mxu1 %v7174_v26  ;;  %6515 = vmatpush3.bf16.msra.mxu0 %v7175_v2 }
 0x48a   :  { %6494 = vmatprep.subr.bf16.mxu1 %v7176_v4  ;;  %6516 = vmatprep.subr.bf16.mxu0 %v7177_v5 }
 0x48d   :  { %6495 = vmatpush3.bf16.msra.mxu1 %v7178_v6  ;;  %6517 = vmatpush3.bf16.msra.mxu0 %v7179_v7 }
 0x48e   :  { %6496 = vmatprep.subr.bf16.mxu1 %v7180_v13  ;;  %6518 = vmatprep.subr.bf16.mxu0 %v7181_v8 }
 0x491   :  { %6497 = vmatpush3.bf16.msra.mxu1 %v7182_v9  ;;  %6519 = vmatpush3.bf16.msra.mxu0 %v7183_v10 }
 0x492   :  { %6498 = vmatprep.subr.bf16.mxu1 %v7184_v11  ;;  %6520 = vmatprep.subr.bf16.mxu0 %v7185_v12 }
 0x495   :  { %6499 = vmatpush3.bf16.msra.mxu1 %v7186_v14  ;;  %6521 = vmatpush3.bf16.msra.mxu0 %v7187_v32 }
 0x496   :  { %6500 = vmatprep.subr.bf16.mxu1 %v7188_v15  ;;  %6522 = vmatprep.subr.bf16.mxu0 %v7189_v31 }
 0x499   :  { %6501 = vmatpush3.bf16.msra.mxu1 %v7190_v16  ;;  %6523 = vmatpush3.bf16.msra.mxu0 %v7191_v17 }
 0x49a   :  { %6502 = vmatprep.subr.bf16.mxu1 %v7192_v18  ;;  %6524 = vmatprep.subr.bf16.mxu0 %v7193_v36 }
 0x49d   :  { %6503 = vmatpush3.bf16.msra.mxu1 %v7194_v37  ;;  %6525 = vmatpush3.bf16.msra.mxu0 %v7195_v40 }
 0x49e   :  { %6504 = vmatprep.subr.bf16.mxu1 %v7196_v43  ;;  %6526 = vmatprep.subr.bf16.mxu0 %v7197_v20 }
 0x4a1   :  { %6505 = vmatpush3.bf16.msra.mxu1 %v7198_v21  ;;  %6527 = vmatpush3.bf16.msra.mxu0 %v7199_v41 }
 0x4a2   :  { %6506 = vmatprep.subr.bf16.mxu1 %v7200_v22  ;;  %6528 = vmatprep.subr.bf16.mxu0 %v7201_v23 }
 0x4a5   :  { %6507 = vmatpush3.bf16.msra.mxu1 %v7202_v24  ;;  %6529 = vmatpush3.bf16.msra.mxu0 %v7203_v25 }
 0x55b   :  { %v5243_v19 = vpop.f32.mrb[24].mxu1  ;;  %v5407_v33 = vpop.f32.mrb[16].mxu0 }
 0x55c   :  { %v6574_v38 = vadd.f32 %v5243_v19, %v3789_v28  ;;  %v6576_v42 = vadd.f32 %v5407_v33, %v3797_v53  ;;  %v5245_v39 = vpop.f32.mrb[25].mxu1  ;;  %v5409_v44 = vpop.f32.mrb[17].mxu0 }
 0x55d   :  { %v6575_v45 = vadd.f32 %v5245_v39, %v3793_v29  ;;  %v6577_v46 = vadd.f32 %v5409_v44, %v3801_v30  ;;  %v5247_v0 = vpop.f32.mrb[26].mxu1  ;;  %v5411_v47 = vpop.f32.mrb[18].mxu0 }
 0x55e   :  { %vm5414_vm5 = vcmp.gt.f32.partialorder %v6574_v38, 0.0  ;;  %v5418_v48 = vmul.f32 0.01, %v6574_v38  ;;  %vm5416_vm6 = vcmp.gt.f32.partialorder %v6576_v42, 0.0  ;;  %v5420_v56 = vmul.f32 0.01, %v6576_v42 }
 0x55f   :  { %vm5415_vm7 = vcmp.gt.f32.partialorder %v6575_v45, 0.0  ;;  %v5419_v61 = vmul.f32 0.01, %v6575_v45  ;;  %vm5417_vm8 = vcmp.gt.f32.partialorder %v6577_v46, 0.0  ;;  %v5421_v58 = vmul.f32 0.01, %v6577_v46 }
 0x560   :  { %v5422_v1 = vsel %vm5414_vm5, %v6574_v38, %v5418_v48  ;;  %v5424_v35 = vsel %vm5416_vm6, %v6576_v42, %v5420_v56  ;;  %v5248_v49 = vpop.f32.mrb[27].mxu1  ;;  %v5412_v55 = vpop.f32.mrb[19].mxu0 }
 0x561   :  { %v5423_v50 = vsel %vm5415_vm7, %v6575_v45, %v5419_v61  ;;  %v5425_v52 = vsel %vm5417_vm8, %v6577_v46, %v5421_v58  ;;  %v5426_v57 = vpack.c.bf16 %v5422_v1, %v5422_v1  ;;  %v5428_v34 = vpack.c.bf16 %v5424_v35, %v5424_v35 }
 0x562   :  { %v5427_v51 = vpack.c.bf16 %v5423_v50, %v5423_v50  ;;  %v5429_v54 = vpack.c.bf16 %v5425_v52, %v5425_v52 }
 0x564   :  { %5725 = vmatprep.mubr.bf16.mxu1 %v5427_v51  ;;  %5765 = vmatprep.mubr.bf16.mxu0 %v5429_v54 }
 0x565   :  { %5726 = vmatmul.mubr.bf16.vlgmr.msra.gmra.mrb[28].mxu1 %v5426_v57  ;;  %5766 = vmatmul.mubr.bf16.vlgmr.msra.gmra.mrb[20].mxu0 %v5428_v34 }
 0x638   :  { %v6508_v59 = vpop.f32.mrb[28].mxu1  ;;  %v6530_v60 = vpop.f32.mrb[20].mxu0 }
 0x639   :  { %v6509_v63 = vpop.f32.mrb[29].mxu1  ;;  %v6531_v26 = vpop.f32.mrb[21].mxu0 }
 0x63a   :  { %v6510_v2 = vadd.f32 %v6509_v63, %v6508_v59  ;;  %v6532_v3 = vadd.f32 %v6531_v26, %v6530_v60  ;;  %v6511_v4 = vpop.f32.mrb[30].mxu1  ;;  %v6533_v5 = vpop.f32.mrb[22].mxu0 }
 0x63b   :  { %v6512_v6 = vpop.f32.mrb[31].mxu1  ;;  %v6534_v7 = vpop.f32.mrb[23].mxu0 }
 0x63c   :  { %v5728_v13 = vadd.f32 %v6510_v2, %v6430_v62 }
 0x63e   :  { %v5768_v8 = vadd.f32 %v6532_v3, %v5728_v13 }
 0x640   :  { %5773 = vst [vmem:[%s7808_s11] sm:$0xff] %v5768_v8 }
 0x641   :  { %5778 = vsyncpa [#allocation3], 1 }
 0x642   :  { %5779 = vsyncpa [#allocation5], 1 }
 0x643   :  { %5780 = vsyncpa [#allocation8], 1 }
 0x644   :  { %5781 = vsyncpa [#allocation11], 1 }
 0x645   :  { %5782 = vsyncpa [#allocation14], 1 }
 0x646   :  { %5783 = vsyncpa [#allocation17], 1 }

</bundles_post_ra>
